<compile_context>
chip_gen: v6e
topology: v6e:2x2x1
jax: 0.10.0
libtpu: 0.0.40
codegen_flags: <defaults>
</compile_context>

<pallas_src>
import math
from functools import partial

import jax
import jax.numpy as jnp
from jax.experimental import pallas as pl
from jax.experimental.pallas import tpu as pltpu

BN_EPS = 1e-5
NUM_CLASSES = 11

_VMEM = pl.BlockSpec(memory_space=pltpu.MemorySpace.VMEM)


def _round_up(x, m):
    return (x + m - 1) // m * m


# ---------------------------------------------------------------------------
# Pallas kernels
# ---------------------------------------------------------------------------
def _conv_bn_relu_kernel(cols_ref, w_ref, b_ref, g_ref, beta_ref, o_ref, *,
                         input_relu, eps):
    """Fused (optional input ReLU) + im2col-matmul + bias + BatchNorm + ReLU.

    cols_ref: (M, K) bf16   w_ref: (K, C) bf16
    b/g/beta: (1, C) f32    o_ref: (M, C) bf16
    BatchNorm uses training-mode batch statistics over the M = N*H*W rows,
    computed in f32 with a centered (numerically stable) variance.
    """
    a = cols_ref[...]
    if input_relu:                       # relu() applied to the layer input
        a = jnp.maximum(a, jnp.zeros_like(a))
    y = jnp.dot(a, w_ref[...], preferred_element_type=jnp.float32)
    y = y + b_ref[...]                   # conv bias, f32
    inv_m = 1.0 / y.shape[0]
    mean = jnp.sum(y, axis=0, keepdims=True) * inv_m
    d = y - mean
    var = jnp.sum(d * d, axis=0, keepdims=True) * inv_m
    scale = g_ref[...] * jax.lax.rsqrt(var + eps)
    o_ref[...] = jnp.maximum(d * scale + beta_ref[...], 0.0).astype(o_ref.dtype)


def _maxpool_kernel(x_ref, o_ref, *, n_taps):
    """Max over the n_taps pooling taps; x_ref: (n_taps, M, C)."""
    m = x_ref[0]
    for t in range(1, n_taps):
        m = jnp.maximum(m, x_ref[t])
    o_ref[...] = m


def _head_kernel(cols_ref, w3_ref, b3_ref, g3_ref, be3_ref,
                 wl2_ref, bl2_ref, wl3_ref, bl3_ref, o_ref, *, n_valid, eps):
    """Fused network head: conv_3 (1x1 spatial) + bn_3 + relu + linear_2 +
    relu + linear_3.  Rows are padded up to a sublane multiple; BN statistics
    are masked to the n_valid real batch rows."""
    a = cols_ref[...]                                              # (Mp, K3) bf16
    y = jnp.dot(a, w3_ref[...], preferred_element_type=jnp.float32) + b3_ref[...]
    row = jax.lax.broadcasted_iota(jnp.int32, y.shape, 0)
    valid = (row < n_valid).astype(jnp.float32)
    inv_n = 1.0 / n_valid
    mean = jnp.sum(y * valid, axis=0, keepdims=True) * inv_n
    d = y - mean
    var = jnp.sum(d * d * valid, axis=0, keepdims=True) * inv_n
    h = jnp.maximum(d * (g3_ref[...] * jax.lax.rsqrt(var + eps)) + be3_ref[...],
                    0.0)                                           # bn_3 + relu
    h2 = jnp.dot(h.astype(jnp.bfloat16), wl2_ref[...],
                 preferred_element_type=jnp.float32) + bl2_ref[...]
    h2 = jnp.maximum(h2, 0.0)                                      # linear_2 + relu
    o_ref[...] = jnp.dot(h2.astype(jnp.bfloat16), wl3_ref[...],
                         preferred_element_type=jnp.float32) + bl3_ref[...]


# ---------------------------------------------------------------------------
# Wrappers (plain-JAX glue + pallas_call)
# ---------------------------------------------------------------------------
def conv_bn_relu(cols_bf16, w, b, gamma, beta, *, input_relu=False):
    M = cols_bf16.shape[0]
    C = w.shape[1]
    return pl.pallas_call(
        partial(_conv_bn_relu_kernel, input_relu=input_relu, eps=BN_EPS),
        out_shape=jax.ShapeDtypeStruct((M, C), jnp.bfloat16),
        in_specs=[_VMEM] * 5,
        out_specs=_VMEM,
    )(cols_bf16, w, b, gamma, beta)


def maxpool(x, k):
    """MaxPool2d((k, k)), stride k, no padding, on an NHWC tensor."""
    N, H, W, C = x.shape
    Ho, Wo = H // k, W // k
    xc = x[:, :Ho * k, :Wo * k, :]
    taps = xc.reshape(N, Ho, k, Wo, k, C).transpose(2, 4, 0, 1, 3, 5)
    taps = taps.reshape(k * k, N * Ho * Wo, C)         # single stacked buffer
    out = pl.pallas_call(
        partial(_maxpool_kernel, n_taps=k * k),
        out_shape=jax.ShapeDtypeStruct((N * Ho * Wo, C), x.dtype),
        in_specs=[_VMEM],
        out_specs=_VMEM,
    )(taps)
    return out.reshape(N, Ho, Wo, C)


def head(cols3, p):
    N = cols3.shape[0]
    Mp = _round_up(max(N, 8), 8)                       # sublane-aligned rows
    cols_p = jnp.pad(cols3, ((0, Mp - N), (0, 0)))
    out = pl.pallas_call(
        partial(_head_kernel, n_valid=N, eps=BN_EPS),
        out_shape=jax.ShapeDtypeStruct((Mp, NUM_CLASSES), jnp.float32),
        in_specs=[_VMEM] * 9,
        out_specs=_VMEM,
    )(cols_p, p["conv3_w"], p["conv3_b"], p["bn3_g"], p["bn3_b"],
      p["l2_w"], p["l2_b"], p["l3_w"], p["l3_b"])
    return out[:N]


def _im2col(x, kh, kw):
    """stride=1, padding=0 im2col on NHWC; column order (i, j, cin) matches
    the HWIO weight reshape used in init_params."""
    N, H, W, C = x.shape
    Ho, Wo = H - kh + 1, W - kw + 1
    patches = [x[:, i:i + Ho, j:j + Wo, :] for i in range(kh) for j in range(kw)]
    cols = jnp.stack(patches, axis=3).reshape(N * Ho * Wo, kh * kw * C)
    return cols, Ho, Wo


# ---------------------------------------------------------------------------
# Parameters (deterministic, PyTorch-default-style init)
# ---------------------------------------------------------------------------
def init_params(key):
    keys = jax.random.split(key, 5)

    def _conv(k, kh, kw, cin, cout):
        # PyTorch Conv2d default: U(-1/sqrt(fan_in), 1/sqrt(fan_in)) for w & b.
        fan_in = cin * kh * kw
        bound = 1.0 / math.sqrt(fan_in)
        wk, bk = jax.random.split(k)
        w = jax.random.uniform(wk, (kh, kw, cin, cout), jnp.float32,
                               minval=-bound, maxval=bound)
        b = jax.random.uniform(bk, (1, cout), jnp.float32,
                               minval=-bound, maxval=bound)
        return w.reshape(kh * kw * cin, cout).astype(jnp.bfloat16), b

    def _linear(k, cin, cout):
        bound = 1.0 / math.sqrt(cin)
        wk, bk = jax.random.split(k)
        w = jax.random.uniform(wk, (cin, cout), jnp.float32,
                               minval=-bound, maxval=bound)
        b = jax.random.uniform(bk, (1, cout), jnp.float32,
                               minval=-bound, maxval=bound)
        return w.astype(jnp.bfloat16), b

    p = {}
    p["conv1_w"], p["conv1_b"] = _conv(keys[0], 3, 3, 20, 30)
    p["bn1_g"], p["bn1_b"] = (jnp.ones((1, 30), jnp.float32),
                              jnp.zeros((1, 30), jnp.float32))
    p["conv2_w"], p["conv2_b"] = _conv(keys[1], 3, 3, 30, 40)
    p["bn2_g"], p["bn2_b"] = (jnp.ones((1, 40), jnp.float32),
                              jnp.zeros((1, 40), jnp.float32))
    p["conv3_w"], p["conv3_b"] = _conv(keys[2], 2, 2, 40, 60)
    p["bn3_g"], p["bn3_b"] = (jnp.ones((1, 60), jnp.float32),
                              jnp.zeros((1, 60), jnp.float32))
    p["l2_w"], p["l2_b"] = _linear(keys[3], 60, 30)
    p["l3_w"], p["l3_b"] = _linear(keys[4], 30, 11)
    return p


# ---------------------------------------------------------------------------
# Forward pass (shrinkage.forward, partial=True branch)
# ---------------------------------------------------------------------------
def shrinkage_forward(params, x_nchw):
    x = jnp.transpose(x_nchw, (0, 2, 3, 1)).astype(jnp.float32)   # NCHW -> NHWC
    N = x.shape[0]

    # relu(x) is fused into the conv_1 kernel (input_relu=True).
    cols, Ho, Wo = _im2col(x, 3, 3)
    y = conv_bn_relu(cols.astype(jnp.bfloat16),
                     params["conv1_w"], params["conv1_b"],
                     params["bn1_g"], params["bn1_b"], input_relu=True)
    y = y.reshape(N, Ho, Wo, -1)
    y = maxpool(y, 2)                                             # mp_1

    cols, Ho, Wo = _im2col(y, 3, 3)                               # already bf16
    y = conv_bn_relu(cols, params["conv2_w"], params["conv2_b"],
                     params["bn2_g"], params["bn2_b"])
    y = y.reshape(N, Ho, Wo, -1)
    y = maxpool(y, 3)                                             # mp_2 -> (N,2,2,40)

    # conv_3 has a 2x2 kernel on a 2x2 input, so its im2col is a pure flatten;
    # the fused head kernel finishes conv_3+bn_3+relu+linear_2+relu+linear_3.
    cols3 = y.reshape(N, -1)                                      # (N, 160)
    return head(cols3, params)                                    # (N, 11) f32


# ---------------------------------------------------------------------------
# Main
# ---------------------------------------------------------------------------
if __name__ == "__main__":
    key = jax.random.PRNGKey(0)
    pkey, xkey = jax.random.split(key)
    params = init_params(pkey)

    # Input consistent with the module: the SURE stage in the reference code is
    # constructed for (N=2, C=20, 22, 22) activations; 22x22 reduces exactly to
    # 1x1 spatial at conv_3 (20x20 -> mp 10x10 -> 8x8 -> mp 2x2 -> 1x1).
    x = jax.random.normal(xkey, (2, 20, 22, 22), jnp.float32)

    fwd = jax.jit(shrinkage_forward)
    logits = jax.block_until_ready(fwd(params, x))

    assert logits.shape == (2, NUM_CLASSES), logits.shape
    assert bool(jnp.all(jnp.isfinite(logits)))
    print("KERNEL_OK")
</pallas_src>

<mosaic_0001>
module attributes {stable_mosaic.version = 11 : i64} {
  func.func @_conv_bn_relu_kernel(%arg0: memref<800x180xbf16, #tpu.memory_space<vmem>>, %arg1: memref<180x30xbf16, #tpu.memory_space<vmem>>, %arg2: memref<1x30xf32, #tpu.memory_space<vmem>>, %arg3: memref<1x30xf32, #tpu.memory_space<vmem>>, %arg4: memref<1x30xf32, #tpu.memory_space<vmem>>, %arg5: memref<800x30xbf16, #tpu.memory_space<vmem>>) attributes {dimension_semantics = [], scalar_prefetch = 0 : i64, scratch_operands = 0 : i64, tpu.core_type = #tpu.core_type<tc>} {
    %c0 = arith.constant 0 : index
    %c0_0 = arith.constant 0 : index
    %0 = vector.load %arg0[%c0, %c0_0] : memref<800x180xbf16, #tpu.memory_space<vmem>>, vector<800x180xbf16>
    %cst = arith.constant 0.000000e+00 : bf16
    %1 = vector.broadcast %cst : bf16 to vector<800x180xbf16>
    %2 = arith.maximumf %0, %1 : vector<800x180xbf16>
    %c0_1 = arith.constant 0 : index
    %c0_2 = arith.constant 0 : index
    %3 = vector.load %arg1[%c0_1, %c0_2] : memref<180x30xbf16, #tpu.memory_space<vmem>>, vector<180x30xbf16>
    %cst_3 = arith.constant dense<0.000000e+00> : vector<800x30xf32>
    %4 = tpu.matmul %2, %3, %cst_3 {dimension_numbers = #tpu.dot_dimension_numbers<[1], [0], [0], [1], [0, 0, 1, 1], [], []>} : vector<800x180xbf16>, vector<180x30xbf16>, vector<800x30xf32> -> vector<800x30xf32>
    %c0_4 = arith.constant 0 : index
    %c0_5 = arith.constant 0 : index
    %5 = vector.load %arg2[%c0_4, %c0_5] : memref<1x30xf32, #tpu.memory_space<vmem>>, vector<1x30xf32>
    %6 = vector.broadcast %5 : vector<1x30xf32> to vector<800x30xf32>
    %7 = arith.addf %4, %6 : vector<800x30xf32>
    %cst_6 = arith.constant dense<0.000000e+00> : vector<30xf32>
    %8 = vector.multi_reduction <add>, %7, %cst_6 [0] : vector<800x30xf32> to vector<30xf32>
    %9 = vector.shape_cast %8 : vector<30xf32> to vector<1x30xf32>
    %cst_7 = arith.constant 1.250000e-03 : f32
    %10 = vector.broadcast %cst_7 : f32 to vector<1x30xf32>
    %11 = arith.mulf %9, %10 : vector<1x30xf32>
    %12 = vector.broadcast %11 : vector<1x30xf32> to vector<800x30xf32>
    %13 = arith.subf %7, %12 : vector<800x30xf32>
    %14 = arith.mulf %13, %13 : vector<800x30xf32>
    %cst_8 = arith.constant dense<0.000000e+00> : vector<30xf32>
    %15 = vector.multi_reduction <add>, %14, %cst_8 [0] : vector<800x30xf32> to vector<30xf32>
    %16 = vector.shape_cast %15 : vector<30xf32> to vector<1x30xf32>
    %cst_9 = arith.constant 1.250000e-03 : f32
    %17 = vector.broadcast %cst_9 : f32 to vector<1x30xf32>
    %18 = arith.mulf %16, %17 : vector<1x30xf32>
    %c0_10 = arith.constant 0 : index
    %c0_11 = arith.constant 0 : index
    %19 = vector.load %arg3[%c0_10, %c0_11] : memref<1x30xf32, #tpu.memory_space<vmem>>, vector<1x30xf32>
    %cst_12 = arith.constant 9.99999974E-6 : f32
    %20 = vector.broadcast %cst_12 : f32 to vector<1x30xf32>
    %21 = arith.addf %18, %20 : vector<1x30xf32>
    %22 = math.rsqrt %21 : vector<1x30xf32>
    %23 = arith.mulf %19, %22 : vector<1x30xf32>
    %24 = vector.broadcast %23 : vector<1x30xf32> to vector<800x30xf32>
    %25 = arith.mulf %13, %24 : vector<800x30xf32>
    %c0_13 = arith.constant 0 : index
    %c0_14 = arith.constant 0 : index
    %26 = vector.load %arg4[%c0_13, %c0_14] : memref<1x30xf32, #tpu.memory_space<vmem>>, vector<1x30xf32>
    %27 = vector.broadcast %26 : vector<1x30xf32> to vector<800x30xf32>
    %28 = arith.addf %25, %27 : vector<800x30xf32>
    %cst_15 = arith.constant 0.000000e+00 : f32
    %29 = vector.broadcast %cst_15 : f32 to vector<800x30xf32>
    %30 = arith.maximumf %28, %29 : vector<800x30xf32>
    %31 = arith.truncf %30 : vector<800x30xf32> to vector<800x30xbf16>
    %c0_16 = arith.constant 0 : index
    %c0_17 = arith.constant 0 : index
    %32 = vector.load %arg5[%c0_16, %c0_17] : memref<800x30xbf16, #tpu.memory_space<vmem>>, vector<800x30xbf16>
    tpu.vector_store %arg5[%c0_16, %c0_17], %31 {strides = array<i32>} : memref<800x30xbf16, #tpu.memory_space<vmem>>, vector<800x30xbf16>,
    return
  }
}

module attributes {stable_mosaic.version = 11 : i64} {
  func.func @_maxpool_kernel(%arg0: memref<4x200x30xbf16, #tpu.memory_space<vmem>>, %arg1: memref<200x30xbf16, #tpu.memory_space<vmem>>) attributes {dimension_semantics = [], scalar_prefetch = 0 : i64, scratch_operands = 0 : i64, tpu.core_type = #tpu.core_type<tc>} {
    %c0 = arith.constant 0 : index
    %c0_0 = arith.constant 0 : index
    %c0_1 = arith.constant 0 : index
    %0 = vector.load %arg0[%c0, %c0_0, %c0_1] : memref<4x200x30xbf16, #tpu.memory_space<vmem>>, vector<1x200x30xbf16>
    %1 = vector.shape_cast %0 : vector<1x200x30xbf16> to vector<200x30xbf16>
    %c1 = arith.constant 1 : index
    %c0_2 = arith.constant 0 : index
    %c0_3 = arith.constant 0 : index
    %2 = vector.load %arg0[%c1, %c0_2, %c0_3] : memref<4x200x30xbf16, #tpu.memory_space<vmem>>, vector<1x200x30xbf16>
    %3 = vector.shape_cast %2 : vector<1x200x30xbf16> to vector<200x30xbf16>
    %4 = arith.maximumf %1, %3 : vector<200x30xbf16>
    %c2 = arith.constant 2 : index
    %c0_4 = arith.constant 0 : index
    %c0_5 = arith.constant 0 : index
    %5 = vector.load %arg0[%c2, %c0_4, %c0_5] : memref<4x200x30xbf16, #tpu.memory_space<vmem>>, vector<1x200x30xbf16>
    %6 = vector.shape_cast %5 : vector<1x200x30xbf16> to vector<200x30xbf16>
    %7 = arith.maximumf %4, %6 : vector<200x30xbf16>
    %c3 = arith.constant 3 : index
    %c0_6 = arith.constant 0 : index
    %c0_7 = arith.constant 0 : index
    %8 = vector.load %arg0[%c3, %c0_6, %c0_7] : memref<4x200x30xbf16, #tpu.memory_space<vmem>>, vector<1x200x30xbf16>
    %9 = vector.shape_cast %8 : vector<1x200x30xbf16> to vector<200x30xbf16>
    %10 = arith.maximumf %7, %9 : vector<200x30xbf16>
    %c0_8 = arith.constant 0 : index
    %c0_9 = arith.constant 0 : index
    %11 = vector.load %arg1[%c0_8, %c0_9] : memref<200x30xbf16, #tpu.memory_space<vmem>>, vector<200x30xbf16>
    tpu.vector_store %arg1[%c0_8, %c0_9], %10 {strides = array<i32>} : memref<200x30xbf16, #tpu.memory_space<vmem>>, vector<200x30xbf16>,
    return
  }
}

module attributes {stable_mosaic.version = 11 : i64} {
  func.func @_conv_bn_relu_kernel(%arg0: memref<128x270xbf16, #tpu.memory_space<vmem>>, %arg1: memref<270x40xbf16, #tpu.memory_space<vmem>>, %arg2: memref<1x40xf32, #tpu.memory_space<vmem>>, %arg3: memref<1x40xf32, #tpu.memory_space<vmem>>, %arg4: memref<1x40xf32, #tpu.memory_space<vmem>>, %arg5: memref<128x40xbf16, #tpu.memory_space<vmem>>) attributes {dimension_semantics = [], scalar_prefetch = 0 : i64, scratch_operands = 0 : i64, tpu.core_type = #tpu.core_type<tc>} {
    %c0 = arith.constant 0 : index
    %c0_0 = arith.constant 0 : index
    %0 = vector.load %arg0[%c0, %c0_0] : memref<128x270xbf16, #tpu.memory_space<vmem>>, vector<128x270xbf16>
    %c0_1 = arith.constant 0 : index
    %c0_2 = arith.constant 0 : index
    %1 = vector.load %arg1[%c0_1, %c0_2] : memref<270x40xbf16, #tpu.memory_space<vmem>>, vector<270x40xbf16>
    %cst = arith.constant dense<0.000000e+00> : vector<128x40xf32>
    %2 = tpu.matmul %0, %1, %cst {dimension_numbers = #tpu.dot_dimension_numbers<[1], [0], [0], [1], [0, 0, 1, 1], [], []>} : vector<128x270xbf16>, vector<270x40xbf16>, vector<128x40xf32> -> vector<128x40xf32>
    %c0_3 = arith.constant 0 : index
    %c0_4 = arith.constant 0 : index
    %3 = vector.load %arg2[%c0_3, %c0_4] : memref<1x40xf32, #tpu.memory_space<vmem>>, vector<1x40xf32>
    %4 = vector.broadcast %3 : vector<1x40xf32> to vector<128x40xf32>
    %5 = arith.addf %2, %4 : vector<128x40xf32>
    %cst_5 = arith.constant dense<0.000000e+00> : vector<40xf32>
    %6 = vector.multi_reduction <add>, %5, %cst_5 [0] : vector<128x40xf32> to vector<40xf32>
    %7 = vector.shape_cast %6 : vector<40xf32> to vector<1x40xf32>
    %cst_6 = arith.constant 7.812500e-03 : f32
    %8 = vector.broadcast %cst_6 : f32 to vector<1x40xf32>
    %9 = arith.mulf %7, %8 : vector<1x40xf32>
    %10 = vector.broadcast %9 : vector<1x40xf32> to vector<128x40xf32>
    %11 = arith.subf %5, %10 : vector<128x40xf32>
    %12 = arith.mulf %11, %11 : vector<128x40xf32>
    %cst_7 = arith.constant dense<0.000000e+00> : vector<40xf32>
    %13 = vector.multi_reduction <add>, %12, %cst_7 [0] : vector<128x40xf32> to vector<40xf32>
    %14 = vector.shape_cast %13 : vector<40xf32> to vector<1x40xf32>
    %cst_8 = arith.constant 7.812500e-03 : f32
    %15 = vector.broadcast %cst_8 : f32 to vector<1x40xf32>
    %16 = arith.mulf %14, %15 : vector<1x40xf32>
    %c0_9 = arith.constant 0 : index
    %c0_10 = arith.constant 0 : index
    %17 = vector.load %arg3[%c0_9, %c0_10] : memref<1x40xf32, #tpu.memory_space<vmem>>, vector<1x40xf32>
    %cst_11 = arith.constant 9.99999974E-6 : f32
    %18 = vector.broadcast %cst_11 : f32 to vector<1x40xf32>
    %19 = arith.addf %16, %18 : vector<1x40xf32>
    %20 = math.rsqrt %19 : vector<1x40xf32>
    %21 = arith.mulf %17, %20 : vector<1x40xf32>
    %22 = vector.broadcast %21 : vector<1x40xf32> to vector<128x40xf32>
    %23 = arith.mulf %11, %22 : vector<128x40xf32>
    %c0_12 = arith.constant 0 : index
    %c0_13 = arith.constant 0 : index
    %24 = vector.load %arg4[%c0_12, %c0_13] : memref<1x40xf32, #tpu.memory_space<vmem>>, vector<1x40xf32>
    %25 = vector.broadcast %24 : vector<1x40xf32> to vector<128x40xf32>
    %26 = arith.addf %23, %25 : vector<128x40xf32>
    %cst_14 = arith.constant 0.000000e+00 : f32
    %27 = vector.broadcast %cst_14 : f32 to vector<128x40xf32>
    %28 = arith.maximumf %26, %27 : vector<128x40xf32>
    %29 = arith.truncf %28 : vector<128x40xf32> to vector<128x40xbf16>
    %c0_15 = arith.constant 0 : index
    %c0_16 = arith.constant 0 : index
    %30 = vector.load %arg5[%c0_15, %c0_16] : memref<128x40xbf16, #tpu.memory_space<vmem>>, vector<128x40xbf16>
    tpu.vector_store %arg5[%c0_15, %c0_16], %29 {strides = array<i32>} : memref<128x40xbf16, #tpu.memory_space<vmem>>, vector<128x40xbf16>,
    return
  }
}

module attributes {stable_mosaic.version = 11 : i64} {
  func.func @_maxpool_kernel(%arg0: memref<9x8x40xbf16, #tpu.memory_space<vmem>>, %arg1: memref<8x40xbf16, #tpu.memory_space<vmem>>) attributes {dimension_semantics = [], scalar_prefetch = 0 : i64, scratch_operands = 0 : i64, tpu.core_type = #tpu.core_type<tc>} {
    %c0 = arith.constant 0 : index
    %c0_0 = arith.constant 0 : index
    %c0_1 = arith.constant 0 : index
    %0 = vector.load %arg0[%c0, %c0_0, %c0_1] : memref<9x8x40xbf16, #tpu.memory_space<vmem>>, vector<1x8x40xbf16>
    %1 = vector.shape_cast %0 : vector<1x8x40xbf16> to vector<8x40xbf16>
    %c1 = arith.constant 1 : index
    %c0_2 = arith.constant 0 : index
    %c0_3 = arith.constant 0 : index
    %2 = vector.load %arg0[%c1, %c0_2, %c0_3] : memref<9x8x40xbf16, #tpu.memory_space<vmem>>, vector<1x8x40xbf16>
    %3 = vector.shape_cast %2 : vector<1x8x40xbf16> to vector<8x40xbf16>
    %4 = arith.maximumf %1, %3 : vector<8x40xbf16>
    %c2 = arith.constant 2 : index
    %c0_4 = arith.constant 0 : index
    %c0_5 = arith.constant 0 : index
    %5 = vector.load %arg0[%c2, %c0_4, %c0_5] : memref<9x8x40xbf16, #tpu.memory_space<vmem>>, vector<1x8x40xbf16>
    %6 = vector.shape_cast %5 : vector<1x8x40xbf16> to vector<8x40xbf16>
    %7 = arith.maximumf %4, %6 : vector<8x40xbf16>
    %c3 = arith.constant 3 : index
    %c0_6 = arith.constant 0 : index
    %c0_7 = arith.constant 0 : index
    %8 = vector.load %arg0[%c3, %c0_6, %c0_7] : memref<9x8x40xbf16, #tpu.memory_space<vmem>>, vector<1x8x40xbf16>
    %9 = vector.shape_cast %8 : vector<1x8x40xbf16> to vector<8x40xbf16>
    %10 = arith.maximumf %7, %9 : vector<8x40xbf16>
    %c4 = arith.constant 4 : index
    %c0_8 = arith.constant 0 : index
    %c0_9 = arith.constant 0 : index
    %11 = vector.load %arg0[%c4, %c0_8, %c0_9] : memref<9x8x40xbf16, #tpu.memory_space<vmem>>, vector<1x8x40xbf16>
    %12 = vector.shape_cast %11 : vector<1x8x40xbf16> to vector<8x40xbf16>
    %13 = arith.maximumf %10, %12 : vector<8x40xbf16>
    %c5 = arith.constant 5 : index
    %c0_10 = arith.constant 0 : index
    %c0_11 = arith.constant 0 : index
    %14 = vector.load %arg0[%c5, %c0_10, %c0_11] : memref<9x8x40xbf16, #tpu.memory_space<vmem>>, vector<1x8x40xbf16>
    %15 = vector.shape_cast %14 : vector<1x8x40xbf16> to vector<8x40xbf16>
    %16 = arith.maximumf %13, %15 : vector<8x40xbf16>
    %c6 = arith.constant 6 : index
    %c0_12 = arith.constant 0 : index
    %c0_13 = arith.constant 0 : index
    %17 = vector.load %arg0[%c6, %c0_12, %c0_13] : memref<9x8x40xbf16, #tpu.memory_space<vmem>>, vector<1x8x40xbf16>
    %18 = vector.shape_cast %17 : vector<1x8x40xbf16> to vector<8x40xbf16>
    %19 = arith.maximumf %16, %18 : vector<8x40xbf16>
    %c7 = arith.constant 7 : index
    %c0_14 = arith.constant 0 : index
    %c0_15 = arith.constant 0 : index
    %20 = vector.load %arg0[%c7, %c0_14, %c0_15] : memref<9x8x40xbf16, #tpu.memory_space<vmem>>, vector<1x8x40xbf16>
    %21 = vector.shape_cast %20 : vector<1x8x40xbf16> to vector<8x40xbf16>
    %22 = arith.maximumf %19, %21 : vector<8x40xbf16>
    %c8 = arith.constant 8 : index
    %c0_16 = arith.constant 0 : index
    %c0_17 = arith.constant 0 : index
    %23 = vector.load %arg0[%c8, %c0_16, %c0_17] : memref<9x8x40xbf16, #tpu.memory_space<vmem>>, vector<1x8x40xbf16>
    %24 = vector.shape_cast %23 : vector<1x8x40xbf16> to vector<8x40xbf16>
    %25 = arith.maximumf %22, %24 : vector<8x40xbf16>
    %c0_18 = arith.constant 0 : index
    %c0_19 = arith.constant 0 : index
    %26 = vector.load %arg1[%c0_18, %c0_19] : memref<8x40xbf16, #tpu.memory_space<vmem>>, vector<8x40xbf16>
    tpu.vector_store %arg1[%c0_18, %c0_19], %25 {strides = array<i32>} : memref<8x40xbf16, #tpu.memory_space<vmem>>, vector<8x40xbf16>,
    return
  }
}

module attributes {stable_mosaic.version = 11 : i64} {
  func.func @_head_kernel(%arg0: memref<8x160xbf16, #tpu.memory_space<vmem>>, %arg1: memref<160x60xbf16, #tpu.memory_space<vmem>>, %arg2: memref<1x60xf32, #tpu.memory_space<vmem>>, %arg3: memref<1x60xf32, #tpu.memory_space<vmem>>, %arg4: memref<1x60xf32, #tpu.memory_space<vmem>>, %arg5: memref<60x30xbf16, #tpu.memory_space<vmem>>, %arg6: memref<1x30xf32, #tpu.memory_space<vmem>>, %arg7: memref<30x11xbf16, #tpu.memory_space<vmem>>, %arg8: memref<1x11xf32, #tpu.memory_space<vmem>>, %arg9: memref<8x11xf32, #tpu.memory_space<vmem>>) attributes {dimension_semantics = [], scalar_prefetch = 0 : i64, scratch_operands = 0 : i64, tpu.core_type = #tpu.core_type<tc>} {
    %c0 = arith.constant 0 : index
    %c0_0 = arith.constant 0 : index
    %0 = vector.load %arg0[%c0, %c0_0] : memref<8x160xbf16, #tpu.memory_space<vmem>>, vector<8x160xbf16>
    %c0_1 = arith.constant 0 : index
    %c0_2 = arith.constant 0 : index
    %1 = vector.load %arg1[%c0_1, %c0_2] : memref<160x60xbf16, #tpu.memory_space<vmem>>, vector<160x60xbf16>
    %cst = arith.constant dense<0.000000e+00> : vector<8x60xf32>
    %2 = tpu.matmul %0, %1, %cst {dimension_numbers = #tpu.dot_dimension_numbers<[1], [0], [0], [1], [0, 0, 1, 1], [], []>} : vector<8x160xbf16>, vector<160x60xbf16>, vector<8x60xf32> -> vector<8x60xf32>
    %c0_3 = arith.constant 0 : index
    %c0_4 = arith.constant 0 : index
    %3 = vector.load %arg2[%c0_3, %c0_4] : memref<1x60xf32, #tpu.memory_space<vmem>>, vector<1x60xf32>
    %4 = vector.broadcast %3 : vector<1x60xf32> to vector<8x60xf32>
    %5 = arith.addf %2, %4 : vector<8x60xf32>
    %6 = tpu.iota {dimensions = array<i32: 0>} : vector<8x60xi32>
    %c2_i32 = arith.constant 2 : i32
    %7 = vector.broadcast %c2_i32 : i32 to vector<8x60xi32>
    %8 = arith.cmpi slt, %6, %7 : vector<8x60xi32>
    %9 = arith.extui %8 : vector<8x60xi1> to vector<8x60xi32>
    %10 = arith.sitofp %9 : vector<8x60xi32> to vector<8x60xf32>
    %11 = arith.mulf %5, %10 : vector<8x60xf32>
    %cst_5 = arith.constant dense<0.000000e+00> : vector<60xf32>
    %12 = vector.multi_reduction <add>, %11, %cst_5 [0] : vector<8x60xf32> to vector<60xf32>
    %13 = vector.shape_cast %12 : vector<60xf32> to vector<1x60xf32>
    %cst_6 = arith.constant 5.000000e-01 : f32
    %14 = vector.broadcast %cst_6 : f32 to vector<1x60xf32>
    %15 = arith.mulf %13, %14 : vector<1x60xf32>
    %16 = vector.broadcast %15 : vector<1x60xf32> to vector<8x60xf32>
    %17 = arith.subf %5, %16 : vector<8x60xf32>
    %18 = arith.mulf %17, %17 : vector<8x60xf32>
    %19 = arith.mulf %18, %10 : vector<8x60xf32>
    %cst_7 = arith.constant dense<0.000000e+00> : vector<60xf32>
    %20 = vector.multi_reduction <add>, %19, %cst_7 [0] : vector<8x60xf32> to vector<60xf32>
    %21 = vector.shape_cast %20 : vector<60xf32> to vector<1x60xf32>
    %cst_8 = arith.constant 5.000000e-01 : f32
    %22 = vector.broadcast %cst_8 : f32 to vector<1x60xf32>
    %23 = arith.mulf %21, %22 : vector<1x60xf32>
    %c0_9 = arith.constant 0 : index
    %c0_10 = arith.constant 0 : index
    %24 = vector.load %arg3[%c0_9, %c0_10] : memref<1x60xf32, #tpu.memory_space<vmem>>, vector<1x60xf32>
    %cst_11 = arith.constant 9.99999974E-6 : f32
    %25 = vector.broadcast %cst_11 : f32 to vector<1x60xf32>
    %26 = arith.addf %23, %25 : vector<1x60xf32>
    %27 = math.rsqrt %26 : vector<1x60xf32>
    %28 = arith.mulf %24, %27 : vector<1x60xf32>
    %29 = vector.broadcast %28 : vector<1x60xf32> to vector<8x60xf32>
    %30 = arith.mulf %17, %29 : vector<8x60xf32>
    %c0_12 = arith.constant 0 : index
    %c0_13 = arith.constant 0 : index
    %31 = vector.load %arg4[%c0_12, %c0_13] : memref<1x60xf32, #tpu.memory_space<vmem>>, vector<1x60xf32>
    %32 = vector.broadcast %31 : vector<1x60xf32> to vector<8x60xf32>
    %33 = arith.addf %30, %32 : vector<8x60xf32>
    %cst_14 = arith.constant 0.000000e+00 : f32
    %34 = vector.broadcast %cst_14 : f32 to vector<8x60xf32>
    %35 = arith.maximumf %33, %34 : vector<8x60xf32>
    %36 = arith.truncf %35 : vector<8x60xf32> to vector<8x60xbf16>
    %c0_15 = arith.constant 0 : index
    %c0_16 = arith.constant 0 : index
    %37 = vector.load %arg5[%c0_15, %c0_16] : memref<60x30xbf16, #tpu.memory_space<vmem>>, vector<60x30xbf16>
    %cst_17 = arith.constant dense<0.000000e+00> : vector<8x30xf32>
    %38 = tpu.matmul %36, %37, %cst_17 {dimension_numbers = #tpu.dot_dimension_numbers<[1], [0], [0], [1], [0, 0, 1, 1], [], []>} : vector<8x60xbf16>, vector<60x30xbf16>, vector<8x30xf32> -> vector<8x30xf32>
    %c0_18 = arith.constant 0 : index
    %c0_19 = arith.constant 0 : index
    %39 = vector.load %arg6[%c0_18, %c0_19] : memref<1x30xf32, #tpu.memory_space<vmem>>, vector<1x30xf32>
    %40 = vector.broadcast %39 : vector<1x30xf32> to vector<8x30xf32>
    %41 = arith.addf %38, %40 : vector<8x30xf32>
    %cst_20 = arith.constant 0.000000e+00 : f32
    %42 = vector.broadcast %cst_20 : f32 to vector<8x30xf32>
    %43 = arith.maximumf %41, %42 : vector<8x30xf32>
    %44 = arith.truncf %43 : vector<8x30xf32> to vector<8x30xbf16>
    %c0_21 = arith.constant 0 : index
    %c0_22 = arith.constant 0 : index
    %45 = vector.load %arg7[%c0_21, %c0_22] : memref<30x11xbf16, #tpu.memory_space<vmem>>, vector<30x11xbf16>
    %cst_23 = arith.constant dense<0.000000e+00> : vector<8x11xf32>
    %46 = tpu.matmul %44, %45, %cst_23 {dimension_numbers = #tpu.dot_dimension_numbers<[1], [0], [0], [1], [0, 0, 1, 1], [], []>} : vector<8x30xbf16>, vector<30x11xbf16>, vector<8x11xf32> -> vector<8x11xf32>
    %c0_24 = arith.constant 0 : index
    %c0_25 = arith.constant 0 : index
    %47 = vector.load %arg8[%c0_24, %c0_25] : memref<1x11xf32, #tpu.memory_space<vmem>>, vector<1x11xf32>
    %48 = vector.broadcast %47 : vector<1x11xf32> to vector<8x11xf32>
    %49 = arith.addf %46, %48 : vector<8x11xf32>
    %c0_26 = arith.constant 0 : index
    %c0_27 = arith.constant 0 : index
    %50 = vector.load %arg9[%c0_26, %c0_27] : memref<8x11xf32, #tpu.memory_space<vmem>>, vector<8x11xf32>
    tpu.vector_store %arg9[%c0_26, %c0_27], %49 {strides = array<i32>} : memref<8x11xf32, #tpu.memory_space<vmem>>, vector<8x11xf32>,
    return
  }
}

</mosaic_0001>

<bundles_post_ra>
// kernel: shrinkage_forward.6
= control target key start
LH: loop header
LB: loop body
LE: loop exit
PB: predicated region body
PF: predicated region fallthrough
CT: control target
= control target key end

     0   :  { %vm186_vm0 = vcmask 240640   ;;  %s701_s0 = inlined_call_operand.vmem [shape: bf16[4,200,30], index: 0, kind: input, shape index: {}]   ;;  %s702_s1 = inlined_call_operand.vmem [shape: bf16[200,30], index: 1, kind: output, shape index: {}]  }
   0x1   :  { %v8_v0 = vld [vmem:[%s701_s0] sm:$0xf]  ;;  %v216_v1 = vld [vmem:[%s701_s0 + $0x64] sm:$0xf]  ;;  %v241_v2 = vld [vmem:[%s701_s0 + $0xc8] sm:$0xf] }
   0x2   :  { %v59_v3 = vmax.bf16 %v216_v1, %v8_v0  ;;  %v9_v4 = vld [vmem:[%s701_s0 + $0x4] sm:$0xf]  ;;  %v217_v5 = vld [vmem:[%s701_s0 + $0x68] sm:$0xf]  ;;  %v266_v6 = vld [vmem:[%s701_s0 + $0x12c] sm:$0xf] }
   0x3   :  { %v60_v7 = vmax.bf16 %v217_v5, %v9_v4  ;;  %v242_v8 = vld [vmem:[%s701_s0 + $0xcc] sm:$0xf]  ;;  %v10_v9 = vld [vmem:[%s701_s0 + $0x8] sm:$0xf]  ;;  %v267_v11 = vld [vmem:[%s701_s0 + $0x130] sm:$0xf] }
   0x4   :  { %v110_v10 = vmax.bf16 %v241_v2, %v59_v3  ;;  %v218_v12 = vld [vmem:[%s701_s0 + $0x6c] sm:$0xf]  ;;  %v243_v13 = vld [vmem:[%s701_s0 + $0xd0] sm:$0xf]  ;;  %v244_v18 = vld [vmem:[%s701_s0 + $0xd4] sm:$0xf] }
   0x5   :  { %v111_v14 = vmax.bf16 %v242_v8, %v60_v7  ;;  %v61_v15 = vmax.bf16 %v218_v12, %v10_v9  ;;  %v11_v16 = vld [vmem:[%s701_s0 + $0xc] sm:$0xf]  ;;  %v219_v17 = vld [vmem:[%s701_s0 + $0x70] sm:$0xf]  ;;  %v268_v20 = vld [vmem:[%s701_s0 + $0x134] sm:$0xf] }
   0x6   :  { %v161_v19 = vmax.bf16 %v266_v6, %v110_v10  ;;  %v62_v21 = vmax.bf16 %v219_v17, %v11_v16  ;;  %v12_v22 = vld [vmem:[%s701_s0 + $0x10] sm:$0xf]  ;;  %v220_v23 = vld [vmem:[%s701_s0 + $0x74] sm:$0xf]  ;;  %v269_v26 = vld [vmem:[%s701_s0 + $0x138] sm:$0xf] }
   0x7   :  { %v162_v24 = vmax.bf16 %v267_v11, %v111_v14  ;;  %v112_v25 = vmax.bf16 %v243_v13, %v61_v15  ;;  %v63_v27 = vmax.bf16 %v220_v23, %v12_v22  ;;  %v245_v28 = vld [vmem:[%s701_s0 + $0xd8] sm:$0xf]  ;;  %v13_v29 = vld [vmem:[%s701_s0 + $0x14] sm:$0xf]  ;;  %v270_v31 = vld [vmem:[%s701_s0 + $0x13c] sm:$0xf] }
   0x8   :  { %187 = vst.msk [vmem:[%s702_s1] sm:$0xf] %vm186_vm0, %v161_v19  ;;  %v113_v30 = vmax.bf16 %v244_v18, %v62_v21  ;;  %v221_v32 = vld [vmem:[%s701_s0 + $0x78] sm:$0xf]  ;;  %v246_v33 = vld [vmem:[%s701_s0 + $0xdc] sm:$0xf] }
   0x9   :  { %188 = vst.msk [vmem:[%s702_s1 + $0x4] sm:$0xf] %vm186_vm0, %v162_v24  ;;  %v163_v34 = vmax.bf16 %v268_v20, %v112_v25  ;;  %v114_v35 = vmax.bf16 %v245_v28, %v63_v27  ;;  %v64_v36 = vmax.bf16 %v221_v32, %v13_v29  ;;  %v14_v37 = vld [vmem:[%s701_s0 + $0x18] sm:$0xf]  ;;  %v222_v38 = vld [vmem:[%s701_s0 + $0x7c] sm:$0xf] }
   0xa   :  { %v247_v39 = vld [vmem:[%s701_s0 + $0xe0] sm:$0xf]  ;;  %v164_v40 = vmax.bf16 %v269_v26, %v113_v30  ;;  %v65_v42 = vmax.bf16 %v222_v38, %v14_v37  ;;  %v15_v43 = vld [vmem:[%s701_s0 + $0x1c] sm:$0xf]  ;;  %v272_v47 = vld [vmem:[%s701_s0 + $0x144] sm:$0xf] }
   0xb   :  { %v271_v41 = vld [vmem:[%s701_s0 + $0x140] sm:$0xf]  ;;  %189 = vst.msk [vmem:[%s702_s1 + $0x8] sm:$0xf] %vm186_vm0, %v163_v34  ;;  %v165_v45 = vmax.bf16 %v270_v31, %v114_v35  ;;  %v115_v46 = vmax.bf16 %v246_v33, %v64_v36  ;;  %v248_v49 = vld [vmem:[%s701_s0 + $0xe4] sm:$0xf] }
   0xc   :  { %v223_v44 = vld [vmem:[%s701_s0 + $0x80] sm:$0xf]  ;;  %190 = vst.msk [vmem:[%s702_s1 + $0xc] sm:$0xf] %vm186_vm0, %v164_v40  ;;  %v116_v51 = vmax.bf16 %v247_v39, %v65_v42  ;;  %v273_v52 = vld [vmem:[%s701_s0 + $0x148] sm:$0xf] }
   0xd   :  { %v66_v48 = vmax.bf16 %v223_v44, %v15_v43  ;;  %v16_v50 = vld [vmem:[%s701_s0 + $0x20] sm:$0xf]  ;;  %v224_v53 = vld [vmem:[%s701_s0 + $0x84] sm:$0xf]  ;;  %v249_v54 = vld [vmem:[%s701_s0 + $0xe8] sm:$0xf]  ;;  %v166_v55 = vmax.bf16 %v271_v41, %v115_v46 }
   0xe   :  { %191 = vst.msk [vmem:[%s702_s1 + $0x10] sm:$0xf] %vm186_vm0, %v165_v45  ;;  %v67_v57 = vmax.bf16 %v224_v53, %v16_v50  ;;  %v17_v58 = vld [vmem:[%s701_s0 + $0x24] sm:$0xf]  ;;  %v225_v59 = vld [vmem:[%s701_s0 + $0x88] sm:$0xf]  ;;  %v167_v61 = vmax.bf16 %v272_v47, %v116_v51 }
   0xf   :  { %v117_v56 = vmax.bf16 %v248_v49, %v66_v48  ;;  %v250_v60 = vld [vmem:[%s701_s0 + $0xec] sm:$0xf]  ;;  %v68_v63 = vmax.bf16 %v225_v59, %v17_v58  ;;  %v18_v0 = vld [vmem:[%s701_s0 + $0x28] sm:$0xf]  ;;  %192 = vst.msk [vmem:[%s702_s1 + $0x14] sm:$0xf] %vm186_vm0, %v166_v55 }
  0x10   :  { %v274_v62 = vld [vmem:[%s701_s0 + $0x14c] sm:$0xf]  ;;  %v118_v3 = vmax.bf16 %v249_v54, %v67_v57  ;;  %v275_v4 = vld [vmem:[%s701_s0 + $0x150] sm:$0xf]  ;;  %193 = vst.msk [vmem:[%s702_s1 + $0x18] sm:$0xf] %vm186_vm0, %v167_v61 }
  0x11   :  { %v226_v1 = vld [vmem:[%s701_s0 + $0x8c] sm:$0xf]  ;;  %v168_v2 = vmax.bf16 %v273_v52, %v117_v56  ;;  %v251_v6 = vld [vmem:[%s701_s0 + $0xf0] sm:$0xf]  ;;  %v119_v8 = vmax.bf16 %v250_v60, %v68_v63  ;;  %v276_v9 = vld [vmem:[%s701_s0 + $0x154] sm:$0xf] }
  0x12   :  { %v69_v5 = vmax.bf16 %v226_v1, %v18_v0  ;;  %v19_v7 = vld [vmem:[%s701_s0 + $0x2c] sm:$0xf]  ;;  %v227_v10 = vld [vmem:[%s701_s0 + $0x90] sm:$0xf]  ;;  %v252_v11 = vld [vmem:[%s701_s0 + $0xf4] sm:$0xf]  ;;  %v169_v12 = vmax.bf16 %v274_v62, %v118_v3 }
  0x13   :  { %194 = vst.msk [vmem:[%s702_s1 + $0x1c] sm:$0xf] %vm186_vm0, %v168_v2  ;;  %v70_v14 = vmax.bf16 %v227_v10, %v19_v7  ;;  %v20_v15 = vld [vmem:[%s701_s0 + $0x30] sm:$0xf]  ;;  %v228_v16 = vld [vmem:[%s701_s0 + $0x94] sm:$0xf]  ;;  %v170_v18 = vmax.bf16 %v275_v4, %v119_v8 }
  0x14   :  { %v120_v13 = vmax.bf16 %v251_v6, %v69_v5  ;;  %v253_v17 = vld [vmem:[%s701_s0 + $0xf8] sm:$0xf]  ;;  %v71_v20 = vmax.bf16 %v228_v16, %v20_v15  ;;  %v21_v21 = vld [vmem:[%s701_s0 + $0x34] sm:$0xf]  ;;  %195 = vst.msk [vmem:[%s702_s1 + $0x20] sm:$0xf] %vm186_vm0, %v169_v12 }
  0x15   :  { %v277_v19 = vld [vmem:[%s701_s0 + $0x158] sm:$0xf]  ;;  %v121_v24 = vmax.bf16 %v252_v11, %v70_v14  ;;  %v278_v25 = vld [vmem:[%s701_s0 + $0x15c] sm:$0xf]  ;;  %196 = vst.msk [vmem:[%s702_s1 + $0x24] sm:$0xf] %vm186_vm0, %v170_v18 }
  0x16   :  { %v229_v22 = vld [vmem:[%s701_s0 + $0x98] sm:$0xf]  ;;  %v171_v23 = vmax.bf16 %v276_v9, %v120_v13  ;;  %v254_v27 = vld [vmem:[%s701_s0 + $0xfc] sm:$0xf]  ;;  %v122_v29 = vmax.bf16 %v253_v17, %v71_v20  ;;  %v279_v30 = vld [vmem:[%s701_s0 + $0x160] sm:$0xf] }
  0x17   :  { %v72_v26 = vmax.bf16 %v229_v22, %v21_v21  ;;  %v22_v28 = vld [vmem:[%s701_s0 + $0x38] sm:$0xf]  ;;  %v230_v31 = vld [vmem:[%s701_s0 + $0x9c] sm:$0xf]  ;;  %v255_v32 = vld [vmem:[%s701_s0 + $0x100] sm:$0xf]  ;;  %v172_v33 = vmax.bf16 %v277_v19, %v121_v24 }
  0x18   :  { %197 = vst.msk [vmem:[%s702_s1 + $0x28] sm:$0xf] %vm186_vm0, %v171_v23  ;;  %v73_v35 = vmax.bf16 %v230_v31, %v22_v28  ;;  %v23_v36 = vld [vmem:[%s701_s0 + $0x3c] sm:$0xf]  ;;  %v231_v37 = vld [vmem:[%s701_s0 + $0xa0] sm:$0xf]  ;;  %v173_v39 = vmax.bf16 %v278_v25, %v122_v29 }
  0x19   :  { %v123_v34 = vmax.bf16 %v254_v27, %v72_v26  ;;  %v256_v38 = vld [vmem:[%s701_s0 + $0x104] sm:$0xf]  ;;  %v74_v41 = vmax.bf16 %v231_v37, %v23_v36  ;;  %v24_v42 = vld [vmem:[%s701_s0 + $0x40] sm:$0xf]  ;;  %198 = vst.msk [vmem:[%s702_s1 + $0x2c] sm:$0xf] %vm186_vm0, %v172_v33 }
  0x1a   :  { %v280_v40 = vld [vmem:[%s701_s0 + $0x164] sm:$0xf]  ;;  %v124_v45 = vmax.bf16 %v255_v32, %v73_v35  ;;  %v281_v46 = vld [vmem:[%s701_s0 + $0x168] sm:$0xf]  ;;  %199 = vst.msk [vmem:[%s702_s1 + $0x30] sm:$0xf] %vm186_vm0, %v173_v39 }
  0x1b   :  { %v232_v43 = vld [vmem:[%s701_s0 + $0xa4] sm:$0xf]  ;;  %v174_v44 = vmax.bf16 %v279_v30, %v123_v34  ;;  %v257_v48 = vld [vmem:[%s701_s0 + $0x108] sm:$0xf]  ;;  %v125_v50 = vmax.bf16 %v256_v38, %v74_v41  ;;  %v282_v51 = vld [vmem:[%s701_s0 + $0x16c] sm:$0xf] }
  0x1c   :  { %v75_v47 = vmax.bf16 %v232_v43, %v24_v42  ;;  %v25_v49 = vld [vmem:[%s701_s0 + $0x44] sm:$0xf]  ;;  %v233_v52 = vld [vmem:[%s701_s0 + $0xa8] sm:$0xf]  ;;  %v258_v53 = vld [vmem:[%s701_s0 + $0x10c] sm:$0xf]  ;;  %v175_v54 = vmax.bf16 %v280_v40, %v124_v45 }
  0x1d   :  { %200 = vst.msk [vmem:[%s702_s1 + $0x34] sm:$0xf] %vm186_vm0, %v174_v44  ;;  %v76_v56 = vmax.bf16 %v233_v52, %v25_v49  ;;  %v26_v57 = vld [vmem:[%s701_s0 + $0x48] sm:$0xf]  ;;  %v234_v58 = vld [vmem:[%s701_s0 + $0xac] sm:$0xf]  ;;  %v176_v60 = vmax.bf16 %v281_v46, %v125_v50 }
  0x1e   :  { %v126_v55 = vmax.bf16 %v257_v48, %v75_v47  ;;  %v259_v59 = vld [vmem:[%s701_s0 + $0x110] sm:$0xf]  ;;  %v77_v62 = vmax.bf16 %v234_v58, %v26_v57  ;;  %v27_v63 = vld [vmem:[%s701_s0 + $0x4c] sm:$0xf]  ;;  %201 = vst.msk [vmem:[%s702_s1 + $0x38] sm:$0xf] %vm186_vm0, %v175_v54 }
  0x1f   :  { %v283_v61 = vld [vmem:[%s701_s0 + $0x170] sm:$0xf]  ;;  %v127_v2 = vmax.bf16 %v258_v53, %v76_v56  ;;  %v284_v3 = vld [vmem:[%s701_s0 + $0x174] sm:$0xf]  ;;  %202 = vst.msk [vmem:[%s702_s1 + $0x3c] sm:$0xf] %vm186_vm0, %v176_v60 }
  0x20   :  { %v235_v0 = vld [vmem:[%s701_s0 + $0xb0] sm:$0xf]  ;;  %v177_v1 = vmax.bf16 %v282_v51, %v126_v55  ;;  %v260_v5 = vld [vmem:[%s701_s0 + $0x114] sm:$0xf]  ;;  %v128_v7 = vmax.bf16 %v259_v59, %v77_v62  ;;  %v285_v8 = vld [vmem:[%s701_s0 + $0x178] sm:$0xf] }
  0x21   :  { %v78_v4 = vmax.bf16 %v235_v0, %v27_v63  ;;  %v28_v6 = vld [vmem:[%s701_s0 + $0x50] sm:$0xf]  ;;  %v236_v9 = vld [vmem:[%s701_s0 + $0xb4] sm:$0xf]  ;;  %v261_v10 = vld [vmem:[%s701_s0 + $0x118] sm:$0xf]  ;;  %v178_v11 = vmax.bf16 %v283_v61, %v127_v2 }
  0x22   :  { %203 = vst.msk [vmem:[%s702_s1 + $0x40] sm:$0xf] %vm186_vm0, %v177_v1  ;;  %v79_v13 = vmax.bf16 %v236_v9, %v28_v6  ;;  %v29_v14 = vld [vmem:[%s701_s0 + $0x54] sm:$0xf]  ;;  %v237_v15 = vld [vmem:[%s701_s0 + $0xb8] sm:$0xf]  ;;  %v179_v17 = vmax.bf16 %v284_v3, %v128_v7 }
  0x23   :  { %v129_v12 = vmax.bf16 %v260_v5, %v78_v4  ;;  %v262_v16 = vld [vmem:[%s701_s0 + $0x11c] sm:$0xf]  ;;  %v80_v19 = vmax.bf16 %v237_v15, %v29_v14  ;;  %v30_v20 = vld [vmem:[%s701_s0 + $0x58] sm:$0xf]  ;;  %204 = vst.msk [vmem:[%s702_s1 + $0x44] sm:$0xf] %vm186_vm0, %v178_v11 }
  0x24   :  { %v286_v18 = vld [vmem:[%s701_s0 + $0x17c] sm:$0xf]  ;;  %v130_v23 = vmax.bf16 %v261_v10, %v79_v13  ;;  %v287_v24 = vld [vmem:[%s701_s0 + $0x180] sm:$0xf]  ;;  %205 = vst.msk [vmem:[%s702_s1 + $0x48] sm:$0xf] %vm186_vm0, %v179_v17 }
  0x25   :  { %v238_v21 = vld [vmem:[%s701_s0 + $0xbc] sm:$0xf]  ;;  %v180_v22 = vmax.bf16 %v285_v8, %v129_v12  ;;  %v263_v26 = vld [vmem:[%s701_s0 + $0x120] sm:$0xf]  ;;  %v131_v28 = vmax.bf16 %v262_v16, %v80_v19  ;;  %v288_v29 = vld [vmem:[%s701_s0 + $0x184] sm:$0xf] }
  0x26   :  { %v81_v25 = vmax.bf16 %v238_v21, %v30_v20  ;;  %v31_v27 = vld [vmem:[%s701_s0 + $0x5c] sm:$0xf]  ;;  %v239_v30 = vld [vmem:[%s701_s0 + $0xc0] sm:$0xf]  ;;  %v264_v31 = vld [vmem:[%s701_s0 + $0x124] sm:$0xf]  ;;  %v181_v32 = vmax.bf16 %v286_v18, %v130_v23 }
  0x27   :  { %206 = vst.msk [vmem:[%s702_s1 + $0x4c] sm:$0xf] %vm186_vm0, %v180_v22  ;;  %v82_v34 = vmax.bf16 %v239_v30, %v31_v27  ;;  %v32_v35 = vld [vmem:[%s701_s0 + $0x60] sm:$0xf]  ;;  %v240_v36 = vld [vmem:[%s701_s0 + $0xc4] sm:$0xf]  ;;  %v182_v38 = vmax.bf16 %v287_v24, %v131_v28 }
  0x28   :  { %v132_v33 = vmax.bf16 %v263_v26, %v81_v25  ;;  %v265_v37 = vld [vmem:[%s701_s0 + $0x128] sm:$0xf]  ;;  %v83_v40 = vmax.bf16 %v240_v36, %v32_v35  ;;  %207 = vst.msk [vmem:[%s702_s1 + $0x50] sm:$0xf] %vm186_vm0, %v181_v32  ;;  %v290_v43 = vld [vmem:[%s701_s0 + $0x18c] sm:$0xf] }
  0x29   :  { %v289_v39 = vld [vmem:[%s701_s0 + $0x188] sm:$0xf]  ;;  %v133_v42 = vmax.bf16 %v264_v31, %v82_v34  ;;  %208 = vst.msk [vmem:[%s702_s1 + $0x54] sm:$0xf] %vm186_vm0, %v182_v38 }
  0x2a   :  { %v183_v41 = vmax.bf16 %v288_v29, %v132_v33  ;;  %v134_v44 = vmax.bf16 %v265_v37, %v83_v40 }
  0x2b   :  { %v184_v45 = vmax.bf16 %v289_v39, %v133_v42 }
  0x2c   :  { %209 = vst.msk [vmem:[%s702_s1 + $0x58] sm:$0xf] %vm186_vm0, %v183_v41  ;;  %v185_v46 = vmax.bf16 %v290_v43, %v134_v44 }
  0x2d   :  { %210 = vst.msk [vmem:[%s702_s1 + $0x5c] sm:$0xf] %vm186_vm0, %v184_v45 }
  0x2e   :  { %211 = vst.msk [vmem:[%s702_s1 + $0x60] sm:$0xf] %vm186_vm0, %v185_v46 }

// kernel: shrinkage_forward.5
= control target key start
LH: loop header
LB: loop body
LE: loop exit
PB: predicated region body
PF: predicated region fallthrough
CT: control target
= control target key end

     0   :  { %v3196_v0 = vmov 0   ;;  %vm770_vm0 = vcmask 424960   ;;  %vm921_vm1 = vcmask 1041408   ;;  %vm1358_vm2 = vcmask 244736   ;;  %s6820_s1 = inlined_call_operand.vmem [shape: bf16[180,30], index: 1, kind: input, shape index: {}]   ;;  %s6821_s0 = inlined_call_operand.vmem [shape: bf16[800,180], index: 0, kind: input, shape index: {}]   ;;  %s6822_s2 = inlined_call_operand.vmem [shape: f32[1,30], index: 2, kind: input, shape index: {}]   ;;  %s6823_s3 = inlined_call_operand.vmem [shape: f32[1,30], index: 3, kind: input, shape index: {}]   ;;  %s6824_s4 = inlined_call_operand.vmem [shape: f32[1,30], index: 4, kind: input, shape index: {}]   ;;  %s6825_s5 = inlined_call_operand.vmem [shape: bf16[800,30], index: 5, kind: output, shape index: {}]  }
   0x1   :  { %925 = vmatprep.subr.bf16.mxu0 %v3196_v0  ;;  %v3182_v1 = vld [vmem:[%s6820_s1 + $0x38] sm:$0xff]   ;;  %3157 = vmatprep.subr.bf16.mxu1 %v3196_v0  ;;  %v3183_v2 = vld [vmem:[%s6820_s1 + $0x30] sm:$0xff]   ;;  %v3184_v3 = vld [vmem:[%s6820_s1 + $0x28] sm:$0xff]   ;;  %vm2688_vm3 = vcmask 240640  }
   0x2   :  { %926 = vmatpush1.bf16.msra.mxu0 %v3182_v1  ;;  %3169 = vmatpush1.bf16.msra.mxu1 %v3182_v1  ;;  %v3185_v4 = vld [vmem:[%s6820_s1 + $0x20] sm:$0xff]   ;;  %v22_v6 = vld [vmem:[%s6821_s0 + $0x8] sm:$0xff]  ;;  %v3186_v9 = vld [vmem:[%s6820_s1 + $0x18] sm:$0xff]  }
   0x3   :  { %927 = vmatprep.subr.bf16.mxu0 %v3196_v0  ;;  %3158 = vmatprep.subr.bf16.mxu1 %v3196_v0  ;;  %v21_v5 = vld [vmem:[%s6821_s0] sm:$0xff]  ;;  %v3257_v8 = vmax.bf16 %v3196_v0, %v22_v6  ;;  %v3187_v11 = vld [vmem:[%s6820_s1 + $0x10] sm:$0xff]   ;;  %v3188_v13 = vld [vmem:[%s6820_s1 + $0x8] sm:$0xff]  }
   0x4   :  { %v3254_v7 = vmax.bf16 %v3196_v0, %v21_v5  ;;  %v71_v12 = vld [vmem:[%s6821_s0 + $0x190] sm:$0xff]  ;;  %v72_v14 = vld [vmem:[%s6821_s0 + $0x198] sm:$0xff]  ;;  %v3189_v17 = vld [vmem:[%s6820_s1] sm:$0xff]  }
   0x5   :  { %v171_v15 = vmax.bf16 %v3196_v0, %v71_v12  ;;  %v172_v16 = vmax.bf16 %v3196_v0, %v72_v14  ;;  %v3190_v18 = vld [vmem:[%s6820_s1 + $0x58] ss:$0 sps:$4 sm:$0x33]   ;;  %v3191_v21 = vld [vmem:[%s6820_s1 + $0x50] sm:$0xff]   ;;  %v3192_v22 = vld [vmem:[%s6820_s1 + $0x48] sm:$0xff]  }
   0x6   :  { %928 = vmatpush1.bf16.msra.mxu0 %v3183_v2  ;;  %3170 = vmatpush1.bf16.msra.mxu1 %v3183_v2  ;;  %v2795_v10 = vcombine.high %v3254_v7, %v3257_v8  ;;  %v923_v20 = vsel %vm921_vm1, %v3190_v18, 0  ;;  %v23_v23 = vld [vmem:[%s6821_s0 + $0x10] sm:$0xff]  ;;  %v24_v24 = vld [vmem:[%s6821_s0 + $0x18] sm:$0xff]  ;;  %v73_v25 = vld [vmem:[%s6821_s0 + $0x1a0] sm:$0xff]  ;;  %v2794_v32 = vcombine.low %v3254_v7, %v3257_v8 }
   0x7   :  { %929 = vmatprep.subr.bf16.mxu0 %v3196_v0  ;;  %3159 = vmatprep.subr.bf16.mxu1 %v3196_v0  ;;  %v2845_v19 = vcombine.high %v171_v15, %v172_v16  ;;  %v74_v26 = vld [vmem:[%s6821_s0 + $0x1a8] sm:$0xff]  ;;  %v3193_v27 = vld [vmem:[%s6820_s1 + $0x40] sm:$0xff]   ;;  %v123_v28 = vmax.bf16 %v3196_v0, %v23_v23  ;;  %v124_v29 = vmax.bf16 %v3196_v0, %v24_v24  ;;  %v75_v38 = vld [vmem:[%s6821_s0 + $0x1b0] sm:$0xff] }
   0x8   :  { %2906 = vmatprep.mubr.msk.bf16.mxu0 %vm770_vm0, %v2795_v10  ;;  %v173_v30 = vmax.bf16 %v3196_v0, %v73_v25  ;;  %v174_v31 = vmax.bf16 %v3196_v0, %v74_v26  ;;  %v25_v34 = vld [vmem:[%s6821_s0 + $0x20] sm:$0xff]  ;;  %v26_v35 = vld [vmem:[%s6821_s0 + $0x28] sm:$0xff]  ;;  %v2844_v36 = vcombine.low %v171_v15, %v172_v16  ;;  %v76_v39 = vld [vmem:[%s6821_s0 + $0x1b8] sm:$0xff]  ;;  %v175_v42 = vmax.bf16 %v3196_v0, %v75_v38 }
   0x9   :  { %2931 = vmatprep.mubr.msk.bf16.mxu1 %vm770_vm0, %v2845_v19  ;;  %v2797_v33 = vcombine.high %v123_v28, %v124_v29  ;;  %v125_v40 = vmax.bf16 %v3196_v0, %v25_v34  ;;  %v126_v41 = vmax.bf16 %v3196_v0, %v26_v35  ;;  %v176_v43 = vmax.bf16 %v3196_v0, %v76_v39  ;;  %v27_v46 = vld [vmem:[%s6821_s0 + $0x30] sm:$0xff]  ;;  %v28_v47 = vld [vmem:[%s6821_s0 + $0x38] sm:$0xff]  ;;  %v77_v50 = vld [vmem:[%s6821_s0 + $0x1c0] sm:$0xff] }
   0xa   :  { %930 = vmatpush1.bf16.msra.mxu0 %v3184_v3  ;;  %3171 = vmatpush1.bf16.msra.mxu1 %v3184_v3  ;;  %v2847_v37 = vcombine.high %v173_v30, %v174_v31  ;;  %v2796_v44 = vcombine.low %v123_v28, %v124_v29  ;;  %v2846_v48 = vcombine.low %v173_v30, %v174_v31  ;;  %v78_v51 = vld [vmem:[%s6821_s0 + $0x1c8] sm:$0xff]  ;;  %v29_v58 = vld [vmem:[%s6821_s0 + $0x40] sm:$0xff]  ;;  %v79_v62 = vld [vmem:[%s6821_s0 + $0x1d0] sm:$0xff] }
   0xb   :  { %931 = vmatprep.subr.bf16.mxu0 %v3196_v0  ;;  %3160 = vmatprep.subr.bf16.mxu1 %v3196_v0  ;;  %v2799_v45 = vcombine.high %v125_v40, %v126_v41  ;;  %v2849_v49 = vcombine.high %v175_v42, %v176_v43  ;;  %v127_v52 = vmax.bf16 %v3196_v0, %v27_v46  ;;  %v30_v59 = vld [vmem:[%s6821_s0 + $0x48] sm:$0xff]  ;;  %v80_v63 = vld [vmem:[%s6821_s0 + $0x1d8] sm:$0xff]  ;;  %v31_v7 = vld [vmem:[%s6821_s0 + $0x50] sm:$0xff] }
   0xc   :  { %v128_v53 = vmax.bf16 %v3196_v0, %v28_v47  ;;  %v177_v54 = vmax.bf16 %v3196_v0, %v77_v50  ;;  %v178_v55 = vmax.bf16 %v3196_v0, %v78_v51  ;;  %v2798_v56 = vcombine.low %v125_v40, %v126_v41  ;;  %v32_v8 = vld [vmem:[%s6821_s0 + $0x58] sm:$0xff]  ;;  %v82_v12 = vld [vmem:[%s6821_s0 + $0x1e8] sm:$0xff]  ;;  %v33_v19 = vld [vmem:[%s6821_s0 + $0x60] sm:$0xff] }
   0xd   :  { %v2848_v60 = vcombine.low %v175_v42, %v176_v43  ;;  %v129_v1 = vmax.bf16 %v3196_v0, %v29_v58  ;;  %v130_v2 = vmax.bf16 %v3196_v0, %v30_v59  ;;  %v179_v3 = vmax.bf16 %v3196_v0, %v79_v62  ;;  %v83_v23 = vld [vmem:[%s6821_s0 + $0x1f0] sm:$0xff]  ;;  %v84_v24 = vld [vmem:[%s6821_s0 + $0x1f8] sm:$0xff]  ;;  %v85_v35 = vld [vmem:[%s6821_s0 + $0x200] sm:$0xff] }
   0xe   :  { %932 = vmatpush1.bf16.msra.mxu0 %v3185_v4  ;;  %3172 = vmatpush1.bf16.msra.mxu1 %v3185_v4  ;;  %v2801_v57 = vcombine.high %v127_v52, %v128_v53  ;;  %v2851_v61 = vcombine.high %v177_v54, %v178_v55  ;;  %v180_v4 = vmax.bf16 %v3196_v0, %v80_v63  ;;  %v35_v31 = vld [vmem:[%s6821_s0 + $0x70] sm:$0xff]  ;;  %v37_v43 = vld [vmem:[%s6821_s0 + $0x80] sm:$0xff] }
   0xf   :  { %933 = vmatprep.subr.bf16.mxu0 %v3196_v0  ;;  %3161 = vmatprep.subr.bf16.mxu1 %v3196_v0  ;;  %v2800_v5 = vcombine.low %v127_v52, %v128_v53  ;;  %v2803_v6 = vcombine.high %v129_v1, %v130_v2  ;;  %v132_v14 = vmax.bf16 %v3196_v0, %v32_v8  ;;  %v87_v47 = vld [vmem:[%s6821_s0 + $0x210] sm:$0xff]  ;;  %v89_v59 = vld [vmem:[%s6821_s0 + $0x220] sm:$0xff] }
  0x10   :  { %v2853_v10 = vcombine.high %v179_v3, %v180_v4  ;;  %v182_v16 = vmax.bf16 %v3196_v0, %v82_v12  ;;  %v133_v25 = vmax.bf16 %v3196_v0, %v33_v19  ;;  %v184_v28 = vmax.bf16 %v3196_v0, %v84_v24  ;;  %v91_v8 = vld [vmem:[%s6821_s0 + $0x230] sm:$0xff] }
  0x11   :  { %v185_v39 = vmax.bf16 %v3196_v0, %v85_v35  ;;  %v187_v51 = vmax.bf16 %v3196_v0, %v87_v47  ;;  %v189_v63 = vmax.bf16 %v3196_v0, %v89_v59  ;;  %v191_v12 = vmax.bf16 %v3196_v0, %v91_v8 }
  0x12   :  { %934 = vmatpush1.bf16.msra.mxu0 %v3186_v9  ;;  %3173 = vmatpush1.bf16.msra.mxu1 %v3186_v9  ;;  %v2850_v9 = vcombine.low %v177_v54, %v178_v55  ;;  %v39_v55 = vld [vmem:[%s6821_s0 + $0x90] sm:$0xff] }
  0x13   :  { %935 = vmatprep.subr.bf16.mxu0 %v3196_v0  ;;  %3162 = vmatprep.subr.bf16.mxu1 %v3196_v0 }
  0x16   :  { %936 = vmatpush1.bf16.msra.mxu0 %v3187_v11  ;;  %3174 = vmatpush1.bf16.msra.mxu1 %v3187_v11  ;;  %v81_v11 = vld [vmem:[%s6821_s0 + $0x1e0] sm:$0xff] }
  0x17   :  { %937 = vmatprep.subr.bf16.mxu0 %v3196_v0  ;;  %3163 = vmatprep.subr.bf16.mxu1 %v3196_v0  ;;  %v181_v15 = vmax.bf16 %v3196_v0, %v81_v11 }
  0x1a   :  { %938 = vmatpush1.bf16.msra.mxu0 %v3188_v13  ;;  %3175 = vmatpush1.bf16.msra.mxu1 %v3188_v13  ;;  %v131_v13 = vmax.bf16 %v3196_v0, %v31_v7 }
  0x1b   :  { %939 = vmatprep.subr.bf16.mxu0 %v3196_v0  ;;  %3164 = vmatprep.subr.bf16.mxu1 %v3196_v0 }
  0x1c   :  { %v2805_v18 = vcombine.high %v131_v13, %v132_v14  ;;  %v2804_v29 = vcombine.low %v131_v13, %v132_v14 }
  0x1e   :  { %940 = vmatpush1.bf16.msra.mxu0 %v3189_v17  ;;  %3176 = vmatpush1.bf16.msra.mxu1 %v3189_v17  ;;  %v2802_v17 = vcombine.low %v129_v1, %v130_v2 }
  0x1f   :  { %949 = vmatprep.subr.bf16.mxu0 %v3196_v0  ;;  %3165 = vmatprep.subr.bf16.mxu1 %v3196_v0 }
  0x22   :  { %950 = vmatpush2.bf16.msra.mxu0 %v923_v20  ;;  %3177 = vmatpush2.bf16.msra.mxu1 %v923_v20  ;;  %v34_v20 = vld [vmem:[%s6821_s0 + $0x68] sm:$0xff] }
  0x23   :  { %951 = vmatprep.subr.bf16.mxu0 %v3196_v0  ;;  %3166 = vmatprep.subr.bf16.mxu1 %v3196_v0  ;;  %v134_v26 = vmax.bf16 %v3196_v0, %v34_v20  ;;  %v93_v20 = vld [vmem:[%s6821_s0 + $0x240] sm:$0xff] }
  0x24   :  { %v193_v24 = vmax.bf16 %v3196_v0, %v93_v20 }
  0x25   :  { %v2807_v30 = vcombine.high %v133_v25, %v134_v26  ;;  %v2806_v41 = vcombine.low %v133_v25, %v134_v26 }
  0x26   :  { %952 = vmatpush2.bf16.msra.mxu0 %v3191_v21  ;;  %3178 = vmatpush2.bf16.msra.mxu1 %v3191_v21  ;;  %v2852_v21 = vcombine.low %v179_v3, %v180_v4  ;;  %v41_v4 = vld [vmem:[%s6821_s0 + $0xa0] sm:$0xff] }
  0x27   :  { %953 = vmatprep.subr.bf16.mxu0 %v3196_v0  ;;  %3167 = vmatprep.subr.bf16.mxu1 %v3196_v0 }
  0x2a   :  { %954 = vmatpush2.bf16.msra.mxu0 %v3192_v22  ;;  %3179 = vmatpush2.bf16.msra.mxu1 %v3192_v22  ;;  %v2855_v22 = vcombine.high %v181_v15, %v182_v16 }
  0x2b   :  { %955 = vmatprep.subr.bf16.mxu0 %v3196_v0  ;;  %3168 = vmatprep.subr.bf16.mxu1 %v3196_v0 }
  0x2e   :  { %956 = vmatpush2.bf16.msra.mxu0 %v3193_v27  ;;  %3180 = vmatpush2.bf16.msra.mxu1 %v3193_v27  ;;  %v183_v27 = vmax.bf16 %v3196_v0, %v83_v23 }
  0x30   :  { %v2857_v34 = vcombine.high %v183_v27, %v184_v28 }
  0x31   :  { %958 = vmatmul.mubr.bf16.vlgmr.msra.gmra.mxu0 %v2794_v32  ;;  %1158 = vmatmul.mubr.bf16.vlgmr.msra.gmra.mxu1 %v2844_v36  ;;  %v36_v32 = vld [vmem:[%s6821_s0 + $0x78] sm:$0xff]  ;;  %v86_v36 = vld [vmem:[%s6821_s0 + $0x208] sm:$0xff] }
  0x32   :  { %2907 = vmatprep.mubr.msk.bf16.mxu0 %vm770_vm0, %v2797_v33  ;;  %2932 = vmatprep.mubr.msk.bf16.mxu1 %vm770_vm0, %v2847_v37  ;;  %v2854_v33 = vcombine.low %v181_v15, %v182_v16  ;;  %v135_v37 = vmax.bf16 %v3196_v0, %v35_v31  ;;  %v136_v38 = vmax.bf16 %v3196_v0, %v36_v32  ;;  %v43_v16 = vld [vmem:[%s6821_s0 + $0xb0] sm:$0xff] }
  0x33   :  { %v186_v40 = vmax.bf16 %v3196_v0, %v86_v36  ;;  %v95_v32 = vld [vmem:[%s6821_s0 + $0x250] sm:$0xff] }
  0x34   :  { %v2809_v42 = vcombine.high %v135_v37, %v136_v38  ;;  %v2808_v53 = vcombine.low %v135_v37, %v136_v38  ;;  %v195_v36 = vmax.bf16 %v3196_v0, %v95_v32 }
  0x35   :  { %v2859_v46 = vcombine.high %v185_v39, %v186_v40 }
  0x39   :  { %966 = vmatmul.mubr.bf16.gmra.mxu0 %v2796_v44  ;;  %1166 = vmatmul.mubr.bf16.gmra.mxu1 %v2846_v48  ;;  %v38_v44 = vld [vmem:[%s6821_s0 + $0x88] sm:$0xff]  ;;  %v88_v48 = vld [vmem:[%s6821_s0 + $0x218] sm:$0xff] }
  0x3a   :  { %2908 = vmatprep.mubr.msk.bf16.mxu0 %vm770_vm0, %v2799_v45  ;;  %2933 = vmatprep.mubr.msk.bf16.mxu1 %vm770_vm0, %v2849_v49  ;;  %v2856_v45 = vcombine.low %v183_v27, %v184_v28  ;;  %v137_v49 = vmax.bf16 %v3196_v0, %v37_v43  ;;  %v138_v50 = vmax.bf16 %v3196_v0, %v38_v44  ;;  %v45_v28 = vld [vmem:[%s6821_s0 + $0xc0] sm:$0xff] }
  0x3b   :  { %v188_v52 = vmax.bf16 %v3196_v0, %v88_v48  ;;  %v97_v44 = vld [vmem:[%s6821_s0 + $0x260] sm:$0xff] }
  0x3c   :  { %v2811_v54 = vcombine.high %v137_v49, %v138_v50  ;;  %v2810_v2 = vcombine.low %v137_v49, %v138_v50  ;;  %v197_v48 = vmax.bf16 %v3196_v0, %v97_v44 }
  0x3d   :  { %v2861_v58 = vcombine.high %v187_v51, %v188_v52 }
  0x41   :  { %974 = vmatmul.mubr.bf16.gmra.mxu0 %v2798_v56  ;;  %1174 = vmatmul.mubr.bf16.gmra.mxu1 %v2848_v60  ;;  %v40_v56 = vld [vmem:[%s6821_s0 + $0x98] sm:$0xff]  ;;  %v90_v60 = vld [vmem:[%s6821_s0 + $0x228] sm:$0xff] }
  0x42   :  { %2909 = vmatprep.mubr.msk.bf16.mxu0 %vm770_vm0, %v2801_v57  ;;  %2934 = vmatprep.mubr.msk.bf16.mxu1 %vm770_vm0, %v2851_v61  ;;  %v2858_v57 = vcombine.low %v185_v39, %v186_v40  ;;  %v139_v61 = vmax.bf16 %v3196_v0, %v39_v55  ;;  %v140_v62 = vmax.bf16 %v3196_v0, %v40_v56  ;;  %v47_v40 = vld [vmem:[%s6821_s0 + $0xd0] sm:$0xff] }
  0x43   :  { %v190_v1 = vmax.bf16 %v3196_v0, %v90_v60  ;;  %v99_v56 = vld [vmem:[%s6821_s0 + $0x270] sm:$0xff] }
  0x44   :  { %v2813_v3 = vcombine.high %v139_v61, %v140_v62  ;;  %v2812_v14 = vcombine.low %v139_v61, %v140_v62  ;;  %v199_v60 = vmax.bf16 %v3196_v0, %v99_v56 }
  0x45   :  { %v2863_v7 = vcombine.high %v189_v63, %v190_v1 }
  0x49   :  { %982 = vmatmul.mubr.bf16.gmra.mxu0 %v2800_v5  ;;  %1182 = vmatmul.mubr.bf16.gmra.mxu1 %v2850_v9  ;;  %v42_v5 = vld [vmem:[%s6821_s0 + $0xa8] sm:$0xff]  ;;  %v92_v9 = vld [vmem:[%s6821_s0 + $0x238] sm:$0xff] }
  0x4a   :  { %2910 = vmatprep.mubr.msk.bf16.mxu0 %vm770_vm0, %v2803_v6  ;;  %2935 = vmatprep.mubr.msk.bf16.mxu1 %vm770_vm0, %v2853_v10  ;;  %v2860_v6 = vcombine.low %v187_v51, %v188_v52  ;;  %v141_v10 = vmax.bf16 %v3196_v0, %v41_v4  ;;  %v142_v11 = vmax.bf16 %v3196_v0, %v42_v5  ;;  %v49_v52 = vld [vmem:[%s6821_s0 + $0xe0] sm:$0xff] }
  0x4b   :  { %v192_v13 = vmax.bf16 %v3196_v0, %v92_v9  ;;  %v101_v5 = vld [vmem:[%s6821_s0 + $0x280] sm:$0xff] }
  0x4c   :  { %v2815_v15 = vcombine.high %v141_v10, %v142_v11  ;;  %v2814_v26 = vcombine.low %v141_v10, %v142_v11  ;;  %v201_v9 = vmax.bf16 %v3196_v0, %v101_v5 }
  0x4d   :  { %v2865_v19 = vcombine.high %v191_v12, %v192_v13 }
  0x51   :  { %990 = vmatmul.mubr.bf16.gmra.mxu0 %v2802_v17  ;;  %1190 = vmatmul.mubr.bf16.gmra.mxu1 %v2852_v21  ;;  %v44_v17 = vld [vmem:[%s6821_s0 + $0xb8] sm:$0xff]  ;;  %v94_v21 = vld [vmem:[%s6821_s0 + $0x248] sm:$0xff] }
  0x52   :  { %2911 = vmatprep.mubr.msk.bf16.mxu0 %vm770_vm0, %v2805_v18  ;;  %2936 = vmatprep.mubr.msk.bf16.mxu1 %vm770_vm0, %v2855_v22  ;;  %v2862_v18 = vcombine.low %v189_v63, %v190_v1  ;;  %v143_v22 = vmax.bf16 %v3196_v0, %v43_v16  ;;  %v144_v23 = vmax.bf16 %v3196_v0, %v44_v17  ;;  %v51_v1 = vld [vmem:[%s6821_s0 + $0xf0] sm:$0xff] }
  0x53   :  { %v194_v25 = vmax.bf16 %v3196_v0, %v94_v21  ;;  %v103_v17 = vld [vmem:[%s6821_s0 + $0x290] sm:$0xff] }
  0x54   :  { %v2817_v27 = vcombine.high %v143_v22, %v144_v23  ;;  %v2816_v38 = vcombine.low %v143_v22, %v144_v23  ;;  %v203_v21 = vmax.bf16 %v3196_v0, %v103_v17 }
  0x55   :  { %v2867_v31 = vcombine.high %v193_v24, %v194_v25 }
  0x59   :  { %998 = vmatmul.mubr.bf16.gmra.mxu0 %v2804_v29  ;;  %1198 = vmatmul.mubr.bf16.gmra.mxu1 %v2854_v33  ;;  %v46_v29 = vld [vmem:[%s6821_s0 + $0xc8] sm:$0xff]  ;;  %v96_v33 = vld [vmem:[%s6821_s0 + $0x258] sm:$0xff] }
  0x5a   :  { %2912 = vmatprep.mubr.msk.bf16.mxu0 %vm770_vm0, %v2807_v30  ;;  %2937 = vmatprep.mubr.msk.bf16.mxu1 %vm770_vm0, %v2857_v34  ;;  %v2864_v30 = vcombine.low %v191_v12, %v192_v13  ;;  %v145_v34 = vmax.bf16 %v3196_v0, %v45_v28  ;;  %v146_v35 = vmax.bf16 %v3196_v0, %v46_v29  ;;  %v53_v13 = vld [vmem:[%s6821_s0 + $0x100] sm:$0xff] }
  0x5b   :  { %v196_v37 = vmax.bf16 %v3196_v0, %v96_v33  ;;  %v105_v29 = vld [vmem:[%s6821_s0 + $0x2a0] sm:$0xff] }
  0x5c   :  { %v2819_v39 = vcombine.high %v145_v34, %v146_v35  ;;  %v2818_v50 = vcombine.low %v145_v34, %v146_v35  ;;  %v205_v33 = vmax.bf16 %v3196_v0, %v105_v29 }
  0x5d   :  { %v2869_v43 = vcombine.high %v195_v36, %v196_v37 }
  0x61   :  { %1006 = vmatmul.mubr.bf16.gmra.mxu0 %v2806_v41  ;;  %1206 = vmatmul.mubr.bf16.gmra.mxu1 %v2856_v45  ;;  %v48_v41 = vld [vmem:[%s6821_s0 + $0xd8] sm:$0xff]  ;;  %v98_v45 = vld [vmem:[%s6821_s0 + $0x268] sm:$0xff] }
  0x62   :  { %2913 = vmatprep.mubr.msk.bf16.mxu0 %vm770_vm0, %v2809_v42  ;;  %2938 = vmatprep.mubr.msk.bf16.mxu1 %vm770_vm0, %v2859_v46  ;;  %v2866_v42 = vcombine.low %v193_v24, %v194_v25  ;;  %v147_v46 = vmax.bf16 %v3196_v0, %v47_v40  ;;  %v148_v47 = vmax.bf16 %v3196_v0, %v48_v41  ;;  %v55_v25 = vld [vmem:[%s6821_s0 + $0x110] sm:$0xff] }
  0x63   :  { %v198_v49 = vmax.bf16 %v3196_v0, %v98_v45  ;;  %v107_v41 = vld [vmem:[%s6821_s0 + $0x2b0] sm:$0xff] }
  0x64   :  { %v2821_v51 = vcombine.high %v147_v46, %v148_v47  ;;  %v2820_v62 = vcombine.low %v147_v46, %v148_v47  ;;  %v207_v45 = vmax.bf16 %v3196_v0, %v107_v41 }
  0x65   :  { %v2871_v55 = vcombine.high %v197_v48, %v198_v49 }
  0x69   :  { %1014 = vmatmul.mubr.bf16.gmra.mxu0 %v2808_v53  ;;  %1214 = vmatmul.mubr.bf16.gmra.mxu1 %v2858_v57  ;;  %v50_v53 = vld [vmem:[%s6821_s0 + $0xe8] sm:$0xff]  ;;  %v100_v57 = vld [vmem:[%s6821_s0 + $0x278] sm:$0xff] }
  0x6a   :  { %2914 = vmatprep.mubr.msk.bf16.mxu0 %vm770_vm0, %v2811_v54  ;;  %2939 = vmatprep.mubr.msk.bf16.mxu1 %vm770_vm0, %v2861_v58  ;;  %v2868_v54 = vcombine.low %v195_v36, %v196_v37  ;;  %v149_v58 = vmax.bf16 %v3196_v0, %v49_v52  ;;  %v150_v59 = vmax.bf16 %v3196_v0, %v50_v53  ;;  %v57_v37 = vld [vmem:[%s6821_s0 + $0x120] sm:$0xff] }
  0x6b   :  { %v200_v61 = vmax.bf16 %v3196_v0, %v100_v57  ;;  %v109_v53 = vld [vmem:[%s6821_s0 + $0x2c0] sm:$0xff] }
  0x6c   :  { %v2823_v63 = vcombine.high %v149_v58, %v150_v59  ;;  %v2822_v11 = vcombine.low %v149_v58, %v150_v59  ;;  %v209_v57 = vmax.bf16 %v3196_v0, %v109_v53 }
  0x6d   :  { %v2873_v4 = vcombine.high %v199_v60, %v200_v61 }
  0x71   :  { %1022 = vmatmul.mubr.bf16.gmra.mxu0 %v2810_v2  ;;  %1222 = vmatmul.mubr.bf16.gmra.mxu1 %v2860_v6  ;;  %v52_v2 = vld [vmem:[%s6821_s0 + $0xf8] sm:$0xff]  ;;  %v102_v6 = vld [vmem:[%s6821_s0 + $0x288] sm:$0xff] }
  0x72   :  { %2915 = vmatprep.mubr.msk.bf16.mxu0 %vm770_vm0, %v2813_v3  ;;  %2940 = vmatprep.mubr.msk.bf16.mxu1 %vm770_vm0, %v2863_v7  ;;  %v2870_v3 = vcombine.low %v197_v48, %v198_v49  ;;  %v151_v7 = vmax.bf16 %v3196_v0, %v51_v1  ;;  %v152_v8 = vmax.bf16 %v3196_v0, %v52_v2  ;;  %v59_v49 = vld [vmem:[%s6821_s0 + $0x130] sm:$0xff] }
  0x73   :  { %v202_v10 = vmax.bf16 %v3196_v0, %v102_v6  ;;  %v111_v2 = vld [vmem:[%s6821_s0 + $0x2d0] sm:$0xff] }
  0x74   :  { %v2825_v12 = vcombine.high %v151_v7, %v152_v8  ;;  %v2824_v23 = vcombine.low %v151_v7, %v152_v8  ;;  %v211_v6 = vmax.bf16 %v3196_v0, %v111_v2 }
  0x75   :  { %v2875_v16 = vcombine.high %v201_v9, %v202_v10 }
  0x79   :  { %1030 = vmatmul.mubr.bf16.gmra.mxu0 %v2812_v14  ;;  %1230 = vmatmul.mubr.bf16.gmra.mxu1 %v2862_v18  ;;  %v54_v14 = vld [vmem:[%s6821_s0 + $0x108] sm:$0xff]  ;;  %v104_v18 = vld [vmem:[%s6821_s0 + $0x298] sm:$0xff] }
  0x7a   :  { %2916 = vmatprep.mubr.msk.bf16.mxu0 %vm770_vm0, %v2815_v15  ;;  %2941 = vmatprep.mubr.msk.bf16.mxu1 %vm770_vm0, %v2865_v19  ;;  %v2872_v15 = vcombine.low %v199_v60, %v200_v61  ;;  %v153_v19 = vmax.bf16 %v3196_v0, %v53_v13  ;;  %v154_v20 = vmax.bf16 %v3196_v0, %v54_v14  ;;  %v61_v61 = vld [vmem:[%s6821_s0 + $0x140] sm:$0xff] }
  0x7b   :  { %v204_v22 = vmax.bf16 %v3196_v0, %v104_v18  ;;  %v113_v14 = vld [vmem:[%s6821_s0 + $0x2e0] sm:$0xff] }
  0x7c   :  { %v2827_v24 = vcombine.high %v153_v19, %v154_v20  ;;  %v2826_v35 = vcombine.low %v153_v19, %v154_v20  ;;  %v213_v18 = vmax.bf16 %v3196_v0, %v113_v14 }
  0x7d   :  { %v2877_v28 = vcombine.high %v203_v21, %v204_v22 }
  0x81   :  { %1038 = vmatmul.mubr.bf16.gmra.mxu0 %v2814_v26  ;;  %1238 = vmatmul.mubr.bf16.gmra.mxu1 %v2864_v30  ;;  %v56_v26 = vld [vmem:[%s6821_s0 + $0x118] sm:$0xff]  ;;  %v106_v30 = vld [vmem:[%s6821_s0 + $0x2a8] sm:$0xff] }
  0x82   :  { %2917 = vmatprep.mubr.msk.bf16.mxu0 %vm770_vm0, %v2817_v27  ;;  %2942 = vmatprep.mubr.msk.bf16.mxu1 %vm770_vm0, %v2867_v31  ;;  %v2874_v27 = vcombine.low %v201_v9, %v202_v10  ;;  %v155_v31 = vmax.bf16 %v3196_v0, %v55_v25  ;;  %v156_v32 = vmax.bf16 %v3196_v0, %v56_v26  ;;  %v63_v10 = vld [vmem:[%s6821_s0 + $0x150] sm:$0xff] }
  0x83   :  { %v206_v34 = vmax.bf16 %v3196_v0, %v106_v30  ;;  %v115_v26 = vld [vmem:[%s6821_s0 + $0x2f0] sm:$0xff] }
  0x84   :  { %v2829_v36 = vcombine.high %v155_v31, %v156_v32  ;;  %v2828_v47 = vcombine.low %v155_v31, %v156_v32  ;;  %v215_v30 = vmax.bf16 %v3196_v0, %v115_v26 }
  0x85   :  { %v2879_v40 = vcombine.high %v205_v33, %v206_v34 }
  0x89   :  { %1046 = vmatmul.mubr.bf16.gmra.mxu0 %v2816_v38  ;;  %1246 = vmatmul.mubr.bf16.gmra.mxu1 %v2866_v42  ;;  %v58_v38 = vld [vmem:[%s6821_s0 + $0x128] sm:$0xff]  ;;  %v108_v42 = vld [vmem:[%s6821_s0 + $0x2b8] sm:$0xff] }
  0x8a   :  { %2918 = vmatprep.mubr.msk.bf16.mxu0 %vm770_vm0, %v2819_v39  ;;  %2943 = vmatprep.mubr.msk.bf16.mxu1 %vm770_vm0, %v2869_v43  ;;  %v2876_v39 = vcombine.low %v203_v21, %v204_v22  ;;  %v157_v43 = vmax.bf16 %v3196_v0, %v57_v37  ;;  %v158_v44 = vmax.bf16 %v3196_v0, %v58_v38  ;;  %v65_v22 = vld [vmem:[%s6821_s0 + $0x160] sm:$0xff] }
  0x8b   :  { %v208_v46 = vmax.bf16 %v3196_v0, %v108_v42  ;;  %v117_v38 = vld [vmem:[%s6821_s0 + $0x300] sm:$0xff] }
  0x8c   :  { %v2831_v48 = vcombine.high %v157_v43, %v158_v44  ;;  %v2830_v59 = vcombine.low %v157_v43, %v158_v44  ;;  %v217_v42 = vmax.bf16 %v3196_v0, %v117_v38 }
  0x8d   :  { %v2881_v52 = vcombine.high %v207_v45, %v208_v46 }
  0x91   :  { %1054 = vmatmul.mubr.bf16.gmra.mxu0 %v2818_v50  ;;  %1254 = vmatmul.mubr.bf16.gmra.mxu1 %v2868_v54  ;;  %v60_v50 = vld [vmem:[%s6821_s0 + $0x138] sm:$0xff]  ;;  %v110_v54 = vld [vmem:[%s6821_s0 + $0x2c8] sm:$0xff] }
  0x92   :  { %2919 = vmatprep.mubr.msk.bf16.mxu0 %vm770_vm0, %v2821_v51  ;;  %2944 = vmatprep.mubr.msk.bf16.mxu1 %vm770_vm0, %v2871_v55  ;;  %v2878_v51 = vcombine.low %v205_v33, %v206_v34  ;;  %v159_v55 = vmax.bf16 %v3196_v0, %v59_v49  ;;  %v160_v56 = vmax.bf16 %v3196_v0, %v60_v50  ;;  %v67_v34 = vld [vmem:[%s6821_s0 + $0x170] sm:$0xff] }
  0x93   :  { %v210_v58 = vmax.bf16 %v3196_v0, %v110_v54  ;;  %v119_v50 = vld [vmem:[%s6821_s0 + $0x310] sm:$0xff] }
  0x94   :  { %v2833_v60 = vcombine.high %v159_v55, %v160_v56  ;;  %v2832_v8 = vcombine.low %v159_v55, %v160_v56  ;;  %v219_v54 = vmax.bf16 %v3196_v0, %v119_v50 }
  0x95   :  { %v2883_v1 = vcombine.high %v209_v57, %v210_v58 }
  0x99   :  { %1062 = vmatmul.mubr.bf16.gmra.mxu0 %v2820_v62  ;;  %1262 = vmatmul.mubr.bf16.gmra.mxu1 %v2870_v3  ;;  %v62_v62 = vld [vmem:[%s6821_s0 + $0x148] sm:$0xff]  ;;  %v112_v3 = vld [vmem:[%s6821_s0 + $0x2d8] sm:$0xff] }
  0x9a   :  { %2920 = vmatprep.mubr.msk.bf16.mxu0 %vm770_vm0, %v2823_v63  ;;  %2945 = vmatprep.mubr.msk.bf16.mxu1 %vm770_vm0, %v2873_v4  ;;  %v2880_v63 = vcombine.low %v207_v45, %v208_v46  ;;  %v161_v4 = vmax.bf16 %v3196_v0, %v61_v61  ;;  %v162_v5 = vmax.bf16 %v3196_v0, %v62_v62  ;;  %v69_v46 = vld [vmem:[%s6821_s0 + $0x180] sm:$0xff] }
  0x9b   :  { %v212_v7 = vmax.bf16 %v3196_v0, %v112_v3 }
  0x9c   :  { %v2835_v9 = vcombine.high %v161_v4, %v162_v5  ;;  %v2834_v20 = vcombine.low %v161_v4, %v162_v5 }
  0x9d   :  { %v2885_v13 = vcombine.high %v211_v6, %v212_v7 }
  0xa1   :  { %1070 = vmatmul.mubr.bf16.gmra.mxu0 %v2822_v11  ;;  %1270 = vmatmul.mubr.bf16.gmra.mxu1 %v2872_v15  ;;  %v64_v11 = vld [vmem:[%s6821_s0 + $0x158] sm:$0xff]  ;;  %v114_v15 = vld [vmem:[%s6821_s0 + $0x2e8] sm:$0xff] }
  0xa2   :  { %2921 = vmatprep.mubr.msk.bf16.mxu0 %vm770_vm0, %v2825_v12  ;;  %2946 = vmatprep.mubr.msk.bf16.mxu1 %vm770_vm0, %v2875_v16  ;;  %v2882_v12 = vcombine.low %v209_v57, %v210_v58  ;;  %v163_v16 = vmax.bf16 %v3196_v0, %v63_v10  ;;  %v164_v17 = vmax.bf16 %v3196_v0, %v64_v11 }
  0xa3   :  { %v214_v19 = vmax.bf16 %v3196_v0, %v114_v15 }
  0xa4   :  { %v2837_v21 = vcombine.high %v163_v16, %v164_v17  ;;  %v2836_v32 = vcombine.low %v163_v16, %v164_v17 }
  0xa5   :  { %v2887_v25 = vcombine.high %v213_v18, %v214_v19 }
  0xa9   :  { %1078 = vmatmul.mubr.bf16.gmra.mxu0 %v2824_v23  ;;  %1278 = vmatmul.mubr.bf16.gmra.mxu1 %v2874_v27  ;;  %v66_v23 = vld [vmem:[%s6821_s0 + $0x168] sm:$0xff]  ;;  %v116_v27 = vld [vmem:[%s6821_s0 + $0x2f8] sm:$0xff] }
  0xaa   :  { %2922 = vmatprep.mubr.msk.bf16.mxu0 %vm770_vm0, %v2827_v24  ;;  %2947 = vmatprep.mubr.msk.bf16.mxu1 %vm770_vm0, %v2877_v28  ;;  %v2884_v24 = vcombine.low %v211_v6, %v212_v7  ;;  %v165_v28 = vmax.bf16 %v3196_v0, %v65_v22  ;;  %v166_v29 = vmax.bf16 %v3196_v0, %v66_v23 }
  0xab   :  { %v216_v31 = vmax.bf16 %v3196_v0, %v116_v27 }
  0xac   :  { %v2839_v33 = vcombine.high %v165_v28, %v166_v29  ;;  %v2838_v44 = vcombine.low %v165_v28, %v166_v29 }
  0xad   :  { %v2889_v37 = vcombine.high %v215_v30, %v216_v31 }
  0xb1   :  { %1086 = vmatmul.mubr.bf16.gmra.mxu0 %v2826_v35  ;;  %1286 = vmatmul.mubr.bf16.gmra.mxu1 %v2876_v39  ;;  %v68_v35 = vld [vmem:[%s6821_s0 + $0x178] sm:$0xff]  ;;  %v118_v39 = vld [vmem:[%s6821_s0 + $0x308] sm:$0xff] }
  0xb2   :  { %2923 = vmatprep.mubr.msk.bf16.mxu0 %vm770_vm0, %v2829_v36  ;;  %2948 = vmatprep.mubr.msk.bf16.mxu1 %vm770_vm0, %v2879_v40  ;;  %v2886_v36 = vcombine.low %v213_v18, %v214_v19  ;;  %v167_v40 = vmax.bf16 %v3196_v0, %v67_v34  ;;  %v168_v41 = vmax.bf16 %v3196_v0, %v68_v35 }
  0xb3   :  { %v218_v43 = vmax.bf16 %v3196_v0, %v118_v39 }
  0xb4   :  { %v2841_v45 = vcombine.high %v167_v40, %v168_v41  ;;  %v2840_v56 = vcombine.low %v167_v40, %v168_v41 }
  0xb5   :  { %v2891_v49 = vcombine.high %v217_v42, %v218_v43  ;;  %v2890_v58 = vcombine.low %v217_v42, %v218_v43 }
  0xb9   :  { %1094 = vmatmul.mubr.bf16.gmra.mxu0 %v2828_v47  ;;  %1294 = vmatmul.mubr.bf16.gmra.mxu1 %v2878_v51  ;;  %v70_v47 = vld [vmem:[%s6821_s0 + $0x188] sm:$0xff]  ;;  %v120_v51 = vld [vmem:[%s6821_s0 + $0x318] sm:$0xff] }
  0xba   :  { %2924 = vmatprep.mubr.msk.bf16.mxu0 %vm770_vm0, %v2831_v48  ;;  %2949 = vmatprep.mubr.msk.bf16.mxu1 %vm770_vm0, %v2881_v52  ;;  %v2888_v48 = vcombine.low %v215_v30, %v216_v31  ;;  %v169_v52 = vmax.bf16 %v3196_v0, %v69_v46  ;;  %v170_v53 = vmax.bf16 %v3196_v0, %v70_v47 }
  0xbb   :  { %v220_v55 = vmax.bf16 %v3196_v0, %v120_v51 }
  0xbc   :  { %v2843_v57 = vcombine.high %v169_v52, %v170_v53 }
  0xbd   :  { %v2892_v61 = vcombine.low %v219_v54, %v220_v55 }
  0xc1   :  { %1102 = vmatmul.mubr.bf16.gmra.mxu0 %v2830_v59  ;;  %1302 = vmatmul.mubr.bf16.gmra.mxu1 %v2880_v63  ;;  %v2893_v59 = vcombine.high %v219_v54, %v220_v55 }
  0xc2   :  { %2925 = vmatprep.mubr.msk.bf16.mxu0 %vm770_vm0, %v2833_v60  ;;  %2950 = vmatprep.mubr.msk.bf16.mxu1 %vm770_vm0, %v2883_v1  ;;  %v2842_v60 = vcombine.low %v169_v52, %v170_v53 }
  0xc9   :  { %1110 = vmatmul.mubr.bf16.gmra.mxu0 %v2832_v8  ;;  %1310 = vmatmul.mubr.bf16.gmra.mxu1 %v2882_v12 }
  0xca   :  { %2926 = vmatprep.mubr.msk.bf16.mxu0 %vm770_vm0, %v2835_v9  ;;  %2951 = vmatprep.mubr.msk.bf16.mxu1 %vm770_vm0, %v2885_v13 }
  0xd1   :  { %1118 = vmatmul.mubr.bf16.gmra.mxu0 %v2834_v20  ;;  %1318 = vmatmul.mubr.bf16.gmra.mxu1 %v2884_v24 }
  0xd2   :  { %2927 = vmatprep.mubr.msk.bf16.mxu0 %vm770_vm0, %v2837_v21  ;;  %2952 = vmatprep.mubr.msk.bf16.mxu1 %vm770_vm0, %v2887_v25 }
  0xd9   :  { %1126 = vmatmul.mubr.bf16.gmra.mxu0 %v2836_v32  ;;  %1326 = vmatmul.mubr.bf16.gmra.mxu1 %v2886_v36 }
  0xda   :  { %2928 = vmatprep.mubr.msk.bf16.mxu0 %vm770_vm0, %v2839_v33  ;;  %2953 = vmatprep.mubr.msk.bf16.mxu1 %vm770_vm0, %v2889_v37 }
  0xe1   :  { %1134 = vmatmul.mubr.bf16.gmra.mxu0 %v2838_v44  ;;  %1334 = vmatmul.mubr.bf16.gmra.mxu1 %v2888_v48 }
  0xe2   :  { %2929 = vmatprep.mubr.msk.bf16.mxu0 %vm770_vm0, %v2841_v45  ;;  %2954 = vmatprep.mubr.msk.bf16.mxu1 %vm770_vm0, %v2891_v49 }
  0xe9   :  { %1142 = vmatmul.mubr.bf16.gmra.mxu0 %v2840_v56  ;;  %1342 = vmatmul.mubr.bf16.gmra.mxu1 %v2890_v58 }
  0xea   :  { %2930 = vmatprep.mubr.msk.bf16.mxu0 %vm770_vm0, %v2843_v57  ;;  %2955 = vmatprep.mubr.msk.bf16.mxu1 %vm770_vm0, %v2893_v59 }
  0xf1   :  { %v3745_v62 = vpop.f32.mrf.mxu0  ;;  %1150 = vmatmul.mubr.bf16.gmra.mxu0 %v2842_v60  ;;  %v3747_v1 = vpop.f32.mrf.mxu1  ;;  %1350 = vmatmul.mubr.bf16.gmra.mxu1 %v2892_v61 }
  0xf3   :  { %v961_v63 = vpop.f32.mrf.mxu0  ;;  %v1161_v2 = vpop.f32.mrf.mxu1 }
  0xf5   :  { %v3749_v0 = vpop.f32.mrf.mxu0  ;;  %v3751_v4 = vpop.f32.mrf.mxu1 }
  0xf7   :  { %v964_v3 = vpop.f32.mrf.mxu0  ;;  %v1164_v6 = vpop.f32.mrf.mxu1 }
  0xf9   :  { %v3753_v5 = vpop.f32.mrf.mxu0  ;;  %v3755_v8 = vpop.f32.mrf.mxu1 }
  0xfb   :  { %v969_v7 = vpop.f32.mrf.mxu0  ;;  %v1169_v10 = vpop.f32.mrf.mxu1 }
  0xfd   :  { %v3757_v9 = vpop.f32.mrf.mxu0  ;;  %v3759_v12 = vpop.f32.mrf.mxu1 }
  0xff   :  { %v972_v11 = vpop.f32.mrf.mxu0  ;;  %v1172_v14 = vpop.f32.mrf.mxu1 }
 0x101   :  { %v3761_v13 = vpop.f32.mrf.mxu0  ;;  %v3763_v16 = vpop.f32.mrf.mxu1 }
 0x103   :  { %v977_v15 = vpop.f32.mrf.mxu0  ;;  %v1177_v18 = vpop.f32.mrf.mxu1 }
 0x105   :  { %v3765_v17 = vpop.f32.mrf.mxu0  ;;  %v3767_v20 = vpop.f32.mrf.mxu1 }
 0x107   :  { %v980_v19 = vpop.f32.mrf.mxu0  ;;  %v1180_v22 = vpop.f32.mrf.mxu1 }
 0x109   :  { %v3769_v21 = vpop.f32.mrf.mxu0  ;;  %v3771_v24 = vpop.f32.mrf.mxu1 }
 0x10b   :  { %v985_v23 = vpop.f32.mrf.mxu0  ;;  %v1185_v26 = vpop.f32.mrf.mxu1 }
 0x10d   :  { %v3773_v25 = vpop.f32.mrf.mxu0  ;;  %v3775_v28 = vpop.f32.mrf.mxu1 }
 0x10f   :  { %v988_v27 = vpop.f32.mrf.mxu0  ;;  %v1188_v30 = vpop.f32.mrf.mxu1 }
 0x111   :  { %v3777_v29 = vpop.f32.mrf.mxu0  ;;  %v3779_v32 = vpop.f32.mrf.mxu1 }
 0x113   :  { %v993_v31 = vpop.f32.mrf.mxu0  ;;  %v1193_v34 = vpop.f32.mrf.mxu1 }
 0x115   :  { %v3781_v33 = vpop.f32.mrf.mxu0  ;;  %v3783_v36 = vpop.f32.mrf.mxu1 }
 0x117   :  { %v996_v35 = vpop.f32.mrf.mxu0  ;;  %v1196_v38 = vpop.f32.mrf.mxu1 }
 0x119   :  { %v3785_v37 = vpop.f32.mrf.mxu0  ;;  %v3787_v40 = vpop.f32.mrf.mxu1 }
 0x11b   :  { %v1001_v39 = vpop.f32.mrf.mxu0  ;;  %v1201_v42 = vpop.f32.mrf.mxu1 }
 0x11d   :  { %v3789_v41 = vpop.f32.mrf.mxu0  ;;  %v3791_v44 = vpop.f32.mrf.mxu1 }
 0x11f   :  { %v1004_v43 = vpop.f32.mrf.mxu0  ;;  %v1204_v46 = vpop.f32.mrf.mxu1 }
 0x121   :  { %v3793_v45 = vpop.f32.mrf.mxu0  ;;  %v3795_v48 = vpop.f32.mrf.mxu1 }
 0x123   :  { %v1009_v47 = vpop.f32.mrf.mxu0  ;;  %v1209_v50 = vpop.f32.mrf.mxu1 }
 0x125   :  { %v3797_v49 = vpop.f32.mrf.mxu0  ;;  %v3799_v52 = vpop.f32.mrf.mxu1 }
 0x127   :  { %v1012_v51 = vpop.f32.mrf.mxu0  ;;  %v1212_v54 = vpop.f32.mrf.mxu1 }
 0x129   :  { %v3801_v53 = vpop.f32.mrf.mxu0  ;;  %v3803_v56 = vpop.f32.mrf.mxu1 }
 0x12b   :  { %v1017_v55 = vpop.f32.mrf.mxu0  ;;  %v1217_v58 = vpop.f32.mrf.mxu1 }
 0x12d   :  { %v3805_v57 = vpop.f32.mrf.mxu0  ;;  %v3807_v60 = vpop.f32.mrf.mxu1 }
 0x12f   :  { %v1020_v59 = vpop.f32.mrf.mxu0  ;;  %v1220_v63 = vpop.f32.mrf.mxu1 }
 0x130   :  { %v3844_v63 = vld [vmem:[%s6822_s2] ss:$0 sm:$0xff] }
 0x131   :  { %v3809_v61 = vpop.f32.mrf.mxu0  ;;  %v3811_v3 = vpop.f32.mrf.mxu1 }
 0x133   :  { %v1025_v2 = vpop.f32.mrf.mxu0  ;;  %v1225_v7 = vpop.f32.mrf.mxu1 }
 0x135   :  { %v3813_v6 = vpop.f32.mrf.mxu0  ;;  %v3815_v11 = vpop.f32.mrf.mxu1 }
 0x137   :  { %v1028_v10 = vpop.f32.mrf.mxu0  ;;  %v1228_v15 = vpop.f32.mrf.mxu1 }
 0x138   :  { %v3850_v10 = vadd.f32 %v3844_v63, %v3749_v0  ;;  %v3868_v0 = vadd.f32 %v3844_v63, %v3757_v9 }
 0x139   :  { %v3817_v14 = vpop.f32.mrf.mxu0  ;;  %v3819_v19 = vpop.f32.mrf.mxu1 }
 0x13a   :  { %7005 = vst [vmem:[#allocation2_spill] sm:$0xff] %v3850_v10  ;;  %7008 = vst [vmem:[#allocation5_spill] sm:$0xff] %v3868_v0  ;;  %v1364_v9 = vsel %vm1358_vm2, %v3868_v0, 0.0 }
 0x13b   :  { %v1033_v18 = vpop.f32.mrf.mxu0  ;;  %v1233_v23 = vpop.f32.mrf.mxu1 }
 0x13c   :  { %v3856_v23 = vadd.f32 %v3844_v63, %v3745_v62 }
 0x13d   :  { %v3821_v22 = vpop.f32.mrf.mxu0  ;;  %v3823_v27 = vpop.f32.mrf.mxu1 }
 0x13e   :  { %7006 = vst [vmem:[#allocation3_spill] sm:$0xff] %v3856_v23  ;;  %v1359_v62 = vsel %vm1358_vm2, %v3856_v23, 0.0 }
 0x13f   :  { %v1036_v26 = vpop.f32.mrf.mxu0  ;;  %v1236_v31 = vpop.f32.mrf.mxu1 }
 0x140   :  { %v3860_v26 = vadd.f32 %v3844_v63, %v3753_v5 }
 0x141   :  { %v3825_v30 = vpop.f32.mrf.mxu0  ;;  %v3827_v35 = vpop.f32.mrf.mxu1 }
 0x142   :  { %7007 = vst [vmem:[#allocation4_spill] sm:$0xff] %v3860_v26  ;;  %v1362_v5 = vsel %vm1358_vm2, %v3860_v26, 0.0 }
 0x143   :  { %v1041_v34 = vpop.f32.mrf.mxu0  ;;  %v1241_v39 = vpop.f32.mrf.mxu1 }
 0x144   :  { %v1360_v39 = vsel %vm1358_vm2, %v3850_v10, 0.0 }
 0x145   :  { %v3829_v38 = vpop.f32.mrf.mxu0  ;;  %v3831_v43 = vpop.f32.mrf.mxu1 }
 0x147   :  { %v1044_v42 = vpop.f32.mrf.mxu0  ;;  %v1244_v47 = vpop.f32.mrf.mxu1 }
 0x149   :  { %v3833_v46 = vpop.f32.mrf.mxu0  ;;  %v3835_v51 = vpop.f32.mrf.mxu1 }
 0x14b   :  { %v1049_v50 = vpop.f32.mrf.mxu0  ;;  %v1249_v55 = vpop.f32.mrf.mxu1 }
 0x14c   :  { %v3878_v50 = vadd.f32 %v3844_v63, %v3761_v13  ;;  %v1361_v55 = vadd.f32 %v1360_v39, %v1359_v62  ;;  %v3894_v13 = vadd.f32 %v3844_v63, %v3769_v21  ;;  %v3910_v21 = vadd.f32 %v3844_v63, %v3777_v29 }
 0x14d   :  { %v3837_v54 = vpop.f32.mrf.mxu0  ;;  %v3839_v59 = vpop.f32.mrf.mxu1  ;;  %v3926_v29 = vadd.f32 %v3844_v63, %v3785_v37  ;;  %v3942_v37 = vadd.f32 %v3844_v63, %v3793_v45  ;;  %v3958_v45 = vadd.f32 %v3844_v63, %v3801_v53  ;;  %v3974_v53 = vadd.f32 %v3844_v63, %v3809_v61 }
 0x14e   :  { %7009 = vst [vmem:[#allocation6_spill] sm:$0xff] %v3878_v50  ;;  %v1366_v26 = vsel %vm1358_vm2, %v3878_v50, 0.0  ;;  %7011 = vst [vmem:[#allocation8_spill] sm:$0xff] %v3894_v13  ;;  %v1370_v50 = vsel %vm1358_vm2, %v3894_v13, 0.0  ;;  %v1374_v13 = vsel %vm1358_vm2, %v3910_v21, 0.0  ;;  %v3990_v61 = vadd.f32 %v3844_v63, %v3817_v14 }
 0x14f   :  { %v1052_v58 = vpop.f32.mrf.mxu0  ;;  %v1252_v7 = vpop.f32.mrf.mxu1  ;;  %7013 = vst [vmem:[#allocation10_spill] sm:$0xff] %v3910_v21  ;;  %7015 = vst [vmem:[#allocation12_spill] sm:$0xff] %v3926_v29  ;;  %v1378_v21 = vsel %vm1358_vm2, %v3926_v29, 0.0  ;;  %v1382_v29 = vsel %vm1358_vm2, %v3942_v37, 0.0  ;;  %v4006_v14 = vadd.f32 %v3844_v63, %v3825_v30  ;;  %v4022_v30 = vadd.f32 %v3844_v63, %v3833_v46 }
 0x150   :  { %7017 = vst [vmem:[#allocation14_spill] sm:$0xff] %v3942_v37  ;;  %7019 = vst [vmem:[#allocation16_spill] sm:$0xff] %v3958_v45  ;;  %v1386_v37 = vsel %vm1358_vm2, %v3958_v45, 0.0  ;;  %v1390_v45 = vsel %vm1358_vm2, %v3974_v53, 0.0 }
 0x151   :  { %v3846_v2 = vpop.f32.mrf.mxu0  ;;  %v3852_v18 = vpop.f32.mrf.mxu1  ;;  %7021 = vst [vmem:[#allocation18_spill] sm:$0xff] %v3974_v53  ;;  %7023 = vst [vmem:[#allocation20_spill] sm:$0xff] %v3990_v61  ;;  %v1394_v53 = vsel %vm1358_vm2, %v3990_v61, 0.0  ;;  %v1398_v61 = vsel %vm1358_vm2, %v4006_v14, 0.0 }
 0x152   :  { %7025 = vst [vmem:[#allocation22_spill] sm:$0xff] %v4006_v14  ;;  %7027 = vst [vmem:[#allocation24_spill] sm:$0xff] %v4022_v30  ;;  %v1402_v14 = vsel %vm1358_vm2, %v4022_v30, 0.0  ;;  %v4038_v46 = vadd.f32 %v3844_v63, %v3846_v2 }
 0x153   :  { %v1057_v15 = vpop.f32.mrf.mxu0  ;;  %v1257_v34 = vpop.f32.mrf.mxu1 }
 0x154   :  { %v3886_v15 = vadd.f32 %v3844_v63, %v3765_v17  ;;  %v1363_v34 = vadd.f32 %v1362_v5, %v1361_v55  ;;  %v3902_v17 = vadd.f32 %v3844_v63, %v3773_v25  ;;  %v3918_v25 = vadd.f32 %v3844_v63, %v3781_v33  ;;  %7029 = vst [vmem:[#allocation26_spill] sm:$0xff] %v4038_v46 }
 0x155   :  { %v3862_v31 = vpop.f32.mrf.mxu0  ;;  %v3870_v47 = vpop.f32.mrf.mxu1  ;;  %v3934_v33 = vadd.f32 %v3844_v63, %v3789_v41  ;;  %v3950_v41 = vadd.f32 %v3844_v63, %v3797_v49  ;;  %v3966_v49 = vadd.f32 %v3844_v63, %v3805_v57  ;;  %v3982_v57 = vadd.f32 %v3844_v63, %v3813_v6 }
 0x156   :  { %7010 = vst [vmem:[#allocation7_spill] sm:$0xff] %v3886_v15  ;;  %v1365_v39 = vadd.f32 %v1364_v9, %v1363_v34  ;;  %v1368_v0 = vsel %vm1358_vm2, %v3886_v15, 0.0  ;;  %7012 = vst [vmem:[#allocation9_spill] sm:$0xff] %v3902_v17  ;;  %v1372_v15 = vsel %vm1358_vm2, %v3902_v17, 0.0  ;;  %v1376_v17 = vsel %vm1358_vm2, %v3918_v25, 0.0 }
 0x157   :  { %v1060_v42 = vpop.f32.mrf.mxu0  ;;  %v1260_v7 = vpop.f32.mrf.mxu1  ;;  %7014 = vst [vmem:[#allocation11_spill] sm:$0xff] %v3918_v25  ;;  %7016 = vst [vmem:[#allocation13_spill] sm:$0xff] %v3934_v33  ;;  %v1380_v25 = vsel %vm1358_vm2, %v3934_v33, 0.0  ;;  %v1384_v33 = vsel %vm1358_vm2, %v3950_v41, 0.0  ;;  %v3998_v6 = vadd.f32 %v3844_v63, %v3821_v22  ;;  %v4014_v22 = vadd.f32 %v3844_v63, %v3829_v38 }
 0x158   :  { %v1367_v5 = vadd.f32 %v1366_v26, %v1365_v39  ;;  %7018 = vst [vmem:[#allocation15_spill] sm:$0xff] %v3950_v41  ;;  %7020 = vst [vmem:[#allocation17_spill] sm:$0xff] %v3966_v49  ;;  %v1388_v41 = vsel %vm1358_vm2, %v3966_v49, 0.0  ;;  %v1392_v49 = vsel %vm1358_vm2, %v3982_v57, 0.0  ;;  %v4030_v38 = vadd.f32 %v3844_v63, %v3837_v54 }
 0x159   :  { %v3880_v58 = vpop.f32.mrf.mxu0  ;;  %v3888_v10 = vpop.f32.mrf.mxu1  ;;  %7022 = vst [vmem:[#allocation19_spill] sm:$0xff] %v3982_v57  ;;  %7024 = vst [vmem:[#allocation21_spill] sm:$0xff] %v3998_v6  ;;  %v1396_v57 = vsel %vm1358_vm2, %v3998_v6, 0.0  ;;  %v1400_v6 = vsel %vm1358_vm2, %v4014_v22, 0.0  ;;  %v4044_v54 = vadd.f32 %v3844_v63, %v3862_v31  ;;  %v1406_v30 = vsel %vm1358_vm2, %v4038_v46, 0.0 }
 0x15a   :  { %v1369_v9 = vadd.f32 %v1368_v0, %v1367_v5  ;;  %7026 = vst [vmem:[#allocation23_spill] sm:$0xff] %v4014_v22  ;;  %7028 = vst [vmem:[#allocation25_spill] sm:$0xff] %v4030_v38  ;;  %v1404_v22 = vsel %vm1358_vm2, %v4030_v38, 0.0  ;;  %v4052_v2 = vadd.f32 %v3844_v63, %v3880_v58 }
 0x15b   :  { %v1065_v42 = vpop.f32.mrf.mxu0  ;;  %v1265_v7 = vpop.f32.mrf.mxu1  ;;  %7030 = vst [vmem:[#allocation27_spill] sm:$0xff] %v4044_v54  ;;  %v1408_v38 = vsel %vm1358_vm2, %v4044_v54, 0.0 }
 0x15c   :  { %v1371_v26 = vadd.f32 %v1370_v50, %v1369_v9  ;;  %7031 = vst [vmem:[#allocation28_spill] sm:$0xff] %v4052_v2  ;;  %v1410_v46 = vsel %vm1358_vm2, %v4052_v2, 0.0 }
 0x15d   :  { %v3896_v62 = vpop.f32.mrf.mxu0  ;;  %v3904_v42 = vpop.f32.mrf.mxu1 }
 0x15e   :  { %v1373_v0 = vadd.f32 %v1372_v15, %v1371_v26  ;;  %v4058_v31 = vadd.f32 %v3844_v63, %v3896_v62 }
 0x15f   :  { %v1068_v55 = vpop.f32.mrf.mxu0  ;;  %v1268_v7 = vpop.f32.mrf.mxu1 }
 0x160   :  { %v1375_v50 = vadd.f32 %v1374_v13, %v1373_v0  ;;  %7032 = vst [vmem:[#allocation29_spill] sm:$0xff] %v4058_v31  ;;  %v1412_v54 = vsel %vm1358_vm2, %v4058_v31, 0.0 }
 0x161   :  { %v3912_v34 = vpop.f32.mrf.mxu0  ;;  %v3920_v55 = vpop.f32.mrf.mxu1 }
 0x162   :  { %v1377_v15 = vadd.f32 %v1376_v17, %v1375_v50  ;;  %v4066_v58 = vadd.f32 %v3844_v63, %v3912_v34 }
 0x163   :  { %v1073_v39 = vpop.f32.mrf.mxu0  ;;  %v1273_v7 = vpop.f32.mrf.mxu1 }
 0x164   :  { %v1379_v13 = vadd.f32 %v1378_v21, %v1377_v15  ;;  %7033 = vst [vmem:[#allocation30_spill] sm:$0xff] %v4066_v58  ;;  %v1414_v2 = vsel %vm1358_vm2, %v4066_v58, 0.0 }
 0x165   :  { %v3928_v5 = vpop.f32.mrf.mxu0  ;;  %v3936_v39 = vpop.f32.mrf.mxu1 }
 0x166   :  { %v1381_v17 = vadd.f32 %v1380_v25, %v1379_v13  ;;  %v4072_v62 = vadd.f32 %v3844_v63, %v3928_v5 }
 0x167   :  { %v1076_v9 = vpop.f32.mrf.mxu0  ;;  %v1276_v7 = vpop.f32.mrf.mxu1 }
 0x168   :  { %v1383_v21 = vadd.f32 %v1382_v29, %v1381_v17  ;;  %7034 = vst [vmem:[#allocation31_spill] sm:$0xff] %v4072_v62  ;;  %v1416_v31 = vsel %vm1358_vm2, %v4072_v62, 0.0 }
 0x169   :  { %v3944_v26 = vpop.f32.mrf.mxu0  ;;  %v3952_v9 = vpop.f32.mrf.mxu1 }
 0x16a   :  { %v1385_v25 = vadd.f32 %v1384_v33, %v1383_v21  ;;  %v4080_v34 = vadd.f32 %v3844_v63, %v3944_v26 }
 0x16b   :  { %v1081_v0 = vpop.f32.mrf.mxu0  ;;  %v1281_v7 = vpop.f32.mrf.mxu1 }
 0x16c   :  { %v1387_v29 = vadd.f32 %v1386_v37, %v1385_v25  ;;  %7035 = vst [vmem:[#allocation32_spill] sm:$0xff] %v4080_v34  ;;  %v1418_v58 = vsel %vm1358_vm2, %v4080_v34, 0.0 }
 0x16d   :  { %v3960_v50 = vpop.f32.mrf.mxu0  ;;  %v3968_v0 = vpop.f32.mrf.mxu1 }
 0x16e   :  { %v1389_v33 = vadd.f32 %v1388_v41, %v1387_v29  ;;  %v4086_v5 = vadd.f32 %v3844_v63, %v3960_v50 }
 0x16f   :  { %v1084_v15 = vpop.f32.mrf.mxu0  ;;  %v1284_v7 = vpop.f32.mrf.mxu1 }
 0x170   :  { %v1391_v37 = vadd.f32 %v1390_v45, %v1389_v33  ;;  %7036 = vst [vmem:[#allocation33_spill] sm:$0xff] %v4086_v5  ;;  %v1420_v62 = vsel %vm1358_vm2, %v4086_v5, 0.0 }
 0x171   :  { %v3976_v13 = vpop.f32.mrf.mxu0  ;;  %v3984_v15 = vpop.f32.mrf.mxu1 }
 0x172   :  { %v1393_v41 = vadd.f32 %v1392_v49, %v1391_v37  ;;  %v4094_v26 = vadd.f32 %v3844_v63, %v3976_v13 }
 0x173   :  { %v1089_v17 = vpop.f32.mrf.mxu0  ;;  %v1289_v7 = vpop.f32.mrf.mxu1 }
 0x174   :  { %v1395_v45 = vadd.f32 %v1394_v53, %v1393_v41  ;;  %7037 = vst [vmem:[#allocation34_spill] sm:$0xff] %v4094_v26  ;;  %v1422_v34 = vsel %vm1358_vm2, %v4094_v26, 0.0 }
 0x175   :  { %v3992_v21 = vpop.f32.mrf.mxu0  ;;  %v4000_v17 = vpop.f32.mrf.mxu1 }
 0x176   :  { %v1397_v49 = vadd.f32 %v1396_v57, %v1395_v45  ;;  %v4100_v50 = vadd.f32 %v3844_v63, %v3992_v21 }
 0x177   :  { %v1092_v25 = vpop.f32.mrf.mxu0  ;;  %v1292_v7 = vpop.f32.mrf.mxu1 }
 0x178   :  { %v1399_v53 = vadd.f32 %v1398_v61, %v1397_v49  ;;  %7038 = vst [vmem:[#allocation35_spill] sm:$0xff] %v4100_v50  ;;  %v1424_v5 = vsel %vm1358_vm2, %v4100_v50, 0.0 }
 0x179   :  { %v4008_v29 = vpop.f32.mrf.mxu0  ;;  %v4016_v25 = vpop.f32.mrf.mxu1 }
 0x17a   :  { %v1401_v57 = vadd.f32 %v1400_v6, %v1399_v53  ;;  %v4108_v13 = vadd.f32 %v3844_v63, %v4008_v29 }
 0x17b   :  { %v1097_v33 = vpop.f32.mrf.mxu0  ;;  %v1297_v7 = vpop.f32.mrf.mxu1 }
 0x17c   :  { %v1403_v61 = vadd.f32 %v1402_v14, %v1401_v57  ;;  %7039 = vst [vmem:[#allocation36_spill] sm:$0xff] %v4108_v13  ;;  %v1426_v26 = vsel %vm1358_vm2, %v4108_v13, 0.0 }
 0x17d   :  { %v4024_v37 = vpop.f32.mrf.mxu0  ;;  %v4032_v33 = vpop.f32.mrf.mxu1 }
 0x17e   :  { %v1405_v6 = vadd.f32 %v1404_v22, %v1403_v61  ;;  %v4114_v21 = vadd.f32 %v3844_v63, %v4024_v37 }
 0x17f   :  { %v1100_v41 = vpop.f32.mrf.mxu0  ;;  %v1300_v7 = vpop.f32.mrf.mxu1 }
 0x180   :  { %v1407_v14 = vadd.f32 %v1406_v30, %v1405_v6  ;;  %7040 = vst [vmem:[#allocation37_spill] sm:$0xff] %v4114_v21  ;;  %v1428_v50 = vsel %vm1358_vm2, %v4114_v21, 0.0 }
 0x181   :  { %v1103_v45 = vpop.f32.mrf.mxu0  ;;  %v4046_v41 = vpop.f32.mrf.mxu1 }
 0x182   :  { %v1409_v22 = vadd.f32 %v1408_v38, %v1407_v14  ;;  %v4121_v29 = vadd.f32 %v3844_v63, %v1103_v45 }
 0x183   :  { %v1105_v49 = vpop.f32.mrf.mxu0  ;;  %v1305_v7 = vpop.f32.mrf.mxu1 }
 0x184   :  { %v1411_v30 = vadd.f32 %v1410_v46, %v1409_v22  ;;  %7041 = vst [vmem:[#allocation38_spill] sm:$0xff] %v4121_v29 }
 0x185   :  { %v1106_v53 = vpop.f32.mrf.mxu0  ;;  %v4060_v49 = vpop.f32.mrf.mxu1 }
 0x186   :  { %v1413_v38 = vadd.f32 %v1412_v54, %v1411_v30  ;;  %v4126_v23 = vadd.f32 %v3844_v63, %v1106_v53 }
 0x187   :  { %v1108_v57 = vpop.f32.mrf.mxu0  ;;  %v1308_v7 = vpop.f32.mrf.mxu1 }
 0x188   :  { %v1415_v46 = vadd.f32 %v1414_v2, %v1413_v38  ;;  %7042 = vst [vmem:[#allocation39_spill] sm:$0xff] %v4126_v23 }
 0x189   :  { %v1111_v61 = vpop.f32.mrf.mxu0  ;;  %v4074_v57 = vpop.f32.mrf.mxu1 }
 0x18a   :  { %v1417_v54 = vadd.f32 %v1416_v31, %v1415_v46  ;;  %v4133_v13 = vadd.f32 %v3844_v63, %v1111_v61 }
 0x18b   :  { %v1113_v6 = vpop.f32.mrf.mxu0  ;;  %v1313_v7 = vpop.f32.mrf.mxu1 }
 0x18c   :  { %v1419_v2 = vadd.f32 %v1418_v58, %v1417_v54  ;;  %7043 = vst [vmem:[#allocation40_spill] sm:$0xff] %v4133_v13 }
 0x18d   :  { %v1114_v14 = vpop.f32.mrf.mxu0  ;;  %v4088_v6 = vpop.f32.mrf.mxu1 }
 0x18e   :  { %v1421_v31 = vadd.f32 %v1420_v62, %v1419_v2  ;;  %v4138_v21 = vadd.f32 %v3844_v63, %v1114_v14 }
 0x18f   :  { %v1116_v22 = vpop.f32.mrf.mxu0  ;;  %v1316_v7 = vpop.f32.mrf.mxu1 }
 0x190   :  { %v1423_v58 = vadd.f32 %v1422_v34, %v1421_v31  ;;  %7044 = vst [vmem:[#allocation41_spill] sm:$0xff] %v4138_v21 }
 0x191   :  { %v1119_v30 = vpop.f32.mrf.mxu0  ;;  %v4102_v22 = vpop.f32.mrf.mxu1 }
 0x192   :  { %v1425_v62 = vadd.f32 %v1424_v5, %v1423_v58 }
 0x193   :  { %v1121_v38 = vpop.f32.mrf.mxu0  ;;  %v1321_v7 = vpop.f32.mrf.mxu1 }
 0x194   :  { %v1427_v37 = vadd.f32 %v1426_v26, %v1425_v62 }
 0x195   :  { %v1122_v46 = vpop.f32.mrf.mxu0  ;;  %v4116_v38 = vpop.f32.mrf.mxu1 }
 0x196   :  { %v1429_v45 = vadd.f32 %v1428_v50, %v1427_v37 }
 0x197   :  { %v1124_v54 = vpop.f32.mrf.mxu0  ;;  %v1324_v7 = vpop.f32.mrf.mxu1 }
 0x198   :  { %v1430_v54 = vsel %vm1358_vm2, %v4121_v29, 0.0  ;;  %v1432_v7 = vsel %vm1358_vm2, %v4126_v23, 0.0  ;;  %v4145_v29 = vadd.f32 %v3844_v63, %v1119_v30  ;;  %v4150_v23 = vadd.f32 %v3844_v63, %v1122_v46 }
 0x199   :  { %v1127_v2 = vpop.f32.mrf.mxu0  ;;  %v4128_v31 = vpop.f32.mrf.mxu1  ;;  %v1431_v53 = vadd.f32 %v1430_v54, %v1429_v45 }
 0x19a   :  { %7045 = vst [vmem:[#allocation42_spill] sm:$0xff] %v4145_v29  ;;  %7046 = vst [vmem:[#allocation43_spill] sm:$0xff] %v4150_v23 }
 0x19b   :  { %v1129_v34 = vpop.f32.mrf.mxu0  ;;  %v1329_v58 = vpop.f32.mrf.mxu1  ;;  %v1433_v61 = vadd.f32 %v1432_v7, %v1431_v53 }
 0x19c   :  { %v1434_v34 = vsel %vm1358_vm2, %v4133_v13, 0.0  ;;  %v1436_v58 = vsel %vm1358_vm2, %v4138_v21, 0.0  ;;  %v4157_v13 = vadd.f32 %v3844_v63, %v1127_v2 }
 0x19d   :  { %v1130_v5 = vpop.f32.mrf.mxu0  ;;  %v4140_v62 = vpop.f32.mrf.mxu1  ;;  %v1435_v14 = vadd.f32 %v1434_v34, %v1433_v61 }
 0x19e   :  { %7047 = vst [vmem:[#allocation44_spill] sm:$0xff] %v4157_v13  ;;  %v4162_v21 = vadd.f32 %v3844_v63, %v1130_v5 }
 0x19f   :  { %v1132_v26 = vpop.f32.mrf.mxu0  ;;  %v1332_v37 = vpop.f32.mrf.mxu1  ;;  %v1437_v30 = vadd.f32 %v1436_v58, %v1435_v14 }
 0x1a0   :  { %v1438_v26 = vsel %vm1358_vm2, %v4145_v29, 0.0  ;;  %v1440_v37 = vsel %vm1358_vm2, %v4150_v23, 0.0  ;;  %7048 = vst [vmem:[#allocation45_spill] sm:$0xff] %v4162_v21 }
 0x1a1   :  { %v1135_v50 = vpop.f32.mrf.mxu0  ;;  %v4152_v45 = vpop.f32.mrf.mxu1  ;;  %v1439_v46 = vadd.f32 %v1438_v26, %v1437_v30 }
 0x1a2   :  { %v4169_v29 = vadd.f32 %v3844_v63, %v1135_v50 }
 0x1a3   :  { %v1137_v54 = vpop.f32.mrf.mxu0  ;;  %v1337_v53 = vpop.f32.mrf.mxu1  ;;  %v1441_v2 = vadd.f32 %v1440_v37, %v1439_v46 }
 0x1a4   :  { %v1442_v54 = vsel %vm1358_vm2, %v4157_v13, 0.0  ;;  %7049 = vst [vmem:[#allocation46_spill] sm:$0xff] %v4169_v29  ;;  %v1444_v53 = vsel %vm1358_vm2, %v4162_v21, 0.0 }
 0x1a5   :  { %v1138_v7 = vpop.f32.mrf.mxu0  ;;  %v4164_v61 = vpop.f32.mrf.mxu1  ;;  %v1443_v5 = vadd.f32 %v1442_v54, %v1441_v2 }
 0x1a6   :  { %v4174_v23 = vadd.f32 %v3844_v63, %v1138_v7 }
 0x1a7   :  { %v1140_v34 = vpop.f32.mrf.mxu0  ;;  %v1340_v14 = vpop.f32.mrf.mxu1  ;;  %v1445_v50 = vadd.f32 %v1444_v53, %v1443_v5 }
 0x1a8   :  { %7050 = vst [vmem:[#allocation47_spill] sm:$0xff] %v4174_v23  ;;  %v1446_v34 = vsel %vm1358_vm2, %v4169_v29, 0.0  ;;  %v1448_v14 = vsel %vm1358_vm2, %v4174_v23, 0.0 }
 0x1a9   :  { %v1143_v58 = vpop.f32.mrf.mxu0  ;;  %v4176_v30 = vpop.f32.mrf.mxu1  ;;  %v1447_v7 = vadd.f32 %v1446_v34, %v1445_v50 }
 0x1aa   :  { %7051 = vst [vmem:[#allocation48_spill] sm:$0xff] %v4176_v30  ;;  %v4181_v13 = vadd.f32 %v3844_v63, %v1143_v58 }
 0x1ab   :  { %v1145_v26 = vpop.f32.mrf.mxu0  ;;  %v1345_v46 = vpop.f32.mrf.mxu1  ;;  %v1449_v29 = vadd.f32 %v1448_v14, %v1447_v7  ;;  %v4203_v14 = vadd.f32 %v3844_v63, %v3747_v1 }
 0x1ac   :  { %v1450_v26 = vsel %vm1358_vm2, %v4181_v13, 0.0 }
 0x1ad   :  { %v1146_v37 = vpop.f32.mrf.mxu0  ;;  %v4188_v2 = vpop.f32.mrf.mxu1  ;;  %v1451_v46 = vadd.f32 %v1450_v26, %v1449_v29  ;;  %v1458_v1 = vsel %vm1358_vm2, %v4203_v14, 0.0 }
 0x1ae   :  { %v4186_v21 = vadd.f32 %v3844_v63, %v1146_v37  ;;  %7053 = vst [vmem:[#allocation50_spill] sm:$0xff] %v4188_v2 }
 0x1af   :  { %v1148_v54 = vpop.f32.mrf.mxu0  ;;  %v1348_v58 = vpop.f32.mrf.mxu1 }
 0x1b0   :  { %7052 = vst [vmem:[#allocation49_spill] sm:$0xff] %v4186_v21  ;;  %v1452_v53 = vsel %vm1358_vm2, %v4186_v21, 0.0 }
 0x1b1   :  { %v1151_v30 = vpop.f32.mrf.mxu0  ;;  %v4197_v37 = vpop.f32.mrf.mxu1  ;;  %v1453_v50 = vadd.f32 %v1452_v53, %v1451_v46  ;;  %v4220_v53 = vadd.f32 %v3844_v63, %v3755_v8 }
 0x1b2   :  { %v4195_v5 = vadd.f32 %v3844_v63, %v1151_v30 }
 0x1b3   :  { %v1153_v23 = vpop.f32.mrf.mxu0  ;;  %v1353_v2 = vpop.f32.mrf.mxu1 }
 0x1b4   :  { %v1454_v34 = vsel %vm1358_vm2, %v4195_v5, 0.0  ;;  %v4212_v23 = vadd.f32 %v3844_v63, %v3751_v4  ;;  %v4226_v4 = vadd.f32 %v3844_v63, %v3759_v12 }
 0x1b5   :  { %v1154_v54 = vpop.f32.mrf.mxu0  ;;  %v1455_v58 = vadd.f32 %v1454_v34, %v1453_v50  ;;  %v4208_v21 = vpop.f32.mrf.mxu1 }
 0x1b6   :  { %v4206_v7 = vadd.f32 %v3844_v63, %v1154_v54  ;;  %v1460_v34 = vsel %vm1358_vm2, %v4212_v23, 0.0  ;;  %v1462_v54 = vsel %vm1358_vm2, %v4220_v53, 0.0  ;;  %v1464_v8 = vsel %vm1358_vm2, %v4226_v4, 0.0 }
 0x1b7   :  { %v1156_v30 = vpop.f32.mrf.mxu0  ;;  %v1356_v2 = vpop.f32.mrf.mxu1 }
 0x1b8   :  { %v1456_v29 = vsel %vm1358_vm2, %v4206_v7, 0.0  ;;  %v4244_v2 = vadd.f32 %v3844_v63, %v3771_v24 }
 0x1b9   :  { %v1457_v26 = vadd.f32 %v1456_v29, %v1455_v58  ;;  %v4232_v58 = vadd.f32 %v3844_v63, %v3763_v16  ;;  %v4238_v29 = vadd.f32 %v3844_v63, %v3767_v20 }
 0x1ba   :  { %v1470_v20 = vsel %vm1358_vm2, %v4244_v2, 0.0 }
 0x1bb   :  { %v1459_v46 = vadd.f32 %v1458_v1, %v1457_v26  ;;  %v1466_v12 = vsel %vm1358_vm2, %v4232_v58, 0.0  ;;  %v1468_v16 = vsel %vm1358_vm2, %v4238_v29, 0.0 }
 0x1bd   :  { %v1461_v50 = vadd.f32 %v1460_v34, %v1459_v46  ;;  %v4250_v46 = vadd.f32 %v3844_v63, %v3775_v28 }
 0x1bf   :  { %v1463_v30 = vadd.f32 %v1462_v54, %v1461_v50  ;;  %v4256_v50 = vadd.f32 %v3844_v63, %v3779_v32  ;;  %v1472_v24 = vsel %vm1358_vm2, %v4250_v46, 0.0 }
 0x1c1   :  { %v1465_v26 = vadd.f32 %v1464_v8, %v1463_v30  ;;  %v4262_v30 = vadd.f32 %v3844_v63, %v3783_v36  ;;  %v1474_v28 = vsel %vm1358_vm2, %v4256_v50, 0.0 }
 0x1c3   :  { %v1467_v1 = vadd.f32 %v1466_v12, %v1465_v26  ;;  %v4268_v26 = vadd.f32 %v3844_v63, %v3787_v40  ;;  %v1476_v32 = vsel %vm1358_vm2, %v4262_v30, 0.0 }
 0x1c5   :  { %v1469_v34 = vadd.f32 %v1468_v16, %v1467_v1  ;;  %v4274_v1 = vadd.f32 %v3844_v63, %v3791_v44  ;;  %v1478_v36 = vsel %vm1358_vm2, %v4268_v26, 0.0 }
 0x1c7   :  { %v1471_v54 = vadd.f32 %v1470_v20, %v1469_v34  ;;  %v4280_v34 = vadd.f32 %v3844_v63, %v3795_v48  ;;  %v1480_v40 = vsel %vm1358_vm2, %v4274_v1, 0.0 }
 0x1c9   :  { %v1473_v8 = vadd.f32 %v1472_v24, %v1471_v54  ;;  %v4286_v54 = vadd.f32 %v3844_v63, %v3799_v52  ;;  %v1482_v44 = vsel %vm1358_vm2, %v4280_v34, 0.0 }
 0x1cb   :  { %v1475_v12 = vadd.f32 %v1474_v28, %v1473_v8  ;;  %v4292_v8 = vadd.f32 %v3844_v63, %v3803_v56  ;;  %v1484_v48 = vsel %vm1358_vm2, %v4286_v54, 0.0 }
 0x1cd   :  { %v1477_v16 = vadd.f32 %v1476_v32, %v1475_v12  ;;  %v4298_v12 = vadd.f32 %v3844_v63, %v3807_v60  ;;  %v1486_v52 = vsel %vm1358_vm2, %v4292_v8, 0.0 }
 0x1cf   :  { %v1479_v20 = vadd.f32 %v1478_v36, %v1477_v16  ;;  %v4304_v16 = vadd.f32 %v3844_v63, %v3811_v3  ;;  %v1488_v56 = vsel %vm1358_vm2, %v4298_v12, 0.0 }
 0x1d1   :  { %v1481_v24 = vadd.f32 %v1480_v40, %v1479_v20  ;;  %v4310_v20 = vadd.f32 %v3844_v63, %v3815_v11  ;;  %v1490_v60 = vsel %vm1358_vm2, %v4304_v16, 0.0 }
 0x1d3   :  { %v1483_v28 = vadd.f32 %v1482_v44, %v1481_v24  ;;  %v4316_v24 = vadd.f32 %v3844_v63, %v3819_v19  ;;  %v1492_v3 = vsel %vm1358_vm2, %v4310_v20, 0.0 }
 0x1d5   :  { %v1485_v32 = vadd.f32 %v1484_v48, %v1483_v28  ;;  %v4322_v28 = vadd.f32 %v3844_v63, %v3823_v27  ;;  %v1494_v11 = vsel %vm1358_vm2, %v4316_v24, 0.0 }
 0x1d7   :  { %v1487_v36 = vadd.f32 %v1486_v52, %v1485_v32  ;;  %v4328_v32 = vadd.f32 %v3844_v63, %v3827_v35  ;;  %v1496_v19 = vsel %vm1358_vm2, %v4322_v28, 0.0 }
 0x1d9   :  { %v1489_v40 = vadd.f32 %v1488_v56, %v1487_v36  ;;  %v4334_v36 = vadd.f32 %v3844_v63, %v3831_v43  ;;  %v1498_v27 = vsel %vm1358_vm2, %v4328_v32, 0.0 }
 0x1db   :  { %v1491_v44 = vadd.f32 %v1490_v60, %v1489_v40  ;;  %v4340_v40 = vadd.f32 %v3844_v63, %v3835_v51  ;;  %v1500_v35 = vsel %vm1358_vm2, %v4334_v36, 0.0 }
 0x1dd   :  { %v1493_v48 = vadd.f32 %v1492_v3, %v1491_v44  ;;  %v4346_v44 = vadd.f32 %v3844_v63, %v3839_v59  ;;  %v1502_v43 = vsel %vm1358_vm2, %v4340_v40, 0.0 }
 0x1df   :  { %v1495_v52 = vadd.f32 %v1494_v11, %v1493_v48  ;;  %v4352_v48 = vadd.f32 %v3844_v63, %v3852_v18  ;;  %v1504_v51 = vsel %vm1358_vm2, %v4346_v44, 0.0 }
 0x1e1   :  { %v1497_v56 = vadd.f32 %v1496_v19, %v1495_v52  ;;  %v4358_v52 = vadd.f32 %v3844_v63, %v3870_v47  ;;  %v1506_v59 = vsel %vm1358_vm2, %v4352_v48, 0.0 }
 0x1e3   :  { %v1499_v60 = vadd.f32 %v1498_v27, %v1497_v56  ;;  %v4364_v56 = vadd.f32 %v3844_v63, %v3888_v10  ;;  %v1508_v18 = vsel %vm1358_vm2, %v4358_v52, 0.0 }
 0x1e5   :  { %v1501_v3 = vadd.f32 %v1500_v35, %v1499_v60  ;;  %v4370_v60 = vadd.f32 %v3844_v63, %v3904_v42  ;;  %v1510_v47 = vsel %vm1358_vm2, %v4364_v56, 0.0 }
 0x1e7   :  { %v1503_v11 = vadd.f32 %v1502_v43, %v1501_v3  ;;  %v4376_v3 = vadd.f32 %v3844_v63, %v3920_v55  ;;  %v1512_v10 = vsel %vm1358_vm2, %v4370_v60, 0.0 }
 0x1e9   :  { %v1505_v19 = vadd.f32 %v1504_v51, %v1503_v11  ;;  %v4382_v11 = vadd.f32 %v3844_v63, %v3936_v39  ;;  %v1514_v42 = vsel %vm1358_vm2, %v4376_v3, 0.0 }
 0x1eb   :  { %v1507_v27 = vadd.f32 %v1506_v59, %v1505_v19  ;;  %v4388_v19 = vadd.f32 %v3844_v63, %v3952_v9  ;;  %v1516_v55 = vsel %vm1358_vm2, %v4382_v11, 0.0 }
 0x1ed   :  { %v1509_v35 = vadd.f32 %v1508_v18, %v1507_v27  ;;  %v4394_v27 = vadd.f32 %v3844_v63, %v3968_v0  ;;  %v1518_v39 = vsel %vm1358_vm2, %v4388_v19, 0.0 }
 0x1ef   :  { %v1511_v43 = vadd.f32 %v1510_v47, %v1509_v35  ;;  %v4400_v35 = vadd.f32 %v3844_v63, %v3984_v15  ;;  %v1520_v9 = vsel %vm1358_vm2, %v4394_v27, 0.0 }
 0x1f1   :  { %v1513_v51 = vadd.f32 %v1512_v10, %v1511_v43  ;;  %v4406_v43 = vadd.f32 %v3844_v63, %v4000_v17  ;;  %v1522_v0 = vsel %vm1358_vm2, %v4400_v35, 0.0 }
 0x1f3   :  { %v1515_v59 = vadd.f32 %v1514_v42, %v1513_v51  ;;  %v4412_v51 = vadd.f32 %v3844_v63, %v4016_v25  ;;  %v1524_v15 = vsel %vm1358_vm2, %v4406_v43, 0.0 }
 0x1f5   :  { %v1517_v18 = vadd.f32 %v1516_v55, %v1515_v59  ;;  %v4418_v59 = vadd.f32 %v3844_v63, %v4032_v33  ;;  %v1526_v17 = vsel %vm1358_vm2, %v4412_v51, 0.0  ;;  %v4432_v33 = vadd.f32 %v3844_v63, %v4060_v49 }
 0x1f7   :  { %v1519_v47 = vadd.f32 %v1518_v39, %v1517_v18  ;;  %v4424_v18 = vadd.f32 %v3844_v63, %v4046_v41  ;;  %v1528_v25 = vsel %vm1358_vm2, %v4418_v59, 0.0  ;;  %v4438_v41 = vadd.f32 %v3844_v63, %v4074_v57 }
 0x1f9   :  { %v1521_v10 = vadd.f32 %v1520_v9, %v1519_v47  ;;  %v1530_v9 = vsel %vm1358_vm2, %v4424_v18, 0.0 }
 0x1fb   :  { %v1523_v42 = vadd.f32 %v1522_v0, %v1521_v10  ;;  %v1532_v0 = vsel %vm1358_vm2, %v4432_v33, 0.0 }
 0x1fd   :  { %v1525_v55 = vadd.f32 %v1524_v15, %v1523_v42  ;;  %v1534_v15 = vsel %vm1358_vm2, %v4438_v41, 0.0 }
 0x1ff   :  { %v1527_v39 = vadd.f32 %v1526_v17, %v1525_v55  ;;  %v4444_v55 = vadd.f32 %v3844_v63, %v4088_v6 }
 0x201   :  { %v1529_v47 = vadd.f32 %v1528_v25, %v1527_v39  ;;  %v1536_v49 = vsel %vm1358_vm2, %v4444_v55, 0.0  ;;  %v4450_v39 = vadd.f32 %v3844_v63, %v4102_v22 }
 0x203   :  { %v1531_v10 = vadd.f32 %v1530_v9, %v1529_v47  ;;  %v1538_v57 = vsel %vm1358_vm2, %v4450_v39, 0.0  ;;  %v4456_v47 = vadd.f32 %v3844_v63, %v4116_v38 }
 0x205   :  { %v1533_v42 = vadd.f32 %v1532_v0, %v1531_v10  ;;  %v1540_v6 = vsel %vm1358_vm2, %v4456_v47, 0.0  ;;  %v4462_v10 = vadd.f32 %v3844_v63, %v4128_v31 }
 0x207   :  { %v1535_v17 = vadd.f32 %v1534_v15, %v1533_v42  ;;  %v1542_v22 = vsel %vm1358_vm2, %v4462_v10, 0.0  ;;  %v4468_v42 = vadd.f32 %v3844_v63, %v4140_v62 }
 0x209   :  { %v1537_v25 = vadd.f32 %v1536_v49, %v1535_v17  ;;  %7054 = vst [vmem:[#allocation51_spill] sm:$0xff] %v4468_v42  ;;  %v1544_v38 = vsel %vm1358_vm2, %v4468_v42, 0.0  ;;  %v4474_v17 = vadd.f32 %v3844_v63, %v4152_v45 }
 0x20b   :  { %v1539_v9 = vadd.f32 %v1538_v57, %v1537_v25  ;;  %7055 = vst [vmem:[#allocation52_spill] sm:$0xff] %v4474_v17  ;;  %v1546_v31 = vsel %vm1358_vm2, %v4474_v17, 0.0  ;;  %v4480_v25 = vadd.f32 %v3844_v63, %v4164_v61 }
 0x20d   :  { %v1541_v0 = vadd.f32 %v1540_v6, %v1539_v9  ;;  %7056 = vst [vmem:[#allocation53_spill] sm:$0xff] %v4480_v25  ;;  %v1548_v62 = vsel %vm1358_vm2, %v4480_v25, 0.0  ;;  %v7057_v9 = vld [vmem:[#allocation48_spill] sm:$0xff] }
 0x20e   :  { %v4486_v6 = vadd.f32 %v3844_v63, %v7057_v9 }
 0x20f   :  { %v1543_v15 = vadd.f32 %v1542_v22, %v1541_v0  ;;  %v7059_v22 = vld [vmem:[#allocation50_spill] sm:$0xff] }
 0x210   :  { %7058 = vst [vmem:[#allocation48_spill] sm:$0xff] %v4486_v6  ;;  %v1550_v45 = vsel %vm1358_vm2, %v4486_v6, 0.0 }
 0x211   :  { %v1545_v49 = vadd.f32 %v1544_v38, %v1543_v15  ;;  %v4492_v15 = vadd.f32 %v3844_v63, %v7059_v22 }
 0x213   :  { %v1547_v57 = vadd.f32 %v1546_v31, %v1545_v49  ;;  %7060 = vst [vmem:[#allocation50_spill] sm:$0xff] %v4492_v15  ;;  %v1552_v61 = vsel %vm1358_vm2, %v4492_v15, 0.0  ;;  %v4498_v49 = vadd.f32 %v3844_v63, %v4197_v37 }
 0x215   :  { %v1549_v0 = vadd.f32 %v1548_v62, %v1547_v57  ;;  %7061 = vst [vmem:[#allocation54_spill] sm:$0xff] %v4498_v49  ;;  %v1554_v9 = vsel %vm1358_vm2, %v4498_v49, 0.0  ;;  %v4504_v57 = vadd.f32 %v3844_v63, %v4208_v21  ;;  %v7065_v63 = vld [vmem:[#allocation2_spill] sm:$0xff] }
 0x217   :  { %v1551_v38 = vadd.f32 %v1550_v45, %v1549_v0  ;;  %7062 = vst [vmem:[#allocation55_spill] sm:$0xff] %v4504_v57  ;;  %v1556_v22 = vsel %vm1358_vm2, %v4504_v57, 0.0 }
 0x219   :  { %v1553_v31 = vadd.f32 %v1552_v61, %v1551_v38  ;;  %v7063_v38 = vld [vmem:[#allocation3_spill] sm:$0xff] }
 0x21b   :  { %v1555_v62 = vadd.f32 %v1554_v9, %v1553_v31  ;;  %v7067_v31 = vld [vmem:[#allocation4_spill] sm:$0xff] }
 0x21d   :  { %v1557_v0 = vadd.f32 %v1556_v22, %v1555_v62  ;;  %v7069_v62 = vld [vmem:[#allocation5_spill] sm:$0xff] }
 0x21f   :  { %v1558_v45 = vrot.slane %v1557_v0, 4 }
 0x221   :  { %v1559_v6 = vadd.f32 %v1558_v45, %v1557_v0  ;;  %v7072_v45 = vld [vmem:[#allocation7_spill] sm:$0xff] }
 0x223   :  { %v1560_v15 = vrot.slane %v1559_v6, 2 }
 0x225   :  { %v1561_v25 = vadd.f32 %v1560_v15, %v1559_v6  ;;  %v7070_v6 = vld [vmem:[#allocation6_spill] sm:$0xff] }
 0x227   :  { %v1562_v17 = vrot.slane %v1561_v25, 1 }
 0x229   :  { %v1563_v37 = vadd.f32 %v1562_v17, %v1561_v25 }
 0x22b   :  { %v4508_v42 = vmul.f32 0.00125, %v1563_v37 }
 0x22d   :  { %v4512_v61 = vsub.f32 %v7063_v38, %v4508_v42  ;;  %v4516_v21 = vsub.f32 %v7065_v63, %v4508_v42  ;;  %v4520_v9 = vsub.f32 %v7067_v31, %v4508_v42  ;;  %v4524_v22 = vsub.f32 %v7069_v62, %v4508_v42 }
 0x22e   :  { %v4532_v15 = vsub.f32 %v7070_v6, %v4508_v42  ;;  %v4538_v37 = vsub.f32 %v7072_v45, %v4508_v42  ;;  %v7076_v45 = vld [vmem:[#allocation9_spill] sm:$0xff] }
 0x22f   :  { %7064 = vst [vmem:[#allocation3_spill] sm:$0xff] %v4512_v61  ;;  %7066 = vst [vmem:[#allocation2_spill] sm:$0xff] %v4516_v21  ;;  %v1665_v17 = vmul.f32 %v4512_v61, %v4512_v61  ;;  %v1666_v25 = vmul.f32 %v4516_v21, %v4516_v21  ;;  %v1667_v0 = vmul.f32 %v4520_v9, %v4520_v9  ;;  %v7074_v21 = vld [vmem:[#allocation8_spill] sm:$0xff] }
 0x230   :  { %7068 = vst [vmem:[#allocation4_spill] sm:$0xff] %v4520_v9  ;;  %7071 = vst [vmem:[#allocation5_spill] sm:$0xff] %v4532_v15  ;;  %v1668_v38 = vmul.f32 %v4524_v22, %v4524_v22  ;;  %v4546_v61 = vsub.f32 %v7074_v21, %v4508_v42  ;;  %v1669_v6 = vmul.f32 %v4532_v15, %v4532_v15 }
 0x231   :  { %7073 = vst [vmem:[#allocation6_spill] sm:$0xff] %v4538_v37  ;;  %v1765_v63 = vsel %vm1358_vm2, %v1665_v17, 0.0  ;;  %v1766_v31 = vsel %vm1358_vm2, %v1666_v25, 0.0  ;;  %v1768_v9 = vsel %vm1358_vm2, %v1667_v0, 0.0  ;;  %v4553_v49 = vsub.f32 %v7076_v45, %v4508_v42 }
 0x232   :  { %v1767_v62 = vadd.f32 %v1766_v31, %v1765_v63  ;;  %7075 = vst [vmem:[#allocation7_spill] sm:$0xff] %v4546_v61  ;;  %v1670_v17 = vmul.f32 %v4538_v37, %v4538_v37  ;;  %v1770_v25 = vsel %vm1358_vm2, %v1668_v38, 0.0  ;;  %v7078_v31 = vld [vmem:[#allocation10_spill] sm:$0xff]  ;;  %v1671_v15 = vmul.f32 %v4546_v61, %v4546_v61 }
 0x233   :  { %7077 = vst [vmem:[#allocation8_spill] sm:$0xff] %v4553_v49  ;;  %v4560_v21 = vsub.f32 %v7078_v31, %v4508_v42  ;;  %v1772_v0 = vsel %vm1358_vm2, %v1669_v6, 0.0  ;;  %v1672_v37 = vmul.f32 %v4553_v49, %v4553_v49 }
 0x234   :  { %v1769_v57 = vadd.f32 %v1768_v9, %v1767_v62  ;;  %v7080_v62 = vld [vmem:[#allocation11_spill] sm:$0xff]  ;;  %v1774_v38 = vsel %vm1358_vm2, %v1670_v17, 0.0  ;;  %v1776_v6 = vsel %vm1358_vm2, %v1671_v15, 0.0 }
 0x235   :  { %7079 = vst [vmem:[#allocation9_spill] sm:$0xff] %v4560_v21  ;;  %v4567_v45 = vsub.f32 %v7080_v62, %v4508_v42  ;;  %v1673_v61 = vmul.f32 %v4560_v21, %v4560_v21  ;;  %v1778_v17 = vsel %vm1358_vm2, %v1672_v37, 0.0 }
 0x236   :  { %v1771_v63 = vadd.f32 %v1770_v25, %v1769_v57  ;;  %v7082_v25 = vld [vmem:[#allocation12_spill] sm:$0xff] }
 0x237   :  { %7081 = vst [vmem:[#allocation10_spill] sm:$0xff] %v4567_v45  ;;  %v4574_v31 = vsub.f32 %v7082_v25, %v4508_v42  ;;  %v1674_v49 = vmul.f32 %v4567_v45, %v4567_v45  ;;  %v1780_v15 = vsel %vm1358_vm2, %v1673_v61, 0.0 }
 0x238   :  { %v1773_v9 = vadd.f32 %v1772_v0, %v1771_v63  ;;  %v7084_v0 = vld [vmem:[#allocation13_spill] sm:$0xff] }
 0x239   :  { %7083 = vst [vmem:[#allocation11_spill] sm:$0xff] %v4574_v31  ;;  %v4581_v62 = vsub.f32 %v7084_v0, %v4508_v42  ;;  %v1675_v21 = vmul.f32 %v4574_v31, %v4574_v31  ;;  %v1782_v37 = vsel %vm1358_vm2, %v1674_v49, 0.0 }
 0x23a   :  { %v1775_v57 = vadd.f32 %v1774_v38, %v1773_v9  ;;  %v7086_v38 = vld [vmem:[#allocation14_spill] sm:$0xff] }
 0x23b   :  { %7085 = vst [vmem:[#allocation12_spill] sm:$0xff] %v4581_v62  ;;  %v4588_v25 = vsub.f32 %v7086_v38, %v4508_v42  ;;  %v1676_v45 = vmul.f32 %v4581_v62, %v4581_v62  ;;  %v1784_v61 = vsel %vm1358_vm2, %v1675_v21, 0.0 }
 0x23c   :  { %v1777_v63 = vadd.f32 %v1776_v6, %v1775_v57  ;;  %v7088_v6 = vld [vmem:[#allocation15_spill] sm:$0xff] }
 0x23d   :  { %7087 = vst [vmem:[#allocation13_spill] sm:$0xff] %v4588_v25  ;;  %v4595_v0 = vsub.f32 %v7088_v6, %v4508_v42  ;;  %v1677_v31 = vmul.f32 %v4588_v25, %v4588_v25  ;;  %v1786_v49 = vsel %vm1358_vm2, %v1676_v45, 0.0 }
 0x23e   :  { %v1779_v9 = vadd.f32 %v1778_v17, %v1777_v63  ;;  %v7090_v17 = vld [vmem:[#allocation16_spill] sm:$0xff] }
 0x23f   :  { %7089 = vst [vmem:[#allocation14_spill] sm:$0xff] %v4595_v0  ;;  %v4602_v38 = vsub.f32 %v7090_v17, %v4508_v42  ;;  %v1678_v62 = vmul.f32 %v4595_v0, %v4595_v0  ;;  %v1788_v21 = vsel %vm1358_vm2, %v1677_v31, 0.0 }
 0x240   :  { %v1781_v57 = vadd.f32 %v1780_v15, %v1779_v9  ;;  %v7092_v15 = vld [vmem:[#allocation17_spill] sm:$0xff] }
 0x241   :  { %7091 = vst [vmem:[#allocation15_spill] sm:$0xff] %v4602_v38  ;;  %v4609_v6 = vsub.f32 %v7092_v15, %v4508_v42  ;;  %v1679_v25 = vmul.f32 %v4602_v38, %v4602_v38  ;;  %v1790_v45 = vsel %vm1358_vm2, %v1678_v62, 0.0 }
 0x242   :  { %v1783_v63 = vadd.f32 %v1782_v37, %v1781_v57  ;;  %v7094_v37 = vld [vmem:[#allocation18_spill] sm:$0xff] }
 0x243   :  { %7093 = vst [vmem:[#allocation16_spill] sm:$0xff] %v4609_v6  ;;  %v4616_v17 = vsub.f32 %v7094_v37, %v4508_v42  ;;  %v1680_v0 = vmul.f32 %v4609_v6, %v4609_v6  ;;  %v1792_v31 = vsel %vm1358_vm2, %v1679_v25, 0.0 }
 0x244   :  { %v1785_v9 = vadd.f32 %v1784_v61, %v1783_v63  ;;  %v7096_v61 = vld [vmem:[#allocation19_spill] sm:$0xff] }
 0x245   :  { %7095 = vst [vmem:[#allocation17_spill] sm:$0xff] %v4616_v17  ;;  %v4623_v15 = vsub.f32 %v7096_v61, %v4508_v42  ;;  %v1681_v38 = vmul.f32 %v4616_v17, %v4616_v17  ;;  %v1794_v62 = vsel %vm1358_vm2, %v1680_v0, 0.0 }
 0x246   :  { %v1787_v57 = vadd.f32 %v1786_v49, %v1785_v9  ;;  %v7098_v49 = vld [vmem:[#allocation20_spill] sm:$0xff] }
 0x247   :  { %7097 = vst [vmem:[#allocation18_spill] sm:$0xff] %v4623_v15  ;;  %v4630_v37 = vsub.f32 %v7098_v49, %v4508_v42  ;;  %v1682_v6 = vmul.f32 %v4623_v15, %v4623_v15  ;;  %v1796_v25 = vsel %vm1358_vm2, %v1681_v38, 0.0 }
 0x248   :  { %v1789_v63 = vadd.f32 %v1788_v21, %v1787_v57  ;;  %v7100_v21 = vld [vmem:[#allocation21_spill] sm:$0xff] }
 0x249   :  { %7099 = vst [vmem:[#allocation19_spill] sm:$0xff] %v4630_v37  ;;  %v4637_v61 = vsub.f32 %v7100_v21, %v4508_v42  ;;  %v1683_v17 = vmul.f32 %v4630_v37, %v4630_v37  ;;  %v1798_v0 = vsel %vm1358_vm2, %v1682_v6, 0.0 }
 0x24a   :  { %v1791_v9 = vadd.f32 %v1790_v45, %v1789_v63  ;;  %v7102_v45 = vld [vmem:[#allocation22_spill] sm:$0xff] }
 0x24b   :  { %7101 = vst [vmem:[#allocation20_spill] sm:$0xff] %v4637_v61  ;;  %v4644_v49 = vsub.f32 %v7102_v45, %v4508_v42  ;;  %v1684_v15 = vmul.f32 %v4637_v61, %v4637_v61  ;;  %v1800_v38 = vsel %vm1358_vm2, %v1683_v17, 0.0 }
 0x24c   :  { %v1793_v57 = vadd.f32 %v1792_v31, %v1791_v9  ;;  %v7104_v31 = vld [vmem:[#allocation23_spill] sm:$0xff] }
 0x24d   :  { %7103 = vst [vmem:[#allocation21_spill] sm:$0xff] %v4644_v49  ;;  %v4651_v21 = vsub.f32 %v7104_v31, %v4508_v42  ;;  %v1685_v37 = vmul.f32 %v4644_v49, %v4644_v49  ;;  %v1802_v6 = vsel %vm1358_vm2, %v1684_v15, 0.0 }
 0x24e   :  { %v1795_v63 = vadd.f32 %v1794_v62, %v1793_v57  ;;  %v7106_v62 = vld [vmem:[#allocation24_spill] sm:$0xff] }
 0x24f   :  { %7105 = vst [vmem:[#allocation22_spill] sm:$0xff] %v4651_v21  ;;  %v4658_v45 = vsub.f32 %v7106_v62, %v4508_v42  ;;  %v1686_v61 = vmul.f32 %v4651_v21, %v4651_v21  ;;  %v1804_v17 = vsel %vm1358_vm2, %v1685_v37, 0.0 }
 0x250   :  { %v1797_v9 = vadd.f32 %v1796_v25, %v1795_v63  ;;  %v7108_v25 = vld [vmem:[#allocation25_spill] sm:$0xff] }
 0x251   :  { %7107 = vst [vmem:[#allocation23_spill] sm:$0xff] %v4658_v45  ;;  %v4665_v31 = vsub.f32 %v7108_v25, %v4508_v42  ;;  %v1687_v49 = vmul.f32 %v4658_v45, %v4658_v45  ;;  %v1806_v15 = vsel %vm1358_vm2, %v1686_v61, 0.0 }
 0x252   :  { %v1799_v57 = vadd.f32 %v1798_v0, %v1797_v9  ;;  %v7110_v0 = vld [vmem:[#allocation26_spill] sm:$0xff] }
 0x253   :  { %7109 = vst [vmem:[#allocation24_spill] sm:$0xff] %v4665_v31  ;;  %v4672_v62 = vsub.f32 %v7110_v0, %v4508_v42  ;;  %v1688_v21 = vmul.f32 %v4665_v31, %v4665_v31  ;;  %v1808_v37 = vsel %vm1358_vm2, %v1687_v49, 0.0 }
 0x254   :  { %v1801_v63 = vadd.f32 %v1800_v38, %v1799_v57  ;;  %v7112_v38 = vld [vmem:[#allocation27_spill] sm:$0xff] }
 0x255   :  { %7111 = vst [vmem:[#allocation25_spill] sm:$0xff] %v4672_v62  ;;  %v4679_v25 = vsub.f32 %v7112_v38, %v4508_v42  ;;  %v1689_v45 = vmul.f32 %v4672_v62, %v4672_v62  ;;  %v1810_v61 = vsel %vm1358_vm2, %v1688_v21, 0.0 }
 0x256   :  { %v1803_v9 = vadd.f32 %v1802_v6, %v1801_v63  ;;  %v7114_v6 = vld [vmem:[#allocation28_spill] sm:$0xff] }
 0x257   :  { %7113 = vst [vmem:[#allocation26_spill] sm:$0xff] %v4679_v25  ;;  %v4686_v0 = vsub.f32 %v7114_v6, %v4508_v42  ;;  %v1690_v31 = vmul.f32 %v4679_v25, %v4679_v25  ;;  %v1812_v49 = vsel %vm1358_vm2, %v1689_v45, 0.0 }
 0x258   :  { %v1805_v57 = vadd.f32 %v1804_v17, %v1803_v9  ;;  %v7116_v17 = vld [vmem:[#allocation29_spill] sm:$0xff] }
 0x259   :  { %7115 = vst [vmem:[#allocation27_spill] sm:$0xff] %v4686_v0  ;;  %v4693_v38 = vsub.f32 %v7116_v17, %v4508_v42  ;;  %v1691_v62 = vmul.f32 %v4686_v0, %v4686_v0  ;;  %v1814_v21 = vsel %vm1358_vm2, %v1690_v31, 0.0 }
 0x25a   :  { %v1807_v63 = vadd.f32 %v1806_v15, %v1805_v57  ;;  %v7118_v15 = vld [vmem:[#allocation30_spill] sm:$0xff] }
 0x25b   :  { %7117 = vst [vmem:[#allocation28_spill] sm:$0xff] %v4693_v38  ;;  %v4700_v6 = vsub.f32 %v7118_v15, %v4508_v42  ;;  %v1692_v25 = vmul.f32 %v4693_v38, %v4693_v38  ;;  %v1816_v45 = vsel %vm1358_vm2, %v1691_v62, 0.0 }
 0x25c   :  { %v1809_v9 = vadd.f32 %v1808_v37, %v1807_v63  ;;  %v7120_v37 = vld [vmem:[#allocation31_spill] sm:$0xff] }
 0x25d   :  { %7119 = vst [vmem:[#allocation29_spill] sm:$0xff] %v4700_v6  ;;  %v4707_v17 = vsub.f32 %v7120_v37, %v4508_v42  ;;  %v1693_v0 = vmul.f32 %v4700_v6, %v4700_v6  ;;  %v1818_v31 = vsel %vm1358_vm2, %v1692_v25, 0.0 }
 0x25e   :  { %v1811_v57 = vadd.f32 %v1810_v61, %v1809_v9  ;;  %v7122_v61 = vld [vmem:[#allocation32_spill] sm:$0xff] }
 0x25f   :  { %7121 = vst [vmem:[#allocation30_spill] sm:$0xff] %v4707_v17  ;;  %v4714_v15 = vsub.f32 %v7122_v61, %v4508_v42  ;;  %v1694_v38 = vmul.f32 %v4707_v17, %v4707_v17  ;;  %v1820_v62 = vsel %vm1358_vm2, %v1693_v0, 0.0 }
 0x260   :  { %v1813_v63 = vadd.f32 %v1812_v49, %v1811_v57  ;;  %v7124_v49 = vld [vmem:[#allocation33_spill] sm:$0xff] }
 0x261   :  { %7123 = vst [vmem:[#allocation31_spill] sm:$0xff] %v4714_v15  ;;  %v4721_v37 = vsub.f32 %v7124_v49, %v4508_v42  ;;  %v1695_v6 = vmul.f32 %v4714_v15, %v4714_v15  ;;  %v1822_v25 = vsel %vm1358_vm2, %v1694_v38, 0.0 }
 0x262   :  { %v1815_v9 = vadd.f32 %v1814_v21, %v1813_v63  ;;  %v7126_v21 = vld [vmem:[#allocation34_spill] sm:$0xff] }
 0x263   :  { %7125 = vst [vmem:[#allocation32_spill] sm:$0xff] %v4721_v37  ;;  %v4728_v61 = vsub.f32 %v7126_v21, %v4508_v42  ;;  %v1696_v17 = vmul.f32 %v4721_v37, %v4721_v37  ;;  %v1824_v0 = vsel %vm1358_vm2, %v1695_v6, 0.0 }
 0x264   :  { %v1817_v57 = vadd.f32 %v1816_v45, %v1815_v9  ;;  %v7128_v45 = vld [vmem:[#allocation35_spill] sm:$0xff] }
 0x265   :  { %7127 = vst [vmem:[#allocation33_spill] sm:$0xff] %v4728_v61  ;;  %v4735_v49 = vsub.f32 %v7128_v45, %v4508_v42  ;;  %v1697_v15 = vmul.f32 %v4728_v61, %v4728_v61  ;;  %v1826_v38 = vsel %vm1358_vm2, %v1696_v17, 0.0 }
 0x266   :  { %v1819_v63 = vadd.f32 %v1818_v31, %v1817_v57  ;;  %v7130_v31 = vld [vmem:[#allocation36_spill] sm:$0xff] }
 0x267   :  { %7129 = vst [vmem:[#allocation34_spill] sm:$0xff] %v4735_v49  ;;  %v4742_v21 = vsub.f32 %v7130_v31, %v4508_v42  ;;  %v1698_v37 = vmul.f32 %v4735_v49, %v4735_v49  ;;  %v1828_v6 = vsel %vm1358_vm2, %v1697_v15, 0.0 }
 0x268   :  { %v1821_v9 = vadd.f32 %v1820_v62, %v1819_v63  ;;  %v7132_v62 = vld [vmem:[#allocation37_spill] sm:$0xff] }
 0x269   :  { %7131 = vst [vmem:[#allocation35_spill] sm:$0xff] %v4742_v21  ;;  %v4749_v45 = vsub.f32 %v7132_v62, %v4508_v42  ;;  %v1699_v61 = vmul.f32 %v4742_v21, %v4742_v21  ;;  %v1830_v17 = vsel %vm1358_vm2, %v1698_v37, 0.0 }
 0x26a   :  { %v1823_v57 = vadd.f32 %v1822_v25, %v1821_v9  ;;  %v7134_v25 = vld [vmem:[#allocation38_spill] sm:$0xff] }
 0x26b   :  { %7133 = vst [vmem:[#allocation36_spill] sm:$0xff] %v4749_v45  ;;  %v4756_v31 = vsub.f32 %v7134_v25, %v4508_v42  ;;  %v1700_v49 = vmul.f32 %v4749_v45, %v4749_v45  ;;  %v1832_v15 = vsel %vm1358_vm2, %v1699_v61, 0.0 }
 0x26c   :  { %v1825_v63 = vadd.f32 %v1824_v0, %v1823_v57  ;;  %v7136_v0 = vld [vmem:[#allocation39_spill] sm:$0xff] }
 0x26d   :  { %7135 = vst [vmem:[#allocation37_spill] sm:$0xff] %v4756_v31  ;;  %v4763_v62 = vsub.f32 %v7136_v0, %v4508_v42  ;;  %v1701_v21 = vmul.f32 %v4756_v31, %v4756_v31  ;;  %v1834_v37 = vsel %vm1358_vm2, %v1700_v49, 0.0 }
 0x26e   :  { %v1827_v9 = vadd.f32 %v1826_v38, %v1825_v63  ;;  %v7138_v38 = vld [vmem:[#allocation40_spill] sm:$0xff] }
 0x26f   :  { %7137 = vst [vmem:[#allocation38_spill] sm:$0xff] %v4763_v62  ;;  %v4770_v25 = vsub.f32 %v7138_v38, %v4508_v42  ;;  %v1702_v45 = vmul.f32 %v4763_v62, %v4763_v62  ;;  %v1836_v61 = vsel %vm1358_vm2, %v1701_v21, 0.0 }
 0x270   :  { %v1829_v57 = vadd.f32 %v1828_v6, %v1827_v9  ;;  %v7140_v6 = vld [vmem:[#allocation41_spill] sm:$0xff] }
 0x271   :  { %7139 = vst [vmem:[#allocation39_spill] sm:$0xff] %v4770_v25  ;;  %v4777_v0 = vsub.f32 %v7140_v6, %v4508_v42  ;;  %v1703_v31 = vmul.f32 %v4770_v25, %v4770_v25  ;;  %v1838_v49 = vsel %vm1358_vm2, %v1702_v45, 0.0 }
 0x272   :  { %v1831_v63 = vadd.f32 %v1830_v17, %v1829_v57  ;;  %v7142_v17 = vld [vmem:[#allocation42_spill] sm:$0xff] }
 0x273   :  { %7141 = vst [vmem:[#allocation40_spill] sm:$0xff] %v4777_v0  ;;  %v4784_v38 = vsub.f32 %v7142_v17, %v4508_v42  ;;  %v1704_v62 = vmul.f32 %v4777_v0, %v4777_v0  ;;  %v1840_v21 = vsel %vm1358_vm2, %v1703_v31, 0.0 }
 0x274   :  { %v1833_v9 = vadd.f32 %v1832_v15, %v1831_v63  ;;  %v7144_v15 = vld [vmem:[#allocation43_spill] sm:$0xff] }
 0x275   :  { %7143 = vst [vmem:[#allocation41_spill] sm:$0xff] %v4784_v38  ;;  %v4791_v6 = vsub.f32 %v7144_v15, %v4508_v42  ;;  %v1705_v25 = vmul.f32 %v4784_v38, %v4784_v38  ;;  %v1842_v45 = vsel %vm1358_vm2, %v1704_v62, 0.0 }
 0x276   :  { %v1835_v57 = vadd.f32 %v1834_v37, %v1833_v9  ;;  %v7146_v37 = vld [vmem:[#allocation44_spill] sm:$0xff] }
 0x277   :  { %7145 = vst [vmem:[#allocation42_spill] sm:$0xff] %v4791_v6  ;;  %v4798_v17 = vsub.f32 %v7146_v37, %v4508_v42  ;;  %v1706_v0 = vmul.f32 %v4791_v6, %v4791_v6  ;;  %v1844_v31 = vsel %vm1358_vm2, %v1705_v25, 0.0 }
 0x278   :  { %v1837_v63 = vadd.f32 %v1836_v61, %v1835_v57  ;;  %v7147_v61 = vld [vmem:[#allocation45_spill] sm:$0xff] }
 0x279   :  { %v4805_v15 = vsub.f32 %v7147_v61, %v4508_v42  ;;  %v1707_v38 = vmul.f32 %v4798_v17, %v4798_v17  ;;  %v1846_v62 = vsel %vm1358_vm2, %v1706_v0, 0.0 }
 0x27a   :  { %v1839_v9 = vadd.f32 %v1838_v49, %v1837_v63  ;;  %v7149_v49 = vld [vmem:[#allocation46_spill] sm:$0xff] }
 0x27b   :  { %7148 = vst [vmem:[#allocation43_spill] sm:$0xff] %v4805_v15  ;;  %v4812_v37 = vsub.f32 %v7149_v49, %v4508_v42  ;;  %v1708_v6 = vmul.f32 %v4805_v15, %v4805_v15  ;;  %v1848_v25 = vsel %vm1358_vm2, %v1707_v38, 0.0 }
 0x27c   :  { %v1841_v57 = vadd.f32 %v1840_v21, %v1839_v9  ;;  %v7150_v21 = vld [vmem:[#allocation47_spill] sm:$0xff] }
 0x27d   :  { %v4819_v61 = vsub.f32 %v7150_v21, %v4508_v42  ;;  %v1709_v49 = vmul.f32 %v4812_v37, %v4812_v37  ;;  %v1850_v0 = vsel %vm1358_vm2, %v1708_v6, 0.0 }
 0x27e   :  { %v1843_v63 = vadd.f32 %v1842_v45, %v1841_v57  ;;  %v4826_v45 = vsub.f32 %v4181_v13, %v4508_v42  ;;  %v4840_v13 = vsub.f32 %v4195_v5, %v4508_v42  ;;  %v4854_v5 = vsub.f32 %v4203_v14, %v4508_v42 }
 0x27f   :  { %v1710_v15 = vmul.f32 %v4819_v61, %v4819_v61  ;;  %v1852_v38 = vsel %vm1358_vm2, %v1709_v49, 0.0  ;;  %v4868_v14 = vsub.f32 %v4220_v53, %v4508_v42  ;;  %v4882_v53 = vsub.f32 %v4232_v58, %v4508_v42 }
 0x280   :  { %v1845_v9 = vadd.f32 %v1844_v31, %v1843_v63  ;;  %v7151_v31 = vld [vmem:[#allocation49_spill] sm:$0xff]  ;;  %v4896_v58 = vsub.f32 %v4244_v2, %v4508_v42  ;;  %v4910_v2 = vsub.f32 %v4256_v50, %v4508_v42  ;;  %v4924_v50 = vsub.f32 %v4268_v26, %v4508_v42 }
 0x281   :  { %v4833_v21 = vsub.f32 %v7151_v31, %v4508_v42  ;;  %v1854_v6 = vsel %vm1358_vm2, %v1710_v15, 0.0  ;;  %v4938_v26 = vsub.f32 %v4280_v34, %v4508_v42  ;;  %v4952_v34 = vsub.f32 %v4292_v8, %v4508_v42 }
 0x282   :  { %v1847_v57 = vadd.f32 %v1846_v62, %v1845_v9  ;;  %v1711_v62 = vmul.f32 %v4826_v45, %v4826_v45  ;;  %v4966_v8 = vsub.f32 %v4304_v16, %v4508_v42  ;;  %v4980_v16 = vsub.f32 %v4316_v24, %v4508_v42 }
 0x283   :  { %v1712_v31 = vmul.f32 %v4833_v21, %v4833_v21  ;;  %v4994_v24 = vsub.f32 %v4328_v32, %v4508_v42  ;;  %v5008_v32 = vsub.f32 %v4340_v40, %v4508_v42  ;;  %v5022_v40 = vsub.f32 %v4352_v48, %v4508_v42 }
 0x284   :  { %v1849_v63 = vadd.f32 %v1848_v25, %v1847_v57  ;;  %v4847_v25 = vsub.f32 %v4206_v7, %v4508_v42  ;;  %v1856_v49 = vsel %vm1358_vm2, %v1711_v62, 0.0  ;;  %v4861_v7 = vsub.f32 %v4212_v23, %v4508_v42 }
 0x285   :  { %v1858_v15 = vsel %vm1358_vm2, %v1712_v31, 0.0  ;;  %v4875_v23 = vsub.f32 %v4226_v4, %v4508_v42  ;;  %v4889_v4 = vsub.f32 %v4238_v29, %v4508_v42  ;;  %v4903_v29 = vsub.f32 %v4250_v46, %v4508_v42 }
 0x286   :  { %v1851_v9 = vadd.f32 %v1850_v0, %v1849_v63  ;;  %v1713_v0 = vmul.f32 %v4840_v13, %v4840_v13  ;;  %v4917_v46 = vsub.f32 %v4262_v30, %v4508_v42  ;;  %v4931_v30 = vsub.f32 %v4274_v1, %v4508_v42 }
 0x287   :  { %v4945_v1 = vsub.f32 %v4286_v54, %v4508_v42  ;;  %v4959_v54 = vsub.f32 %v4298_v12, %v4508_v42  ;;  %v4973_v12 = vsub.f32 %v4310_v20, %v4508_v42  ;;  %v4987_v20 = vsub.f32 %v4322_v28, %v4508_v42 }
 0x288   :  { %v1853_v57 = vadd.f32 %v1852_v38, %v1851_v9  ;;  %v1714_v38 = vmul.f32 %v4847_v25, %v4847_v25  ;;  %v1860_v62 = vsel %vm1358_vm2, %v1713_v0, 0.0  ;;  %v5001_v28 = vsub.f32 %v4334_v36, %v4508_v42 }
 0x289   :  { %v5015_v36 = vsub.f32 %v4346_v44, %v4508_v42  ;;  %v5029_v44 = vsub.f32 %v4358_v52, %v4508_v42  ;;  %v5036_v48 = vsub.f32 %v4364_v56, %v4508_v42  ;;  %v5043_v52 = vsub.f32 %v4370_v60, %v4508_v42 }
 0x28a   :  { %v1855_v63 = vadd.f32 %v1854_v6, %v1853_v57  ;;  %v1715_v6 = vmul.f32 %v4854_v5, %v4854_v5  ;;  %v1862_v31 = vsel %vm1358_vm2, %v1714_v38, 0.0  ;;  %v5050_v56 = vsub.f32 %v4376_v3, %v4508_v42 }
 0x28b   :  { %v5057_v60 = vsub.f32 %v4382_v11, %v4508_v42  ;;  %v5064_v3 = vsub.f32 %v4388_v19, %v4508_v42  ;;  %v5071_v11 = vsub.f32 %v4394_v27, %v4508_v42  ;;  %v5078_v19 = vsub.f32 %v4400_v35, %v4508_v42 }
 0x28c   :  { %v1857_v9 = vadd.f32 %v1856_v49, %v1855_v63  ;;  %v1716_v49 = vmul.f32 %v4861_v7, %v4861_v7  ;;  %v1864_v0 = vsel %vm1358_vm2, %v1715_v6, 0.0  ;;  %v5085_v27 = vsub.f32 %v4406_v43, %v4508_v42 }
 0x28d   :  { %v5092_v35 = vsub.f32 %v4412_v51, %v4508_v42  ;;  %v5099_v43 = vsub.f32 %v4418_v59, %v4508_v42  ;;  %v5106_v51 = vsub.f32 %v4424_v18, %v4508_v42  ;;  %v5113_v59 = vsub.f32 %v4432_v33, %v4508_v42 }
 0x28e   :  { %v1859_v57 = vadd.f32 %v1858_v15, %v1857_v9  ;;  %v1717_v15 = vmul.f32 %v4868_v14, %v4868_v14  ;;  %v1866_v38 = vsel %vm1358_vm2, %v1716_v49, 0.0  ;;  %v5120_v18 = vsub.f32 %v4438_v41, %v4508_v42 }
 0x28f   :  { %7152 = vst [vmem:[#allocation44_spill] sm:$0xff] %v5106_v51  ;;  %7153 = vst [vmem:[#allocation45_spill] sm:$0xff] %v5113_v59  ;;  %v5127_v33 = vsub.f32 %v4444_v55, %v4508_v42  ;;  %v5134_v41 = vsub.f32 %v4450_v39, %v4508_v42  ;;  %v5141_v55 = vsub.f32 %v4456_v47, %v4508_v42 }
 0x290   :  { %v1861_v63 = vadd.f32 %v1860_v62, %v1859_v57  ;;  %v1718_v62 = vmul.f32 %v4875_v23, %v4875_v23  ;;  %v1868_v6 = vsel %vm1358_vm2, %v1717_v15, 0.0  ;;  %7154 = vst [vmem:[#allocation46_spill] sm:$0xff] %v5120_v18  ;;  %v5148_v39 = vsub.f32 %v4462_v10, %v4508_v42 }
 0x291   :  { %7155 = vst [vmem:[#allocation47_spill] sm:$0xff] %v5127_v33  ;;  %7156 = vst [vmem:[#allocation49_spill] sm:$0xff] %v5134_v41 }
 0x292   :  { %v1863_v9 = vadd.f32 %v1862_v31, %v1861_v63  ;;  %v1719_v31 = vmul.f32 %v4882_v53, %v4882_v53  ;;  %v1870_v49 = vsel %vm1358_vm2, %v1718_v62, 0.0  ;;  %7157 = vst [vmem:[#allocation56_spill] sm:$0xff] %v5141_v55  ;;  %7158 = vst [vmem:[#allocation57_spill] sm:$0xff] %v5148_v39 }
 0x294   :  { %v1865_v57 = vadd.f32 %v1864_v0, %v1863_v9  ;;  %v1720_v0 = vmul.f32 %v4889_v4, %v4889_v4  ;;  %v1872_v15 = vsel %vm1358_vm2, %v1719_v31, 0.0 }
 0x296   :  { %v1867_v63 = vadd.f32 %v1866_v38, %v1865_v57  ;;  %v1721_v38 = vmul.f32 %v4896_v58, %v4896_v58  ;;  %v1874_v62 = vsel %vm1358_vm2, %v1720_v0, 0.0 }
 0x298   :  { %v1869_v9 = vadd.f32 %v1868_v6, %v1867_v63  ;;  %v1722_v6 = vmul.f32 %v4903_v29, %v4903_v29  ;;  %v1876_v31 = vsel %vm1358_vm2, %v1721_v38, 0.0 }
 0x29a   :  { %v1871_v57 = vadd.f32 %v1870_v49, %v1869_v9  ;;  %v1723_v49 = vmul.f32 %v4910_v2, %v4910_v2  ;;  %v1878_v0 = vsel %vm1358_vm2, %v1722_v6, 0.0 }
 0x29c   :  { %v1873_v63 = vadd.f32 %v1872_v15, %v1871_v57  ;;  %v1724_v15 = vmul.f32 %v4917_v46, %v4917_v46  ;;  %v1880_v38 = vsel %vm1358_vm2, %v1723_v49, 0.0 }
 0x29e   :  { %v1875_v9 = vadd.f32 %v1874_v62, %v1873_v63  ;;  %v1725_v62 = vmul.f32 %v4924_v50, %v4924_v50  ;;  %v1882_v6 = vsel %vm1358_vm2, %v1724_v15, 0.0 }
 0x2a0   :  { %v1877_v57 = vadd.f32 %v1876_v31, %v1875_v9  ;;  %v1726_v31 = vmul.f32 %v4931_v30, %v4931_v30  ;;  %v1884_v49 = vsel %vm1358_vm2, %v1725_v62, 0.0 }
 0x2a2   :  { %v1879_v63 = vadd.f32 %v1878_v0, %v1877_v57  ;;  %v1727_v0 = vmul.f32 %v4938_v26, %v4938_v26  ;;  %v1886_v15 = vsel %vm1358_vm2, %v1726_v31, 0.0 }
 0x2a4   :  { %v1881_v9 = vadd.f32 %v1880_v38, %v1879_v63  ;;  %v1728_v38 = vmul.f32 %v4945_v1, %v4945_v1  ;;  %v1888_v62 = vsel %vm1358_vm2, %v1727_v0, 0.0 }
 0x2a6   :  { %v1883_v57 = vadd.f32 %v1882_v6, %v1881_v9  ;;  %v1729_v6 = vmul.f32 %v4952_v34, %v4952_v34  ;;  %v1890_v31 = vsel %vm1358_vm2, %v1728_v38, 0.0 }
 0x2a8   :  { %v1885_v63 = vadd.f32 %v1884_v49, %v1883_v57  ;;  %v1730_v49 = vmul.f32 %v4959_v54, %v4959_v54  ;;  %v1892_v0 = vsel %vm1358_vm2, %v1729_v6, 0.0 }
 0x2aa   :  { %v1887_v9 = vadd.f32 %v1886_v15, %v1885_v63  ;;  %v1731_v15 = vmul.f32 %v4966_v8, %v4966_v8  ;;  %v1894_v38 = vsel %vm1358_vm2, %v1730_v49, 0.0 }
 0x2ac   :  { %v1889_v57 = vadd.f32 %v1888_v62, %v1887_v9  ;;  %v1732_v62 = vmul.f32 %v4973_v12, %v4973_v12  ;;  %v1896_v6 = vsel %vm1358_vm2, %v1731_v15, 0.0 }
 0x2ae   :  { %v1891_v63 = vadd.f32 %v1890_v31, %v1889_v57  ;;  %v1733_v31 = vmul.f32 %v4980_v16, %v4980_v16  ;;  %v1898_v49 = vsel %vm1358_vm2, %v1732_v62, 0.0 }
 0x2b0   :  { %v1893_v9 = vadd.f32 %v1892_v0, %v1891_v63  ;;  %v1734_v0 = vmul.f32 %v4987_v20, %v4987_v20  ;;  %v1900_v15 = vsel %vm1358_vm2, %v1733_v31, 0.0 }
 0x2b2   :  { %v1895_v57 = vadd.f32 %v1894_v38, %v1893_v9  ;;  %v1735_v38 = vmul.f32 %v4994_v24, %v4994_v24  ;;  %v1902_v62 = vsel %vm1358_vm2, %v1734_v0, 0.0 }
 0x2b4   :  { %v1897_v63 = vadd.f32 %v1896_v6, %v1895_v57  ;;  %v1736_v6 = vmul.f32 %v5001_v28, %v5001_v28  ;;  %v1904_v31 = vsel %vm1358_vm2, %v1735_v38, 0.0 }
 0x2b6   :  { %v1899_v9 = vadd.f32 %v1898_v49, %v1897_v63  ;;  %v1737_v49 = vmul.f32 %v5008_v32, %v5008_v32  ;;  %v1906_v0 = vsel %vm1358_vm2, %v1736_v6, 0.0 }
 0x2b8   :  { %v1901_v57 = vadd.f32 %v1900_v15, %v1899_v9  ;;  %v1738_v15 = vmul.f32 %v5015_v36, %v5015_v36  ;;  %v1908_v38 = vsel %vm1358_vm2, %v1737_v49, 0.0 }
 0x2ba   :  { %v1903_v63 = vadd.f32 %v1902_v62, %v1901_v57  ;;  %v1739_v62 = vmul.f32 %v5022_v40, %v5022_v40  ;;  %v1910_v6 = vsel %vm1358_vm2, %v1738_v15, 0.0 }
 0x2bc   :  { %v1905_v9 = vadd.f32 %v1904_v31, %v1903_v63  ;;  %v1740_v31 = vmul.f32 %v5029_v44, %v5029_v44  ;;  %v1912_v49 = vsel %vm1358_vm2, %v1739_v62, 0.0 }
 0x2be   :  { %v1907_v57 = vadd.f32 %v1906_v0, %v1905_v9  ;;  %v1741_v0 = vmul.f32 %v5036_v48, %v5036_v48  ;;  %v1914_v15 = vsel %vm1358_vm2, %v1740_v31, 0.0 }
 0x2c0   :  { %v1909_v63 = vadd.f32 %v1908_v38, %v1907_v57  ;;  %v1742_v38 = vmul.f32 %v5043_v52, %v5043_v52  ;;  %v1916_v62 = vsel %vm1358_vm2, %v1741_v0, 0.0 }
 0x2c2   :  { %v1911_v9 = vadd.f32 %v1910_v6, %v1909_v63  ;;  %v1743_v6 = vmul.f32 %v5050_v56, %v5050_v56  ;;  %v1918_v31 = vsel %vm1358_vm2, %v1742_v38, 0.0 }
 0x2c4   :  { %v1913_v57 = vadd.f32 %v1912_v49, %v1911_v9  ;;  %v1744_v49 = vmul.f32 %v5057_v60, %v5057_v60  ;;  %v1920_v0 = vsel %vm1358_vm2, %v1743_v6, 0.0 }
 0x2c6   :  { %v1915_v63 = vadd.f32 %v1914_v15, %v1913_v57  ;;  %v1745_v15 = vmul.f32 %v5064_v3, %v5064_v3  ;;  %v1922_v38 = vsel %vm1358_vm2, %v1744_v49, 0.0 }
 0x2c8   :  { %v1917_v9 = vadd.f32 %v1916_v62, %v1915_v63  ;;  %v1746_v62 = vmul.f32 %v5071_v11, %v5071_v11  ;;  %v1924_v6 = vsel %vm1358_vm2, %v1745_v15, 0.0 }
 0x2ca   :  { %v1919_v57 = vadd.f32 %v1918_v31, %v1917_v9  ;;  %v1747_v31 = vmul.f32 %v5078_v19, %v5078_v19  ;;  %v1926_v49 = vsel %vm1358_vm2, %v1746_v62, 0.0 }
 0x2cc   :  { %v1921_v63 = vadd.f32 %v1920_v0, %v1919_v57  ;;  %v1748_v0 = vmul.f32 %v5085_v27, %v5085_v27  ;;  %v1928_v15 = vsel %vm1358_vm2, %v1747_v31, 0.0 }
 0x2ce   :  { %v1923_v9 = vadd.f32 %v1922_v38, %v1921_v63  ;;  %v1749_v38 = vmul.f32 %v5092_v35, %v5092_v35  ;;  %v1930_v62 = vsel %vm1358_vm2, %v1748_v0, 0.0 }
 0x2d0   :  { %v1925_v57 = vadd.f32 %v1924_v6, %v1923_v9  ;;  %v1750_v6 = vmul.f32 %v5099_v43, %v5099_v43  ;;  %v1932_v31 = vsel %vm1358_vm2, %v1749_v38, 0.0 }
 0x2d2   :  { %v1927_v63 = vadd.f32 %v1926_v49, %v1925_v57  ;;  %v1751_v49 = vmul.f32 %v5106_v51, %v5106_v51  ;;  %v1934_v0 = vsel %vm1358_vm2, %v1750_v6, 0.0 }
 0x2d4   :  { %v1929_v9 = vadd.f32 %v1928_v15, %v1927_v63  ;;  %v1752_v15 = vmul.f32 %v5113_v59, %v5113_v59  ;;  %v1936_v38 = vsel %vm1358_vm2, %v1751_v49, 0.0 }
 0x2d6   :  { %v1931_v57 = vadd.f32 %v1930_v62, %v1929_v9  ;;  %v1753_v62 = vmul.f32 %v5120_v18, %v5120_v18  ;;  %v1938_v6 = vsel %vm1358_vm2, %v1752_v15, 0.0 }
 0x2d8   :  { %v1933_v63 = vadd.f32 %v1932_v31, %v1931_v57  ;;  %v1754_v31 = vmul.f32 %v5127_v33, %v5127_v33  ;;  %v1940_v49 = vsel %vm1358_vm2, %v1753_v62, 0.0  ;;  %v1756_v33 = vmul.f32 %v5141_v55, %v5141_v55 }
 0x2da   :  { %v1935_v9 = vadd.f32 %v1934_v0, %v1933_v63  ;;  %v1755_v0 = vmul.f32 %v5134_v41, %v5134_v41  ;;  %v1942_v15 = vsel %vm1358_vm2, %v1754_v31, 0.0  ;;  %v1757_v41 = vmul.f32 %v5148_v39, %v5148_v39 }
 0x2db   :  { %v1946_v31 = vsel %vm1358_vm2, %v1756_v33, 0.0 }
 0x2dc   :  { %v1937_v57 = vadd.f32 %v1936_v38, %v1935_v9  ;;  %v7159_v38 = vld [vmem:[#allocation51_spill] sm:$0xff]  ;;  %v1944_v62 = vsel %vm1358_vm2, %v1755_v0, 0.0  ;;  %v1948_v0 = vsel %vm1358_vm2, %v1757_v41, 0.0 }
 0x2dd   :  { %v5155_v47 = vsub.f32 %v7159_v38, %v4508_v42 }
 0x2de   :  { %v1939_v63 = vadd.f32 %v1938_v6, %v1937_v57  ;;  %v7161_v6 = vld [vmem:[#allocation52_spill] sm:$0xff] }
 0x2df   :  { %7160 = vst [vmem:[#allocation51_spill] sm:$0xff] %v5155_v47  ;;  %v5162_v10 = vsub.f32 %v7161_v6, %v4508_v42  ;;  %v1758_v55 = vmul.f32 %v5155_v47, %v5155_v47 }
 0x2e0   :  { %v1941_v9 = vadd.f32 %v1940_v49, %v1939_v63  ;;  %v7163_v49 = vld [vmem:[#allocation53_spill] sm:$0xff] }
 0x2e1   :  { %7162 = vst [vmem:[#allocation52_spill] sm:$0xff] %v5162_v10  ;;  %v5169_v38 = vsub.f32 %v7163_v49, %v4508_v42  ;;  %v1759_v39 = vmul.f32 %v5162_v10, %v5162_v10  ;;  %v1950_v33 = vsel %vm1358_vm2, %v1758_v55, 0.0 }
 0x2e2   :  { %v1943_v57 = vadd.f32 %v1942_v15, %v1941_v9  ;;  %v7165_v15 = vld [vmem:[#allocation48_spill] sm:$0xff] }
 0x2e3   :  { %7164 = vst [vmem:[#allocation53_spill] sm:$0xff] %v5169_v38  ;;  %v5176_v6 = vsub.f32 %v7165_v15, %v4508_v42  ;;  %v1760_v47 = vmul.f32 %v5169_v38, %v5169_v38  ;;  %v1952_v41 = vsel %vm1358_vm2, %v1759_v39, 0.0 }
 0x2e4   :  { %v1945_v63 = vadd.f32 %v1944_v62, %v1943_v57  ;;  %v7167_v62 = vld [vmem:[#allocation50_spill] sm:$0xff] }
 0x2e5   :  { %7166 = vst [vmem:[#allocation48_spill] sm:$0xff] %v5176_v6  ;;  %v5183_v49 = vsub.f32 %v7167_v62, %v4508_v42  ;;  %v1761_v10 = vmul.f32 %v5176_v6, %v5176_v6  ;;  %v1954_v55 = vsel %vm1358_vm2, %v1760_v47, 0.0 }
 0x2e6   :  { %v1947_v9 = vadd.f32 %v1946_v31, %v1945_v63  ;;  %v7169_v31 = vld [vmem:[#allocation54_spill] sm:$0xff] }
 0x2e7   :  { %7168 = vst [vmem:[#allocation50_spill] sm:$0xff] %v5183_v49  ;;  %v5190_v15 = vsub.f32 %v7169_v31, %v4508_v42  ;;  %v1762_v38 = vmul.f32 %v5183_v49, %v5183_v49  ;;  %v1956_v31 = vsel %vm1358_vm2, %v1761_v10, 0.0 }
 0x2e8   :  { %v1949_v57 = vadd.f32 %v1948_v0, %v1947_v9  ;;  %v7171_v0 = vld [vmem:[#allocation55_spill] sm:$0xff] }
 0x2e9   :  { %7170 = vst [vmem:[#allocation54_spill] sm:$0xff] %v5190_v15  ;;  %v5197_v62 = vsub.f32 %v7171_v0, %v4508_v42 }
 0x2ea   :  { %v1951_v63 = vadd.f32 %v1950_v33, %v1949_v57  ;;  %v1763_v33 = vmul.f32 %v5190_v15, %v5190_v15 }
 0x2eb   :  { %7172 = vst [vmem:[#allocation55_spill] sm:$0xff] %v5197_v62  ;;  %v1764_v39 = vmul.f32 %v5197_v62, %v5197_v62 }
 0x2ec   :  { %v1953_v9 = vadd.f32 %v1952_v41, %v1951_v63  ;;  %v1958_v63 = vsel %vm1358_vm2, %v1762_v38, 0.0  ;;  %v1960_v42 = vsel %vm1358_vm2, %v1763_v33, 0.0 }
 0x2ed   :  { %v1962_v49 = vsel %vm1358_vm2, %v1764_v39, 0.0 }
 0x2ee   :  { %v1955_v57 = vadd.f32 %v1954_v55, %v1953_v9 }
 0x2f0   :  { %v1957_v18 = vadd.f32 %v1956_v31, %v1955_v57  ;;  %v1976_v31 = vlaneseq }
 0x2f2   :  { %v1959_v41 = vadd.f32 %v1958_v63, %v1957_v18  ;;  %v1977_v62 = vshrl.u32 %v1976_v31, 7  ;;  %v1971_v18 = vld [vmem:[%s6823_s3] sm:$0x1] }
 0x2f4   :  { %v1961_v0 = vadd.f32 %v1960_v42, %v1959_v41  ;;  %v1978_v38 = vsub.s32 0, %v1977_v62  ;;  %v7174_v41 = vld [vmem:[#allocation2_spill] sm:$0xff]  ;;  %v7176_v62 = vld [vmem:[#allocation5_spill] sm:$0xff] }
 0x2f6   :  { %v1963_v6 = vadd.f32 %v1962_v49, %v1961_v0  ;;  %v7173_v49 = vld [vmem:[#allocation3_spill] sm:$0xff] }
 0x2f8   :  { %v1964_v47 = vrot.slane %v1963_v6, 4 }
 0x2fa   :  { %v1965_v9 = vadd.f32 %v1964_v47, %v1963_v6  ;;  %v7177_v47 = vld [vmem:[#allocation6_spill] sm:$0xff] }
 0x2fc   :  { %v1966_v55 = vrot.slane %v1965_v9, 2 }
 0x2fe   :  { %v1967_v59 = vadd.f32 %v1966_v55, %v1965_v9  ;;  %v7178_v55 = vld [vmem:[#allocation7_spill] sm:$0xff] }
 0x300   :  { %v1968_v15 = vrot.slane %v1967_v59, 1 }
 0x302   :  { %v1969_v51 = vadd.f32 %v1968_v15, %v1967_v59  ;;  %v7175_v59 = vld [vmem:[#allocation4_spill] sm:$0xff] }
 0x304   :  { %v1970_v10 = vmul.f32 0.00125, %v1969_v51 }
 0x306   :  { %v1972_v57 = vadd.f32 1e-05, %v1970_v10 }
 0x308   :  { %3194 = vrsqrt.f32 %v1972_v57  ;;  %v7179_v57 = vld [vmem:[#allocation8_spill] sm:$0xff] }
 0x315   :  { %v3195_v33 = vpop.eup %3194 }
 0x316   :  { %v1974_v63 = vmul.f32 %v3195_v33, %v1971_v18  ;;  %v7180_v18 = vld [vmem:[#allocation9_spill] sm:$0xff] }
 0x318   :  { %v5213_v39 = vrot.slane %v1974_v63, %v1978_v38  ;;  %v7181_v38 = vld [vmem:[#allocation10_spill] sm:$0xff]  ;;  %v7183_v63 = vld [vmem:[#allocation11_spill] sm:$0xff] }
 0x31a   :  { %v5217_v6 = vmul.f32 %v5213_v39, %v7173_v49  ;;  %v5221_v51 = vmul.f32 %v5213_v39, %v7174_v41  ;;  %v5225_v15 = vmul.f32 %v5213_v39, %v7175_v59  ;;  %v5229_v42 = vmul.f32 %v5213_v39, %v4524_v22  ;;  %v7185_v41 = vld [vmem:[#allocation12_spill] sm:$0xff] }
 0x31b   :  { %v5233_v0 = vmul.f32 %v5213_v39, %v7176_v62  ;;  %v5237_v9 = vmul.f32 %v5213_v39, %v7177_v47  ;;  %v5241_v10 = vmul.f32 %v5213_v39, %v7178_v55  ;;  %v5245_v31 = vmul.f32 %v5213_v39, %v7179_v57  ;;  %v7187_v62 = vld [vmem:[#allocation13_spill] sm:$0xff]  ;;  %v7189_v55 = vld [vmem:[#allocation14_spill] sm:$0xff] }
 0x31c   :  { %v5249_v22 = vmul.f32 %v5213_v39, %v7180_v18  ;;  %v5253_v33 = vmul.f32 %v5213_v39, %v7181_v38  ;;  %v5257_v49 = vmul.f32 %v5213_v39, %v7183_v63  ;;  %v5261_v59 = vmul.f32 %v5213_v39, %v7185_v41  ;;  %v7191_v18 = vld [vmem:[#allocation15_spill] sm:$0xff] }
 0x31d   :  { %v5265_v47 = vmul.f32 %v5213_v39, %v7187_v62  ;;  %v5269_v57 = vmul.f32 %v5213_v39, %v7189_v55  ;;  %v5273_v38 = vmul.f32 %v5213_v39, %v7191_v18 }
 0x31e   :  { %7182 = vst [vmem:[#allocation3_spill] sm:$0xff] %v5253_v33  ;;  %7184 = vst [vmem:[#allocation2_spill] sm:$0xff] %v5257_v49  ;;  %v7193_v33 = vld [vmem:[#allocation16_spill] sm:$0xff]  ;;  %v7195_v49 = vld [vmem:[#allocation17_spill] sm:$0xff] }
 0x31f   :  { %7186 = vst [vmem:[#allocation4_spill] sm:$0xff] %v5261_v59  ;;  %7188 = vst [vmem:[#allocation5_spill] sm:$0xff] %v5265_v47  ;;  %v5277_v63 = vmul.f32 %v5213_v39, %v7193_v33  ;;  %v5281_v41 = vmul.f32 %v5213_v39, %v7195_v49  ;;  %v7197_v59 = vld [vmem:[#allocation18_spill] sm:$0xff]  ;;  %v7199_v47 = vld [vmem:[#allocation19_spill] sm:$0xff] }
 0x320   :  { %7190 = vst [vmem:[#allocation6_spill] sm:$0xff] %v5269_v57  ;;  %7192 = vst [vmem:[#allocation7_spill] sm:$0xff] %v5273_v38  ;;  %v5285_v62 = vmul.f32 %v5213_v39, %v7197_v59  ;;  %v5289_v55 = vmul.f32 %v5213_v39, %v7199_v47  ;;  %v7201_v57 = vld [vmem:[#allocation20_spill] sm:$0xff]  ;;  %v7203_v38 = vld [vmem:[#allocation21_spill] sm:$0xff] }
 0x321   :  { %7194 = vst [vmem:[#allocation8_spill] sm:$0xff] %v5277_v63  ;;  %7196 = vst [vmem:[#allocation9_spill] sm:$0xff] %v5281_v41  ;;  %v5293_v18 = vmul.f32 %v5213_v39, %v7201_v57  ;;  %v5297_v33 = vmul.f32 %v5213_v39, %v7203_v38  ;;  %v7205_v63 = vld [vmem:[#allocation22_spill] sm:$0xff]  ;;  %v7207_v41 = vld [vmem:[#allocation23_spill] sm:$0xff] }
 0x322   :  { %7198 = vst [vmem:[#allocation10_spill] sm:$0xff] %v5285_v62  ;;  %7200 = vst [vmem:[#allocation11_spill] sm:$0xff] %v5289_v55  ;;  %v5301_v49 = vmul.f32 %v5213_v39, %v7205_v63  ;;  %v5305_v59 = vmul.f32 %v5213_v39, %v7207_v41  ;;  %v7209_v62 = vld [vmem:[#allocation24_spill] sm:$0xff]  ;;  %v7211_v55 = vld [vmem:[#allocation25_spill] sm:$0xff] }
 0x323   :  { %7202 = vst [vmem:[#allocation12_spill] sm:$0xff] %v5293_v18  ;;  %7204 = vst [vmem:[#allocation13_spill] sm:$0xff] %v5297_v33  ;;  %v5309_v47 = vmul.f32 %v5213_v39, %v7209_v62  ;;  %v5313_v57 = vmul.f32 %v5213_v39, %v7211_v55  ;;  %v7213_v18 = vld [vmem:[#allocation26_spill] sm:$0xff]  ;;  %v7215_v33 = vld [vmem:[#allocation27_spill] sm:$0xff] }
 0x324   :  { %7206 = vst [vmem:[#allocation14_spill] sm:$0xff] %v5301_v49  ;;  %7208 = vst [vmem:[#allocation15_spill] sm:$0xff] %v5305_v59  ;;  %v5317_v38 = vmul.f32 %v5213_v39, %v7213_v18  ;;  %v5321_v63 = vmul.f32 %v5213_v39, %v7215_v33  ;;  %v7217_v49 = vld [vmem:[#allocation28_spill] sm:$0xff]  ;;  %v7219_v59 = vld [vmem:[#allocation29_spill] sm:$0xff] }
 0x325   :  { %7210 = vst [vmem:[#allocation16_spill] sm:$0xff] %v5309_v47  ;;  %7212 = vst [vmem:[#allocation17_spill] sm:$0xff] %v5313_v57  ;;  %v5325_v41 = vmul.f32 %v5213_v39, %v7217_v49  ;;  %v5329_v62 = vmul.f32 %v5213_v39, %v7219_v59  ;;  %v7221_v47 = vld [vmem:[#allocation30_spill] sm:$0xff]  ;;  %v7223_v57 = vld [vmem:[#allocation31_spill] sm:$0xff] }
 0x326   :  { %7214 = vst [vmem:[#allocation18_spill] sm:$0xff] %v5317_v38  ;;  %7216 = vst [vmem:[#allocation19_spill] sm:$0xff] %v5321_v63  ;;  %v5333_v55 = vmul.f32 %v5213_v39, %v7221_v47  ;;  %v5337_v18 = vmul.f32 %v5213_v39, %v7223_v57  ;;  %v7225_v38 = vld [vmem:[#allocation32_spill] sm:$0xff]  ;;  %v7227_v63 = vld [vmem:[#allocation33_spill] sm:$0xff] }
 0x327   :  { %7218 = vst [vmem:[#allocation20_spill] sm:$0xff] %v5325_v41  ;;  %7220 = vst [vmem:[#allocation21_spill] sm:$0xff] %v5329_v62  ;;  %v5341_v33 = vmul.f32 %v5213_v39, %v7225_v38  ;;  %v5345_v49 = vmul.f32 %v5213_v39, %v7227_v63  ;;  %v7229_v41 = vld [vmem:[#allocation34_spill] sm:$0xff]  ;;  %v7231_v62 = vld [vmem:[#allocation35_spill] sm:$0xff] }
 0x328   :  { %7222 = vst [vmem:[#allocation22_spill] sm:$0xff] %v5333_v55  ;;  %7224 = vst [vmem:[#allocation23_spill] sm:$0xff] %v5337_v18  ;;  %v5349_v59 = vmul.f32 %v5213_v39, %v7229_v41  ;;  %v5353_v47 = vmul.f32 %v5213_v39, %v7231_v62  ;;  %v7233_v55 = vld [vmem:[#allocation36_spill] sm:$0xff]  ;;  %v7235_v18 = vld [vmem:[#allocation37_spill] sm:$0xff] }
 0x329   :  { %7226 = vst [vmem:[#allocation24_spill] sm:$0xff] %v5341_v33  ;;  %7228 = vst [vmem:[#allocation25_spill] sm:$0xff] %v5345_v49  ;;  %v5357_v57 = vmul.f32 %v5213_v39, %v7233_v55  ;;  %v5361_v38 = vmul.f32 %v5213_v39, %v7235_v18  ;;  %v7236_v33 = vld [vmem:[#allocation38_spill] sm:$0xff]  ;;  %v7238_v49 = vld [vmem:[#allocation39_spill] sm:$0xff] }
 0x32a   :  { %7230 = vst [vmem:[#allocation26_spill] sm:$0xff] %v5349_v59  ;;  %7232 = vst [vmem:[#allocation27_spill] sm:$0xff] %v5353_v47  ;;  %v5365_v63 = vmul.f32 %v5213_v39, %v7236_v33  ;;  %v5369_v41 = vmul.f32 %v5213_v39, %v7238_v49  ;;  %v7239_v59 = vld [vmem:[#allocation40_spill] sm:$0xff]  ;;  %v7240_v47 = vld [vmem:[#allocation41_spill] sm:$0xff]  ;;  %v5385_v33 = vmul.f32 %v5213_v39, %v4798_v17 }
 0x32b   :  { %7234 = vst [vmem:[#allocation28_spill] sm:$0xff] %v5357_v57  ;;  %v5373_v62 = vmul.f32 %v5213_v39, %v7239_v59  ;;  %v5377_v55 = vmul.f32 %v5213_v39, %v7240_v47  ;;  %v7241_v57 = vld [vmem:[#allocation42_spill] sm:$0xff]  ;;  %v5393_v59 = vmul.f32 %v5213_v39, %v4812_v37  ;;  %v5397_v47 = vmul.f32 %v5213_v39, %v4819_v61 }
 0x32c   :  { %7237 = vst [vmem:[#allocation29_spill] sm:$0xff] %v5365_v63  ;;  %v5381_v18 = vmul.f32 %v5213_v39, %v7241_v57  ;;  %v7242_v63 = vld [vmem:[#allocation43_spill] sm:$0xff]  ;;  %v5401_v57 = vmul.f32 %v5213_v39, %v4826_v45  ;;  %v5405_v17 = vmul.f32 %v5213_v39, %v4833_v21  ;;  %v5413_v37 = vmul.f32 %v5213_v39, %v4847_v25 }
 0x32d   :  { %v5389_v49 = vmul.f32 %v5213_v39, %v7242_v63  ;;  %v5409_v63 = vmul.f32 %v5213_v39, %v4840_v13  ;;  %v5417_v61 = vmul.f32 %v5213_v39, %v4854_v5  ;;  %v5421_v45 = vmul.f32 %v5213_v39, %v4861_v7 }
 0x32e   :  { %v5425_v21 = vmul.f32 %v5213_v39, %v4868_v14  ;;  %v5429_v13 = vmul.f32 %v5213_v39, %v4875_v23  ;;  %v5433_v25 = vmul.f32 %v5213_v39, %v4882_v53  ;;  %v5437_v5 = vmul.f32 %v5213_v39, %v4889_v4 }
 0x32f   :  { %v5441_v7 = vmul.f32 %v5213_v39, %v4896_v58  ;;  %v5445_v14 = vmul.f32 %v5213_v39, %v4903_v29  ;;  %v5449_v23 = vmul.f32 %v5213_v39, %v4910_v2  ;;  %v5453_v53 = vmul.f32 %v5213_v39, %v4917_v46 }
 0x330   :  { %v5457_v4 = vmul.f32 %v5213_v39, %v4924_v50  ;;  %v5461_v58 = vmul.f32 %v5213_v39, %v4931_v30  ;;  %v5465_v29 = vmul.f32 %v5213_v39, %v4938_v26  ;;  %v5469_v2 = vmul.f32 %v5213_v39, %v4945_v1 }
 0x331   :  { %v5473_v46 = vmul.f32 %v5213_v39, %v4952_v34  ;;  %v5477_v50 = vmul.f32 %v5213_v39, %v4959_v54  ;;  %v5481_v30 = vmul.f32 %v5213_v39, %v4966_v8  ;;  %v5485_v26 = vmul.f32 %v5213_v39, %v4973_v12 }
 0x332   :  { %v5489_v1 = vmul.f32 %v5213_v39, %v4980_v16  ;;  %v5493_v34 = vmul.f32 %v5213_v39, %v4987_v20  ;;  %v5497_v54 = vmul.f32 %v5213_v39, %v4994_v24  ;;  %v5501_v8 = vmul.f32 %v5213_v39, %v5001_v28 }
 0x333   :  { %v5505_v12 = vmul.f32 %v5213_v39, %v5008_v32  ;;  %v5509_v16 = vmul.f32 %v5213_v39, %v5015_v36  ;;  %v5513_v20 = vmul.f32 %v5213_v39, %v5022_v40  ;;  %v5517_v24 = vmul.f32 %v5213_v39, %v5029_v44 }
 0x334   :  { %v5521_v28 = vmul.f32 %v5213_v39, %v5036_v48  ;;  %v5525_v32 = vmul.f32 %v5213_v39, %v5043_v52  ;;  %v5529_v36 = vmul.f32 %v5213_v39, %v5050_v56  ;;  %v5533_v40 = vmul.f32 %v5213_v39, %v5057_v60 }
 0x335   :  { %v5537_v44 = vmul.f32 %v5213_v39, %v5064_v3  ;;  %v5541_v48 = vmul.f32 %v5213_v39, %v5071_v11  ;;  %v5545_v52 = vmul.f32 %v5213_v39, %v5078_v19  ;;  %v5549_v56 = vmul.f32 %v5213_v39, %v5085_v27 }
 0x336   :  { %7243 = vst [vmem:[#allocation30_spill] sm:$0xff] %v5533_v40  ;;  %v5553_v60 = vmul.f32 %v5213_v39, %v5092_v35  ;;  %v5557_v3 = vmul.f32 %v5213_v39, %v5099_v43  ;;  %v7269_v40 = vld [vmem:[#allocation50_spill] sm:$0xff] }
 0x337   :  { %7244 = vst [vmem:[#allocation31_spill] sm:$0xff] %v5537_v44  ;;  %7245 = vst [vmem:[#allocation32_spill] sm:$0xff] %v5541_v48  ;;  %v7250_v44 = vld [vmem:[#allocation44_spill] sm:$0xff]  ;;  %v7252_v48 = vld [vmem:[#allocation45_spill] sm:$0xff] }
 0x338   :  { %7246 = vst [vmem:[#allocation33_spill] sm:$0xff] %v5545_v52  ;;  %7247 = vst [vmem:[#allocation34_spill] sm:$0xff] %v5549_v56  ;;  %v5561_v11 = vmul.f32 %v5213_v39, %v7250_v44  ;;  %v5565_v19 = vmul.f32 %v5213_v39, %v7252_v48  ;;  %v7254_v52 = vld [vmem:[#allocation46_spill] sm:$0xff]  ;;  %v7256_v56 = vld [vmem:[#allocation47_spill] sm:$0xff] }
 0x339   :  { %7248 = vst [vmem:[#allocation35_spill] sm:$0xff] %v5553_v60  ;;  %7249 = vst [vmem:[#allocation36_spill] sm:$0xff] %v5557_v3  ;;  %v5569_v27 = vmul.f32 %v5213_v39, %v7254_v52  ;;  %v5573_v35 = vmul.f32 %v5213_v39, %v7256_v56  ;;  %v7258_v60 = vld [vmem:[#allocation49_spill] sm:$0xff]  ;;  %v7260_v3 = vld [vmem:[#allocation56_spill] sm:$0xff] }
 0x33a   :  { %7251 = vst [vmem:[#allocation37_spill] sm:$0xff] %v5561_v11  ;;  %7253 = vst [vmem:[#allocation38_spill] sm:$0xff] %v5565_v19  ;;  %v5577_v43 = vmul.f32 %v5213_v39, %v7258_v60  ;;  %v5581_v44 = vmul.f32 %v5213_v39, %v7260_v3  ;;  %v5586_v48 = vld [vmem:[%s6824_s4] ss:$0 sm:$0xff]  ;;  %v7262_v19 = vld [vmem:[#allocation57_spill] sm:$0xff] }
 0x33b   :  { %7255 = vst [vmem:[#allocation39_spill] sm:$0xff] %v5569_v27  ;;  %7257 = vst [vmem:[#allocation40_spill] sm:$0xff] %v5573_v35  ;;  %v5590_v52 = vmul.f32 %v5213_v39, %v7262_v19  ;;  %v7264_v27 = vld [vmem:[#allocation51_spill] sm:$0xff]  ;;  %v7266_v35 = vld [vmem:[#allocation52_spill] sm:$0xff]  ;;  %v5610_v19 = vmul.f32 %v5213_v39, %v7269_v40  ;;  %v5630_v40 = vadd.f32 %v5586_v48, %v5225_v15 }
 0x33c   :  { %7259 = vst [vmem:[#allocation41_spill] sm:$0xff] %v5577_v43  ;;  %7261 = vst [vmem:[#allocation42_spill] sm:$0xff] %v5581_v44  ;;  %v5594_v56 = vmul.f32 %v5213_v39, %v7264_v27  ;;  %v5598_v60 = vmul.f32 %v5213_v39, %v7266_v35  ;;  %v7267_v43 = vld [vmem:[#allocation53_spill] sm:$0xff]  ;;  %v7268_v44 = vld [vmem:[#allocation48_spill] sm:$0xff]  ;;  %v5650_v15 = vadd.f32 %v5586_v48, %v5245_v31 }
 0x33d   :  { %7263 = vst [vmem:[#allocation43_spill] sm:$0xff] %v5590_v52  ;;  %v5602_v3 = vmul.f32 %v5213_v39, %v7267_v43  ;;  %v5606_v11 = vmul.f32 %v5213_v39, %v7268_v44  ;;  %v7270_v52 = vld [vmem:[#allocation54_spill] sm:$0xff]  ;;  %v5622_v43 = vadd.f32 %v5586_v48, %v5217_v6  ;;  %v5626_v44 = vadd.f32 %v5586_v48, %v5221_v51 }
 0x33e   :  { %7265 = vst [vmem:[#allocation44_spill] sm:$0xff] %v5594_v56  ;;  %v5614_v27 = vmul.f32 %v5213_v39, %v7270_v52  ;;  %v7271_v56 = vld [vmem:[#allocation55_spill] sm:$0xff]  ;;  %7274 = vst [vmem:[#allocation47_spill] sm:$0xff] %v5630_v40  ;;  %v5634_v52 = vadd.f32 %v5586_v48, %v5229_v42  ;;  %v5642_v6 = vadd.f32 %v5586_v48, %v5237_v9 }
 0x33f   :  { %v5618_v35 = vmul.f32 %v5213_v39, %v7271_v56  ;;  %7272 = vst [vmem:[#allocation45_spill] sm:$0xff] %v5622_v43  ;;  %7273 = vst [vmem:[#allocation46_spill] sm:$0xff] %v5626_v44  ;;  %v5638_v39 = vadd.f32 %v5586_v48, %v5233_v0  ;;  %v5646_v51 = vadd.f32 %v5586_v48, %v5241_v10  ;;  %v7281_v56 = vld [vmem:[#allocation3_spill] sm:$0xff] }
 0x340   :  { %7275 = vst [vmem:[#allocation49_spill] sm:$0xff] %v5634_v52  ;;  %7277 = vst [vmem:[#allocation57_spill] sm:$0xff] %v5642_v6  ;;  %v5654_v42 = vadd.f32 %v5586_v48, %v5249_v22  ;;  %v5658_v0 = vadd.f32 %v5586_v48, %v7281_v56  ;;  %v7285_v6 = vld [vmem:[#allocation4_spill] sm:$0xff] }
 0x341   :  { %7276 = vst [vmem:[#allocation56_spill] sm:$0xff] %v5638_v39  ;;  %7278 = vst [vmem:[#allocation51_spill] sm:$0xff] %v5646_v51  ;;  %v7283_v39 = vld [vmem:[#allocation2_spill] sm:$0xff]  ;;  %v5666_v10 = vadd.f32 %v5586_v48, %v7285_v6  ;;  %v7287_v51 = vld [vmem:[#allocation5_spill] sm:$0xff] }
 0x342   :  { %7279 = vst [vmem:[#allocation52_spill] sm:$0xff] %v5650_v15  ;;  %7280 = vst [vmem:[#allocation53_spill] sm:$0xff] %v5654_v42  ;;  %v5662_v9 = vadd.f32 %v5586_v48, %v7283_v39  ;;  %v5670_v31 = vadd.f32 %v5586_v48, %v7287_v51  ;;  %v7289_v15 = vld [vmem:[#allocation6_spill] sm:$0xff]  ;;  %v7291_v42 = vld [vmem:[#allocation7_spill] sm:$0xff] }
 0x343   :  { %7282 = vst [vmem:[#allocation48_spill] sm:$0xff] %v5658_v0  ;;  %7286 = vst [vmem:[#allocation54_spill] sm:$0xff] %v5666_v10  ;;  %v5674_v22 = vadd.f32 %v5586_v48, %v7289_v15  ;;  %v5678_v56 = vadd.f32 %v5586_v48, %v7291_v42  ;;  %v7293_v0 = vld [vmem:[#allocation8_spill] sm:$0xff]  ;;  %v7297_v10 = vld [vmem:[#allocation10_spill] sm:$0xff] }
 0x344   :  { %7284 = vst [vmem:[#allocation50_spill] sm:$0xff] %v5662_v9  ;;  %7288 = vst [vmem:[#allocation55_spill] sm:$0xff] %v5670_v31  ;;  %v5682_v39 = vadd.f32 %v5586_v48, %v7293_v0  ;;  %v7295_v9 = vld [vmem:[#allocation9_spill] sm:$0xff]  ;;  %v5690_v51 = vadd.f32 %v5586_v48, %v7297_v10  ;;  %v7299_v31 = vld [vmem:[#allocation11_spill] sm:$0xff] }
 0x345   :  { %7290 = vst [vmem:[#allocation3_spill] sm:$0xff] %v5674_v22  ;;  %7292 = vst [vmem:[#allocation2_spill] sm:$0xff] %v5678_v56  ;;  %v5686_v6 = vadd.f32 %v5586_v48, %v7295_v9  ;;  %v5694_v15 = vadd.f32 %v5586_v48, %v7299_v31  ;;  %v7301_v22 = vld [vmem:[#allocation12_spill] sm:$0xff]  ;;  %v7303_v56 = vld [vmem:[#allocation13_spill] sm:$0xff] }
 0x346   :  { %7294 = vst [vmem:[#allocation4_spill] sm:$0xff] %v5682_v39  ;;  %7298 = vst [vmem:[#allocation6_spill] sm:$0xff] %v5690_v51  ;;  %v5698_v42 = vadd.f32 %v5586_v48, %v7301_v22  ;;  %v5702_v0 = vadd.f32 %v5586_v48, %v7303_v56  ;;  %v7305_v39 = vld [vmem:[#allocation14_spill] sm:$0xff]  ;;  %v7309_v51 = vld [vmem:[#allocation16_spill] sm:$0xff] }
 0x347   :  { %7296 = vst [vmem:[#allocation5_spill] sm:$0xff] %v5686_v6  ;;  %7300 = vst [vmem:[#allocation7_spill] sm:$0xff] %v5694_v15  ;;  %v5706_v9 = vadd.f32 %v5586_v48, %v7305_v39  ;;  %v7307_v6 = vld [vmem:[#allocation15_spill] sm:$0xff]  ;;  %v5714_v31 = vadd.f32 %v5586_v48, %v7309_v51  ;;  %v7311_v15 = vld [vmem:[#allocation17_spill] sm:$0xff] }
 0x348   :  { %7302 = vst [vmem:[#allocation8_spill] sm:$0xff] %v5698_v42  ;;  %7304 = vst [vmem:[#allocation9_spill] sm:$0xff] %v5702_v0  ;;  %v5710_v10 = vadd.f32 %v5586_v48, %v7307_v6  ;;  %v5718_v22 = vadd.f32 %v5586_v48, %v7311_v15  ;;  %v7313_v42 = vld [vmem:[#allocation18_spill] sm:$0xff]  ;;  %v7315_v0 = vld [vmem:[#allocation19_spill] sm:$0xff] }
 0x349   :  { %7306 = vst [vmem:[#allocation10_spill] sm:$0xff] %v5706_v9  ;;  %7310 = vst [vmem:[#allocation12_spill] sm:$0xff] %v5714_v31  ;;  %v5722_v56 = vadd.f32 %v5586_v48, %v7313_v42  ;;  %v5726_v39 = vadd.f32 %v5586_v48, %v7315_v0  ;;  %v7317_v9 = vld [vmem:[#allocation20_spill] sm:$0xff]  ;;  %v7321_v31 = vld [vmem:[#allocation22_spill] sm:$0xff] }
 0x34a   :  { %7308 = vst [vmem:[#allocation11_spill] sm:$0xff] %v5710_v10  ;;  %7312 = vst [vmem:[#allocation13_spill] sm:$0xff] %v5718_v22  ;;  %v5730_v6 = vadd.f32 %v5586_v48, %v7317_v9  ;;  %v7319_v10 = vld [vmem:[#allocation21_spill] sm:$0xff]  ;;  %v5738_v15 = vadd.f32 %v5586_v48, %v7321_v31  ;;  %v7323_v22 = vld [vmem:[#allocation23_spill] sm:$0xff] }
 0x34b   :  { %7314 = vst [vmem:[#allocation14_spill] sm:$0xff] %v5722_v56  ;;  %7316 = vst [vmem:[#allocation15_spill] sm:$0xff] %v5726_v39  ;;  %v5734_v51 = vadd.f32 %v5586_v48, %v7319_v10  ;;  %v5742_v42 = vadd.f32 %v5586_v48, %v7323_v22  ;;  %v7324_v56 = vld [vmem:[#allocation24_spill] sm:$0xff]  ;;  %v7326_v39 = vld [vmem:[#allocation25_spill] sm:$0xff] }
 0x34c   :  { %7318 = vst [vmem:[#allocation16_spill] sm:$0xff] %v5730_v6  ;;  %7322 = vst [vmem:[#allocation18_spill] sm:$0xff] %v5738_v15  ;;  %v5746_v0 = vadd.f32 %v5586_v48, %v7324_v56  ;;  %v5750_v9 = vadd.f32 %v5586_v48, %v7326_v39  ;;  %v7327_v6 = vld [vmem:[#allocation26_spill] sm:$0xff]  ;;  %v7329_v15 = vld [vmem:[#allocation28_spill] sm:$0xff]  ;;  %v5766_v56 = vadd.f32 %v5586_v48, %v5361_v38 }
 0x34d   :  { %7320 = vst [vmem:[#allocation17_spill] sm:$0xff] %v5734_v51  ;;  %v5754_v10 = vadd.f32 %v5586_v48, %v7327_v6  ;;  %v7328_v51 = vld [vmem:[#allocation27_spill] sm:$0xff]  ;;  %v5762_v22 = vadd.f32 %v5586_v48, %v7329_v15  ;;  %v5774_v6 = vadd.f32 %v5586_v48, %v5369_v41  ;;  %v5782_v15 = vadd.f32 %v5586_v48, %v5377_v55 }
 0x34e   :  { %7325 = vst [vmem:[#allocation19_spill] sm:$0xff] %v5746_v0  ;;  %v5758_v31 = vadd.f32 %v5586_v48, %v7328_v51  ;;  %v7330_v0 = vld [vmem:[#allocation29_spill] sm:$0xff]  ;;  %v5778_v51 = vadd.f32 %v5586_v48, %v5373_v62  ;;  %v5786_v38 = vadd.f32 %v5586_v48, %v5381_v18  ;;  %v5794_v41 = vadd.f32 %v5586_v48, %v5389_v49 }
 0x34f   :  { %v5770_v39 = vadd.f32 %v5586_v48, %v7330_v0  ;;  %v5790_v0 = vadd.f32 %v5586_v48, %v5385_v33  ;;  %v5798_v62 = vadd.f32 %v5586_v48, %v5393_v59  ;;  %v5802_v55 = vadd.f32 %v5586_v48, %v5397_v47 }
 0x350   :  { %v5806_v18 = vadd.f32 %v5586_v48, %v5401_v57  ;;  %v5810_v33 = vadd.f32 %v5586_v48, %v5405_v17  ;;  %v5814_v49 = vadd.f32 %v5586_v48, %v5409_v63  ;;  %v5818_v59 = vadd.f32 %v5586_v48, %v5413_v37  ;;  %v7403_v44 = vld [vmem:[#allocation12_spill] sm:$0xff] }
 0x351   :  { %v5822_v47 = vadd.f32 %v5586_v48, %v5417_v61  ;;  %v5826_v57 = vadd.f32 %v5586_v48, %v5421_v45  ;;  %v5830_v17 = vadd.f32 %v5586_v48, %v5425_v21  ;;  %v5834_v63 = vadd.f32 %v5586_v48, %v5429_v13  ;;  %v7402_v43 = vld [vmem:[#allocation11_spill] sm:$0xff]  ;;  %v7404_v40 = vld [vmem:[#allocation13_spill] sm:$0xff] }
 0x352   :  { %v5838_v37 = vadd.f32 %v5586_v48, %v5433_v25  ;;  %v5842_v61 = vadd.f32 %v5586_v48, %v5437_v5  ;;  %v5846_v45 = vadd.f32 %v5586_v48, %v5441_v7  ;;  %v5850_v21 = vadd.f32 %v5586_v48, %v5445_v14  ;;  %v7405_v52 = vld [vmem:[#allocation14_spill] sm:$0xff] }
 0x353   :  { %v5854_v13 = vadd.f32 %v5586_v48, %v5449_v23  ;;  %v5858_v25 = vadd.f32 %v5586_v48, %v5453_v53  ;;  %v5862_v5 = vadd.f32 %v5586_v48, %v5457_v4  ;;  %v5866_v7 = vadd.f32 %v5586_v48, %v5461_v58 }
 0x354   :  { %v5870_v14 = vadd.f32 %v5586_v48, %v5465_v29  ;;  %v5874_v23 = vadd.f32 %v5586_v48, %v5469_v2  ;;  %v5878_v53 = vadd.f32 %v5586_v48, %v5473_v46  ;;  %v5882_v4 = vadd.f32 %v5586_v48, %v5477_v50 }
 0x355   :  { %v5886_v58 = vadd.f32 %v5586_v48, %v5481_v30  ;;  %v5890_v29 = vadd.f32 %v5586_v48, %v5485_v26  ;;  %v5894_v2 = vadd.f32 %v5586_v48, %v5489_v1  ;;  %v5898_v46 = vadd.f32 %v5586_v48, %v5493_v34 }
 0x356   :  { %7331 = vst [vmem:[#allocation20_spill] sm:$0xff] %v5870_v14  ;;  %7332 = vst [vmem:[#allocation21_spill] sm:$0xff] %v5874_v23  ;;  %v5902_v50 = vadd.f32 %v5586_v48, %v5497_v54  ;;  %v5906_v30 = vadd.f32 %v5586_v48, %v5501_v8  ;;  %v5910_v26 = vadd.f32 %v5586_v48, %v5505_v12  ;;  %v7437_v14 = vld [vmem:[#allocation45_spill] sm:$0xff] }
 0x357   :  { %7333 = vst [vmem:[#allocation22_spill] sm:$0xff] %v5878_v53  ;;  %7334 = vst [vmem:[#allocation23_spill] sm:$0xff] %v5882_v4  ;;  %v5914_v1 = vadd.f32 %v5586_v48, %v5509_v16  ;;  %v5918_v34 = vadd.f32 %v5586_v48, %v5513_v20  ;;  %v5922_v54 = vadd.f32 %v5586_v48, %v5517_v24 }
 0x358   :  { %7335 = vst [vmem:[#allocation24_spill] sm:$0xff] %v5886_v58  ;;  %7336 = vst [vmem:[#allocation25_spill] sm:$0xff] %v5890_v29  ;;  %v5926_v8 = vadd.f32 %v5586_v48, %v5521_v28  ;;  %v5930_v12 = vadd.f32 %v5586_v48, %v5525_v32  ;;  %v5934_v16 = vadd.f32 %v5586_v48, %v5529_v36 }
 0x359   :  { %7337 = vst [vmem:[#allocation26_spill] sm:$0xff] %v5894_v2  ;;  %7338 = vst [vmem:[#allocation27_spill] sm:$0xff] %v5898_v46  ;;  %v7439_v46 = vld [vmem:[#allocation46_spill] sm:$0xff] }
 0x35a   :  { %7339 = vst [vmem:[#allocation28_spill] sm:$0xff] %v5902_v50  ;;  %7340 = vst [vmem:[#allocation29_spill] sm:$0xff] %v5906_v30  ;;  %v7441_v30 = vld [vmem:[#allocation47_spill] sm:$0xff]  ;;  %v7455_v50 = vld [vmem:[#allocation48_spill] sm:$0xff] }
 0x35b   :  { %7341 = vst [vmem:[#allocation58_spill] sm:$0xff] %v5910_v26  ;;  %7342 = vst [vmem:[#allocation59_spill] sm:$0xff] %v5914_v1  ;;  %v7348_v1 = vld [vmem:[#allocation30_spill] sm:$0xff]  ;;  %v7442_v53 = vmax.f32 %v7441_v30, 0.0  ;;  %v7453_v26 = vld [vmem:[#allocation53_spill] sm:$0xff] }
 0x35c   :  { %7343 = vst [vmem:[#allocation60_spill] sm:$0xff] %v5918_v34  ;;  %7344 = vst [vmem:[#allocation61_spill] sm:$0xff] %v5922_v54  ;;  %v5938_v20 = vadd.f32 %v5586_v48, %v7348_v1  ;;  %v7350_v34 = vld [vmem:[#allocation31_spill] sm:$0xff]  ;;  %v7352_v54 = vld [vmem:[#allocation32_spill] sm:$0xff] }
 0x35d   :  { %7345 = vst [vmem:[#allocation62_spill] sm:$0xff] %v5926_v8  ;;  %7346 = vst [vmem:[#allocation63_spill] sm:$0xff] %v5930_v12  ;;  %v5942_v24 = vadd.f32 %v5586_v48, %v7350_v34  ;;  %v5946_v28 = vadd.f32 %v5586_v48, %v7352_v54  ;;  %v7354_v8 = vld [vmem:[#allocation33_spill] sm:$0xff]  ;;  %v7356_v12 = vld [vmem:[#allocation34_spill] sm:$0xff]  ;;  %v3059_v4 = vpack.c.bf16 %v7442_v53, %v7442_v53 }
 0x35e   :  { %7347 = vst [vmem:[#allocation64_spill] sm:$0xff] %v5934_v16  ;;  %7349 = vst [vmem:[#allocation30_spill] sm:$0xff] %v5938_v20  ;;  %v5950_v32 = vadd.f32 %v5586_v48, %v7354_v8  ;;  %v5954_v36 = vadd.f32 %v5586_v48, %v7356_v12  ;;  %v7358_v16 = vld [vmem:[#allocation35_spill] sm:$0xff]  ;;  %v7360_v20 = vld [vmem:[#allocation36_spill] sm:$0xff] }
 0x35f   :  { %7351 = vst [vmem:[#allocation31_spill] sm:$0xff] %v5942_v24  ;;  %7353 = vst [vmem:[#allocation32_spill] sm:$0xff] %v5946_v28  ;;  %v5958_v1 = vadd.f32 %v5586_v48, %v7358_v16  ;;  %v5962_v34 = vadd.f32 %v5586_v48, %v7360_v20  ;;  %v7362_v24 = vld [vmem:[#allocation37_spill] sm:$0xff]  ;;  %v7364_v28 = vld [vmem:[#allocation38_spill] sm:$0xff] }
 0x360   :  { %7355 = vst [vmem:[#allocation33_spill] sm:$0xff] %v5950_v32  ;;  %7357 = vst [vmem:[#allocation34_spill] sm:$0xff] %v5954_v36  ;;  %v5966_v54 = vadd.f32 %v5586_v48, %v7362_v24  ;;  %v5970_v8 = vadd.f32 %v5586_v48, %v7364_v28  ;;  %v7366_v32 = vld [vmem:[#allocation39_spill] sm:$0xff]  ;;  %v7368_v36 = vld [vmem:[#allocation40_spill] sm:$0xff] }
 0x361   :  { %7359 = vst [vmem:[#allocation35_spill] sm:$0xff] %v5958_v1  ;;  %7361 = vst [vmem:[#allocation36_spill] sm:$0xff] %v5962_v34  ;;  %v5974_v12 = vadd.f32 %v5586_v48, %v7366_v32  ;;  %v5978_v16 = vadd.f32 %v5586_v48, %v7368_v36  ;;  %v7370_v1 = vld [vmem:[#allocation41_spill] sm:$0xff]  ;;  %v7372_v34 = vld [vmem:[#allocation42_spill] sm:$0xff]  ;;  %v5998_v36 = vadd.f32 %v5586_v48, %v5598_v60 }
 0x362   :  { %7363 = vst [vmem:[#allocation37_spill] sm:$0xff] %v5966_v54  ;;  %7365 = vst [vmem:[#allocation38_spill] sm:$0xff] %v5970_v8  ;;  %v5982_v20 = vadd.f32 %v5586_v48, %v7370_v1  ;;  %v5986_v24 = vadd.f32 %v5586_v48, %v7372_v34  ;;  %v7374_v54 = vld [vmem:[#allocation43_spill] sm:$0xff]  ;;  %v7376_v8 = vld [vmem:[#allocation44_spill] sm:$0xff]  ;;  %v6002_v1 = vadd.f32 %v5586_v48, %v5602_v3 }
 0x363   :  { %7367 = vst [vmem:[#allocation39_spill] sm:$0xff] %v5974_v12  ;;  %7369 = vst [vmem:[#allocation40_spill] sm:$0xff] %v5978_v16  ;;  %v5990_v28 = vadd.f32 %v5586_v48, %v7374_v54  ;;  %v5994_v32 = vadd.f32 %v5586_v48, %v7376_v8  ;;  %v6006_v34 = vadd.f32 %v5586_v48, %v5606_v11  ;;  %v7443_v11 = vld [vmem:[#allocation49_spill] sm:$0xff]  ;;  %v7457_v2 = vld [vmem:[#allocation50_spill] sm:$0xff] }
 0x364   :  { %7371 = vst [vmem:[#allocation41_spill] sm:$0xff] %v5982_v20  ;;  %7373 = vst [vmem:[#allocation42_spill] sm:$0xff] %v5986_v24  ;;  %v6010_v54 = vadd.f32 %v5586_v48, %v5610_v19  ;;  %v6014_v8 = vadd.f32 %v5586_v48, %v5614_v27  ;;  %v6018_v60 = vadd.f32 %v5586_v48, %v5618_v35  ;;  %v7399_v20 = vld [vmem:[#allocation8_spill] sm:$0xff]  ;;  %v7409_v27 = vld [vmem:[#allocation18_spill] sm:$0xff]  ;;  %v7444_v58 = vmax.f32 %v7443_v11, 0.0 }
 0x365   :  { %7375 = vst [vmem:[#allocation43_spill] sm:$0xff] %v5990_v28  ;;  %7377 = vst [vmem:[#allocation44_spill] sm:$0xff] %v5994_v32  ;;  %v7407_v19 = vld [vmem:[#allocation16_spill] sm:$0xff]  ;;  %v7408_v28 = vld [vmem:[#allocation17_spill] sm:$0xff]  ;;  %v7454_v11 = vmax.f32 %v7453_v26, 0.0 }
 0x366   :  { %7378 = vst [vmem:[#allocation65_spill] sm:$0xff] %v5998_v36  ;;  %7379 = vst [vmem:[#allocation66_spill] sm:$0xff] %v6002_v1  ;;  %v7410_v48 = vld [vmem:[#allocation19_spill] sm:$0xff]  ;;  %v7438_v36 = vmax.f32 %v7437_v14, 0.0  ;;  %v7440_v1 = vmax.f32 %v7439_v46, 0.0  ;;  %v3060_v29 = vpack.c.bf16 %v7444_v58, %v7444_v58  ;;  %v7447_v12 = vld [vmem:[#allocation57_spill] sm:$0xff] }
 0x367   :  { %7380 = vst [vmem:[#allocation67_spill] sm:$0xff] %v6006_v34  ;;  %7381 = vst [vmem:[#allocation68_spill] sm:$0xff] %v6010_v54  ;;  %v7406_v34 = vld [vmem:[#allocation15_spill] sm:$0xff]  ;;  %v7445_v54 = vld [vmem:[#allocation56_spill] sm:$0xff]  ;;  %v7448_v14 = vmax.f32 %v7447_v12, 0.0  ;;  %v3065_v58 = vpack.c.bf16 %v7454_v11, %v7454_v11  ;;  %v7458_v12 = vmax.f32 %v7457_v2, 0.0 }
 0x368   :  { %7382 = vst [vmem:[#allocation69_spill] sm:$0xff] %v6014_v8  ;;  %7383 = vst [vmem:[#allocation70_spill] sm:$0xff] %v6018_v60  ;;  %v7401_v60 = vld [vmem:[#allocation10_spill] sm:$0xff]  ;;  %v3057_v3 = vpack.c.bf16 %v7438_v36, %v7438_v36  ;;  %v3058_v23 = vpack.c.bf16 %v7440_v1, %v7440_v1  ;;  %v7446_v16 = vmax.f32 %v7445_v54, 0.0  ;;  %v7449_v24 = vld [vmem:[#allocation51_spill] sm:$0xff]  ;;  %v7456_v54 = vmax.f32 %v7455_v50, 0.0 }
 0x369   :  { %v3062_v36 = vpack.c.bf16 %v7448_v14, %v7448_v14  ;;  %v7450_v46 = vmax.f32 %v7449_v24, 0.0  ;;  %v7451_v32 = vld [vmem:[#allocation52_spill] sm:$0xff]  ;;  %v3067_v14 = vpack.c.bf16 %v7458_v12, %v7458_v12  ;;  %v7459_v8 = vld [vmem:[#allocation54_spill] sm:$0xff]  ;;  %2691 = vst.msk [vmem:[%s6825_s5 + $0x8] sm:$0xf] %vm2688_vm3, %v3059_v4  ;;  %v7461_v2 = vld [vmem:[#allocation55_spill] sm:$0xff] }
 0x36a   :  { %v3061_v35 = vpack.c.bf16 %v7446_v16, %v7446_v16  ;;  %v7452_v30 = vmax.f32 %v7451_v32, 0.0  ;;  %v3066_v16 = vpack.c.bf16 %v7456_v54, %v7456_v54  ;;  %v7460_v24 = vmax.f32 %v7459_v8, 0.0  ;;  %2689 = vst.msk [vmem:[%s6825_s5] sm:$0xf] %vm2688_vm3, %v3057_v3  ;;  %2690 = vst.msk [vmem:[%s6825_s5 + $0x4] sm:$0xf] %vm2688_vm3, %v3058_v23 }
 0x36b   :  { %v3063_v1 = vpack.c.bf16 %v7450_v46, %v7450_v46  ;;  %2692 = vst.msk [vmem:[%s6825_s5 + $0xc] sm:$0xf] %vm2688_vm3, %v3060_v29  ;;  %v7462_v50 = vmax.f32 %v7461_v2, 0.0  ;;  %v7463_v32 = vld [vmem:[#allocation3_spill] sm:$0xff]  ;;  %v7467_v54 = vld [vmem:[#allocation4_spill] sm:$0xff]  ;;  %v7469_v29 = vld [vmem:[#allocation5_spill] sm:$0xff] }
 0x36c   :  { %v3064_v53 = vpack.c.bf16 %v7452_v30, %v7452_v30  ;;  %v3068_v46 = vpack.c.bf16 %v7460_v24, %v7460_v24  ;;  %v7464_v8 = vmax.f32 %v7463_v32, 0.0  ;;  %v7465_v30 = vld [vmem:[#allocation2_spill] sm:$0xff]  ;;  %v7468_v12 = vmax.f32 %v7467_v54, 0.0  ;;  %2693 = vst.msk [vmem:[%s6825_s5 + $0x10] sm:$0xf] %vm2688_vm3, %v3061_v35 }
 0x36d   :  { %v3069_v26 = vpack.c.bf16 %v7462_v50, %v7462_v50  ;;  %v7466_v23 = vmax.f32 %v7465_v30, 0.0  ;;  %2694 = vst.msk [vmem:[%s6825_s5 + $0x14] sm:$0xf] %vm2688_vm3, %v3062_v36  ;;  %2695 = vst.msk [vmem:[%s6825_s5 + $0x18] sm:$0xf] %vm2688_vm3, %v3063_v1  ;;  %v7470_v24 = vmax.f32 %v7469_v29, 0.0 }
 0x36e   :  { %v3070_v3 = vpack.c.bf16 %v7464_v8, %v7464_v8  ;;  %v3072_v4 = vpack.c.bf16 %v7468_v12, %v7468_v12  ;;  %2696 = vst.msk [vmem:[%s6825_s5 + $0x1c] sm:$0xf] %vm2688_vm3, %v3064_v53  ;;  %v7471_v35 = vld [vmem:[#allocation6_spill] sm:$0xff]  ;;  %v7473_v8 = vld [vmem:[#allocation7_spill] sm:$0xff]  ;;  %2697 = vst.msk [vmem:[%s6825_s5 + $0x20] sm:$0xf] %vm2688_vm3, %v3065_v58 }
 0x36f   :  { %v3071_v11 = vpack.c.bf16 %v7466_v23, %v7466_v23  ;;  %v3073_v2 = vpack.c.bf16 %v7470_v24, %v7470_v24  ;;  %v7472_v50 = vmax.f32 %v7471_v35, 0.0  ;;  %v7474_v36 = vmax.f32 %v7473_v8, 0.0  ;;  %2698 = vst.msk [vmem:[%s6825_s5 + $0x24] sm:$0xf] %vm2688_vm3, %v3066_v16  ;;  %2699 = vst.msk [vmem:[%s6825_s5 + $0x28] sm:$0xf] %vm2688_vm3, %v3067_v14 }
 0x370   :  { %v7475_v23 = vmax.f32 %v7399_v20, 0.0  ;;  %2700 = vst.msk [vmem:[%s6825_s5 + $0x2c] sm:$0xf] %vm2688_vm3, %v3068_v46  ;;  %v7476_v20 = vld [vmem:[#allocation9_spill] sm:$0xff]  ;;  %v7478_v58 = vmax.f32 %v7401_v60, 0.0  ;;  %v7479_v16 = vmax.f32 %v7402_v43, 0.0 }
 0x371   :  { %v3074_v32 = vpack.c.bf16 %v7472_v50, %v7472_v50  ;;  %v3075_v30 = vpack.c.bf16 %v7474_v36, %v7474_v36  ;;  %v7477_v53 = vmax.f32 %v7476_v20, 0.0  ;;  %v7480_v24 = vmax.f32 %v7403_v44, 0.0  ;;  %2701 = vst.msk [vmem:[%s6825_s5 + $0x30] sm:$0xf] %vm2688_vm3, %v3069_v26  ;;  %2702 = vst.msk [vmem:[%s6825_s5 + $0x34] sm:$0xf] %vm2688_vm3, %v3070_v3 }
 0x372   :  { %v3076_v1 = vpack.c.bf16 %v7475_v23, %v7475_v23  ;;  %v3078_v12 = vpack.c.bf16 %v7478_v58, %v7478_v58  ;;  %v3079_v29 = vpack.c.bf16 %v7479_v16, %v7479_v16  ;;  %2703 = vst.msk [vmem:[%s6825_s5 + $0x38] sm:$0xf] %vm2688_vm3, %v3071_v11  ;;  %2704 = vst.msk [vmem:[%s6825_s5 + $0x3c] sm:$0xf] %vm2688_vm3, %v3072_v4  ;;  %v7481_v43 = vmax.f32 %v7404_v40, 0.0 }
 0x373   :  { %v3077_v54 = vpack.c.bf16 %v7477_v53, %v7477_v53  ;;  %v3080_v14 = vpack.c.bf16 %v7480_v24, %v7480_v24  ;;  %v7482_v60 = vmax.f32 %v7405_v52, 0.0  ;;  %v7483_v26 = vmax.f32 %v7406_v34, 0.0  ;;  %2705 = vst.msk [vmem:[%s6825_s5 + $0x40] sm:$0xf] %vm2688_vm3, %v3073_v2  ;;  %2706 = vst.msk [vmem:[%s6825_s5 + $0x44] sm:$0xf] %vm2688_vm3, %v3074_v32 }
 0x374   :  { %v3081_v44 = vpack.c.bf16 %v7481_v43, %v7481_v43  ;;  %v7484_v35 = vmax.f32 %v7407_v19, 0.0  ;;  %2707 = vst.msk [vmem:[%s6825_s5 + $0x48] sm:$0xf] %vm2688_vm3, %v3075_v30  ;;  %2708 = vst.msk [vmem:[%s6825_s5 + $0x4c] sm:$0xf] %vm2688_vm3, %v3076_v1  ;;  %v7485_v40 = vmax.f32 %v7408_v28, 0.0 }
 0x375   :  { %v3082_v46 = vpack.c.bf16 %v7482_v60, %v7482_v60  ;;  %v3083_v3 = vpack.c.bf16 %v7483_v26, %v7483_v26  ;;  %v7486_v34 = vmax.f32 %v7409_v27, 0.0  ;;  %v7487_v4 = vmax.f32 %v5742_v42, 0.0  ;;  %2709 = vst.msk [vmem:[%s6825_s5 + $0x50] sm:$0xf] %vm2688_vm3, %v3077_v54  ;;  %2710 = vst.msk [vmem:[%s6825_s5 + $0x54] sm:$0xf] %vm2688_vm3, %v3078_v12 }
 0x376   :  { %v3084_v11 = vpack.c.bf16 %v7484_v35, %v7484_v35  ;;  %v3085_v52 = vpack.c.bf16 %v7485_v40, %v7485_v40  ;;  %v7488_v50 = vmax.f32 %v7410_v48, 0.0  ;;  %2711 = vst.msk [vmem:[%s6825_s5 + $0x58] sm:$0xf] %vm2688_vm3, %v3079_v29  ;;  %2712 = vst.msk [vmem:[%s6825_s5 + $0x5c] sm:$0xf] %vm2688_vm3, %v3080_v14  ;;  %v7489_v42 = vmax.f32 %v5750_v9, 0.0 }
 0x377   :  { %v3086_v19 = vpack.c.bf16 %v7486_v34, %v7486_v34  ;;  %v3087_v2 = vpack.c.bf16 %v7487_v4, %v7487_v4  ;;  %v7490_v27 = vmax.f32 %v5754_v10, 0.0  ;;  %v7491_v8 = vmax.f32 %v5758_v31, 0.0  ;;  %2713 = vst.msk [vmem:[%s6825_s5 + $0x60] sm:$0xf] %vm2688_vm3, %v3081_v44  ;;  %2714 = vst.msk [vmem:[%s6825_s5 + $0x64] sm:$0xf] %vm2688_vm3, %v3082_v46 }
 0x378   :  { %v3088_v32 = vpack.c.bf16 %v7488_v50, %v7488_v50  ;;  %v3089_v28 = vpack.c.bf16 %v7489_v42, %v7489_v42  ;;  %v7492_v30 = vmax.f32 %v5762_v22, 0.0  ;;  %2715 = vst.msk [vmem:[%s6825_s5 + $0x68] sm:$0xf] %vm2688_vm3, %v3083_v3  ;;  %2716 = vst.msk [vmem:[%s6825_s5 + $0x6c] sm:$0xf] %vm2688_vm3, %v3084_v11  ;;  %v7493_v9 = vmax.f32 %v5766_v56, 0.0 }
 0x379   :  { %v3090_v48 = vpack.c.bf16 %v7490_v27, %v7490_v27  ;;  %v3091_v36 = vpack.c.bf16 %v7491_v8, %v7491_v8  ;;  %v7494_v31 = vmax.f32 %v5770_v39, 0.0  ;;  %v7495_v1 = vmax.f32 %v5774_v6, 0.0  ;;  %2717 = vst.msk [vmem:[%s6825_s5 + $0x70] sm:$0xf] %vm2688_vm3, %v3085_v52  ;;  %2718 = vst.msk [vmem:[%s6825_s5 + $0x74] sm:$0xf] %vm2688_vm3, %v3086_v19 }
 0x37a   :  { %v3092_v23 = vpack.c.bf16 %v7492_v30, %v7492_v30  ;;  %v3093_v10 = vpack.c.bf16 %v7493_v9, %v7493_v9  ;;  %v7496_v53 = vmax.f32 %v5778_v51, 0.0  ;;  %2719 = vst.msk [vmem:[%s6825_s5 + $0x78] sm:$0xf] %vm2688_vm3, %v3087_v2  ;;  %2720 = vst.msk [vmem:[%s6825_s5 + $0x7c] sm:$0xf] %vm2688_vm3, %v3088_v32  ;;  %v7497_v56 = vmax.f32 %v5782_v15, 0.0 }
 0x37b   :  { %v3094_v22 = vpack.c.bf16 %v7494_v31, %v7494_v31  ;;  %v3095_v20 = vpack.c.bf16 %v7495_v1, %v7495_v1  ;;  %v7498_v6 = vmax.f32 %v5786_v38, 0.0  ;;  %v7499_v58 = vmax.f32 %v5790_v0, 0.0  ;;  %2721 = vst.msk [vmem:[%s6825_s5 + $0x80] sm:$0xf] %vm2688_vm3, %v3089_v28  ;;  %2722 = vst.msk [vmem:[%s6825_s5 + $0x84] sm:$0xf] %vm2688_vm3, %v3090_v48 }
 0x37c   :  { %v3096_v54 = vpack.c.bf16 %v7496_v53, %v7496_v53  ;;  %v3097_v39 = vpack.c.bf16 %v7497_v56, %v7497_v56  ;;  %v7500_v16 = vmax.f32 %v5794_v41, 0.0  ;;  %2723 = vst.msk [vmem:[%s6825_s5 + $0x88] sm:$0xf] %vm2688_vm3, %v3091_v36  ;;  %2724 = vst.msk [vmem:[%s6825_s5 + $0x8c] sm:$0xf] %vm2688_vm3, %v3092_v23  ;;  %v7501_v15 = vmax.f32 %v5798_v62, 0.0 }
 0x37d   :  { %v3098_v51 = vpack.c.bf16 %v7498_v6, %v7498_v6  ;;  %v3099_v12 = vpack.c.bf16 %v7499_v58, %v7499_v58  ;;  %v7502_v0 = vmax.f32 %v5802_v55, 0.0  ;;  %v7503_v24 = vmax.f32 %v5806_v18, 0.0  ;;  %2725 = vst.msk [vmem:[%s6825_s5 + $0x90] sm:$0xf] %vm2688_vm3, %v3093_v10  ;;  %2726 = vst.msk [vmem:[%s6825_s5 + $0x94] sm:$0xf] %vm2688_vm3, %v3094_v22 }
 0x37e   :  { %v3100_v29 = vpack.c.bf16 %v7500_v16, %v7500_v16  ;;  %v3101_v38 = vpack.c.bf16 %v7501_v15, %v7501_v15  ;;  %v7504_v43 = vmax.f32 %v5810_v33, 0.0  ;;  %2727 = vst.msk [vmem:[%s6825_s5 + $0x98] sm:$0xf] %vm2688_vm3, %v3095_v20  ;;  %2728 = vst.msk [vmem:[%s6825_s5 + $0x9c] sm:$0xf] %vm2688_vm3, %v3096_v54  ;;  %v7505_v62 = vmax.f32 %v5814_v49, 0.0 }
 0x37f   :  { %v3102_v41 = vpack.c.bf16 %v7502_v0, %v7502_v0  ;;  %v3103_v14 = vpack.c.bf16 %v7503_v24, %v7503_v24  ;;  %v7506_v18 = vmax.f32 %v5818_v59, 0.0  ;;  %v7507_v60 = vmax.f32 %v5822_v47, 0.0  ;;  %2729 = vst.msk [vmem:[%s6825_s5 + $0xa0] sm:$0xf] %vm2688_vm3, %v3097_v39  ;;  %2730 = vst.msk [vmem:[%s6825_s5 + $0xa4] sm:$0xf] %vm2688_vm3, %v3098_v51 }
 0x380   :  { %v3104_v44 = vpack.c.bf16 %v7504_v43, %v7504_v43  ;;  %v3105_v55 = vpack.c.bf16 %v7505_v62, %v7505_v62  ;;  %v7508_v26 = vmax.f32 %v5826_v57, 0.0  ;;  %2731 = vst.msk [vmem:[%s6825_s5 + $0xa8] sm:$0xf] %vm2688_vm3, %v3099_v12  ;;  %2732 = vst.msk [vmem:[%s6825_s5 + $0xac] sm:$0xf] %vm2688_vm3, %v3100_v29  ;;  %v7509_v49 = vmax.f32 %v5830_v17, 0.0 }
 0x381   :  { %v3106_v33 = vpack.c.bf16 %v7506_v18, %v7506_v18  ;;  %v3107_v46 = vpack.c.bf16 %v7507_v60, %v7507_v60  ;;  %v7510_v47 = vmax.f32 %v5834_v63, 0.0  ;;  %v7511_v35 = vmax.f32 %v5838_v37, 0.0  ;;  %2733 = vst.msk [vmem:[%s6825_s5 + $0xb0] sm:$0xf] %vm2688_vm3, %v3101_v38  ;;  %2734 = vst.msk [vmem:[%s6825_s5 + $0xb4] sm:$0xf] %vm2688_vm3, %v3102_v41 }
 0x382   :  { %v3108_v3 = vpack.c.bf16 %v7508_v26, %v7508_v26  ;;  %v3109_v59 = vpack.c.bf16 %v7509_v49, %v7509_v49  ;;  %v7512_v40 = vmax.f32 %v5842_v61, 0.0  ;;  %2735 = vst.msk [vmem:[%s6825_s5 + $0xb8] sm:$0xf] %vm2688_vm3, %v3103_v14  ;;  %2736 = vst.msk [vmem:[%s6825_s5 + $0xbc] sm:$0xf] %vm2688_vm3, %v3104_v44  ;;  %v7513_v17 = vmax.f32 %v5846_v45, 0.0 }
 0x383   :  { %v3110_v57 = vpack.c.bf16 %v7510_v47, %v7510_v47  ;;  %v3111_v11 = vpack.c.bf16 %v7511_v35, %v7511_v35  ;;  %v7514_v37 = vmax.f32 %v5850_v21, 0.0  ;;  %v7515_v34 = vmax.f32 %v5854_v13, 0.0  ;;  %2737 = vst.msk [vmem:[%s6825_s5 + $0xc0] sm:$0xf] %vm2688_vm3, %v3105_v55  ;;  %2738 = vst.msk [vmem:[%s6825_s5 + $0xc4] sm:$0xf] %vm2688_vm3, %v3106_v33 }
 0x384   :  { %v3112_v52 = vpack.c.bf16 %v7512_v40, %v7512_v40  ;;  %v3113_v63 = vpack.c.bf16 %v7513_v17, %v7513_v17  ;;  %v7516_v4 = vmax.f32 %v5858_v25, 0.0  ;;  %2739 = vst.msk [vmem:[%s6825_s5 + $0xc8] sm:$0xf] %vm2688_vm3, %v3107_v46  ;;  %2740 = vst.msk [vmem:[%s6825_s5 + $0xcc] sm:$0xf] %vm2688_vm3, %v3108_v3  ;;  %v7517_v45 = vmax.f32 %v5862_v5, 0.0 }
 0x385   :  { %v3114_v61 = vpack.c.bf16 %v7514_v37, %v7514_v37  ;;  %v3115_v19 = vpack.c.bf16 %v7515_v34, %v7515_v34  ;;  %v7518_v13 = vmax.f32 %v5866_v7, 0.0  ;;  %v7519_v50 = vld [vmem:[#allocation20_spill] sm:$0xff]  ;;  %v7521_v28 = vld [vmem:[#allocation21_spill] sm:$0xff]  ;;  %2741 = vst.msk [vmem:[%s6825_s5 + $0xd0] sm:$0xf] %vm2688_vm3, %v3109_v59  ;;  %v7523_v5 = vld [vmem:[#allocation22_spill] sm:$0xff] }
 0x386   :  { %v3116_v2 = vpack.c.bf16 %v7516_v4, %v7516_v4  ;;  %v3117_v21 = vpack.c.bf16 %v7517_v45, %v7517_v45  ;;  %v7520_v32 = vmax.f32 %v7519_v50, 0.0  ;;  %v7522_v27 = vmax.f32 %v7521_v28, 0.0  ;;  %2742 = vst.msk [vmem:[%s6825_s5 + $0xd4] sm:$0xf] %vm2688_vm3, %v3110_v57  ;;  %2743 = vst.msk [vmem:[%s6825_s5 + $0xd8] sm:$0xf] %vm2688_vm3, %v3111_v11 }
 0x387   :  { %v3118_v25 = vpack.c.bf16 %v7518_v13, %v7518_v13  ;;  %2744 = vst.msk [vmem:[%s6825_s5 + $0xdc] sm:$0xf] %vm2688_vm3, %v3112_v52  ;;  %v7524_v7 = vmax.f32 %v7523_v5, 0.0  ;;  %v7525_v36 = vld [vmem:[#allocation23_spill] sm:$0xff]  ;;  %v7527_v9 = vld [vmem:[#allocation24_spill] sm:$0xff]  ;;  %v7529_v22 = vld [vmem:[#allocation25_spill] sm:$0xff] }
 0x388   :  { %v3119_v42 = vpack.c.bf16 %v7520_v32, %v7520_v32  ;;  %v3120_v48 = vpack.c.bf16 %v7522_v27, %v7522_v27  ;;  %v7526_v30 = vmax.f32 %v7525_v36, 0.0  ;;  %v7528_v10 = vmax.f32 %v7527_v9, 0.0  ;;  %2745 = vst.msk [vmem:[%s6825_s5 + $0xe0] sm:$0xf] %vm2688_vm3, %v3113_v63  ;;  %2746 = vst.msk [vmem:[%s6825_s5 + $0xe4] sm:$0xf] %vm2688_vm3, %v3114_v61 }
 0x389   :  { %v3121_v8 = vpack.c.bf16 %v7524_v7, %v7524_v7  ;;  %v7530_v1 = vmax.f32 %v7529_v22, 0.0  ;;  %2747 = vst.msk [vmem:[%s6825_s5 + $0xe8] sm:$0xf] %vm2688_vm3, %v3115_v19  ;;  %2748 = vst.msk [vmem:[%s6825_s5 + $0xec] sm:$0xf] %vm2688_vm3, %v3116_v2  ;;  %v7531_v53 = vld [vmem:[#allocation26_spill] sm:$0xff] }
 0x38a   :  { %v3122_v23 = vpack.c.bf16 %v7526_v30, %v7526_v30  ;;  %v3123_v31 = vpack.c.bf16 %v7528_v10, %v7528_v10  ;;  %v7532_v54 = vmax.f32 %v7531_v53, 0.0  ;;  %v7533_v39 = vld [vmem:[#allocation27_spill] sm:$0xff]  ;;  %v7535_v58 = vld [vmem:[#allocation28_spill] sm:$0xff]  ;;  %v7537_v29 = vld [vmem:[#allocation29_spill] sm:$0xff]  ;;  %2749 = vst.msk [vmem:[%s6825_s5 + $0xf0] sm:$0xf] %vm2688_vm3, %v3117_v21 }
 0x38b   :  { %v3124_v20 = vpack.c.bf16 %v7530_v1, %v7530_v1  ;;  %v7534_v6 = vmax.f32 %v7533_v39, 0.0  ;;  %v7536_v12 = vmax.f32 %v7535_v58, 0.0  ;;  %v7538_v15 = vmax.f32 %v7537_v29, 0.0  ;;  %2750 = vst.msk [vmem:[%s6825_s5 + $0xf4] sm:$0xf] %vm2688_vm3, %v3118_v25  ;;  %v7539_v0 = vld [vmem:[#allocation58_spill] sm:$0xff] }
 0x38c   :  { %v3125_v56 = vpack.c.bf16 %v7532_v54, %v7532_v54  ;;  %2751 = vst.msk [vmem:[%s6825_s5 + $0xf8] sm:$0xf] %vm2688_vm3, %v3119_v42  ;;  %2752 = vst.msk [vmem:[%s6825_s5 + $0xfc] sm:$0xf] %vm2688_vm3, %v3120_v48  ;;  %v7540_v41 = vmax.f32 %v7539_v0, 0.0  ;;  %v7541_v14 = vld [vmem:[#allocation59_spill] sm:$0xff] }
 0x38d   :  { %v3126_v51 = vpack.c.bf16 %v7534_v6, %v7534_v6  ;;  %v3127_v16 = vpack.c.bf16 %v7536_v12, %v7536_v12  ;;  %v3128_v38 = vpack.c.bf16 %v7538_v15, %v7538_v15  ;;  %v7542_v43 = vmax.f32 %v7541_v14, 0.0  ;;  %v7543_v62 = vld [vmem:[#allocation60_spill] sm:$0xff]  ;;  %v7545_v33 = vld [vmem:[#allocation61_spill] sm:$0xff]  ;;  %2753 = vst.msk [vmem:[%s6825_s5 + $0x100] sm:$0xf] %vm2688_vm3, %v3121_v8  ;;  %v7547_v26 = vld [vmem:[#allocation62_spill] sm:$0xff] }
 0x38e   :  { %v3129_v24 = vpack.c.bf16 %v7540_v41, %v7540_v41  ;;  %v7544_v55 = vmax.f32 %v7543_v62, 0.0  ;;  %v7546_v60 = vmax.f32 %v7545_v33, 0.0  ;;  %2754 = vst.msk [vmem:[%s6825_s5 + $0x104] sm:$0xf] %vm2688_vm3, %v3122_v23  ;;  %2755 = vst.msk [vmem:[%s6825_s5 + $0x108] sm:$0xf] %vm2688_vm3, %v3123_v31 }
 0x38f   :  { %v3130_v44 = vpack.c.bf16 %v7542_v43, %v7542_v43  ;;  %2756 = vst.msk [vmem:[%s6825_s5 + $0x10c] sm:$0xf] %vm2688_vm3, %v3124_v20  ;;  %v7548_v3 = vmax.f32 %v7547_v26, 0.0  ;;  %v7549_v59 = vld [vmem:[#allocation63_spill] sm:$0xff]  ;;  %v7551_v35 = vld [vmem:[#allocation64_spill] sm:$0xff]  ;;  %v7553_v52 = vld [vmem:[#allocation30_spill] sm:$0xff] }
 0x390   :  { %v3131_v18 = vpack.c.bf16 %v7544_v55, %v7544_v55  ;;  %v3132_v46 = vpack.c.bf16 %v7546_v60, %v7546_v60  ;;  %v7550_v47 = vmax.f32 %v7549_v59, 0.0  ;;  %v7552_v11 = vmax.f32 %v7551_v35, 0.0  ;;  %2757 = vst.msk [vmem:[%s6825_s5 + $0x110] sm:$0xf] %vm2688_vm3, %v3125_v56  ;;  %2758 = vst.msk [vmem:[%s6825_s5 + $0x114] sm:$0xf] %vm2688_vm3, %v3126_v51 }
 0x391   :  { %v3133_v49 = vpack.c.bf16 %v7548_v3, %v7548_v3  ;;  %v7554_v17 = vmax.f32 %v7553_v52, 0.0  ;;  %2759 = vst.msk [vmem:[%s6825_s5 + $0x118] sm:$0xf] %vm2688_vm3, %v3127_v16  ;;  %2760 = vst.msk [vmem:[%s6825_s5 + $0x11c] sm:$0xf] %vm2688_vm3, %v3128_v38  ;;  %v7555_v37 = vld [vmem:[#allocation31_spill] sm:$0xff] }
 0x392   :  { %v3134_v57 = vpack.c.bf16 %v7550_v47, %v7550_v47  ;;  %v3135_v40 = vpack.c.bf16 %v7552_v11, %v7552_v11  ;;  %v7556_v61 = vmax.f32 %v7555_v37, 0.0  ;;  %v7557_v19 = vld [vmem:[#allocation32_spill] sm:$0xff]  ;;  %v7559_v45 = vld [vmem:[#allocation33_spill] sm:$0xff]  ;;  %v7561_v25 = vld [vmem:[#allocation34_spill] sm:$0xff]  ;;  %2761 = vst.msk [vmem:[%s6825_s5 + $0x120] sm:$0xf] %vm2688_vm3, %v3129_v24 }
 0x393   :  { %v3136_v63 = vpack.c.bf16 %v7554_v17, %v7554_v17  ;;  %v7558_v4 = vmax.f32 %v7557_v19, 0.0  ;;  %v7560_v21 = vmax.f32 %v7559_v45, 0.0  ;;  %v7562_v50 = vmax.f32 %v7561_v25, 0.0  ;;  %2762 = vst.msk [vmem:[%s6825_s5 + $0x124] sm:$0xf] %vm2688_vm3, %v3130_v44  ;;  %v7563_v42 = vld [vmem:[#allocation35_spill] sm:$0xff] }
 0x394   :  { %v3137_v34 = vpack.c.bf16 %v7556_v61, %v7556_v61  ;;  %2763 = vst.msk [vmem:[%s6825_s5 + $0x128] sm:$0xf] %vm2688_vm3, %v3131_v18  ;;  %2764 = vst.msk [vmem:[%s6825_s5 + $0x12c] sm:$0xf] %vm2688_vm3, %v3132_v46  ;;  %v7564_v28 = vmax.f32 %v7563_v42, 0.0  ;;  %v7565_v48 = vld [vmem:[#allocation36_spill] sm:$0xff] }
 0x395   :  { %v3138_v2 = vpack.c.bf16 %v7558_v4, %v7558_v4  ;;  %v3139_v13 = vpack.c.bf16 %v7560_v21, %v7560_v21  ;;  %v3140_v32 = vpack.c.bf16 %v7562_v50, %v7562_v50  ;;  %v7566_v5 = vmax.f32 %v7565_v48, 0.0  ;;  %v7567_v8 = vld [vmem:[#allocation37_spill] sm:$0xff]  ;;  %v7569_v23 = vld [vmem:[#allocation38_spill] sm:$0xff]  ;;  %2765 = vst.msk [vmem:[%s6825_s5 + $0x130] sm:$0xf] %vm2688_vm3, %v3133_v49  ;;  %v7571_v31 = vld [vmem:[#allocation39_spill] sm:$0xff] }
 0x396   :  { %v3141_v27 = vpack.c.bf16 %v7564_v28, %v7564_v28  ;;  %v7568_v36 = vmax.f32 %v7567_v8, 0.0  ;;  %v7570_v9 = vmax.f32 %v7569_v23, 0.0  ;;  %2766 = vst.msk [vmem:[%s6825_s5 + $0x134] sm:$0xf] %vm2688_vm3, %v3134_v57  ;;  %2767 = vst.msk [vmem:[%s6825_s5 + $0x138] sm:$0xf] %vm2688_vm3, %v3135_v40 }
 0x397   :  { %v3142_v7 = vpack.c.bf16 %v7566_v5, %v7566_v5  ;;  %2768 = vst.msk [vmem:[%s6825_s5 + $0x13c] sm:$0xf] %vm2688_vm3, %v3136_v63  ;;  %v7572_v22 = vmax.f32 %v7571_v31, 0.0  ;;  %v7573_v20 = vld [vmem:[#allocation40_spill] sm:$0xff]  ;;  %v7575_v56 = vld [vmem:[#allocation41_spill] sm:$0xff]  ;;  %v7577_v51 = vld [vmem:[#allocation42_spill] sm:$0xff] }
 0x398   :  { %v3143_v30 = vpack.c.bf16 %v7568_v36, %v7568_v36  ;;  %v3144_v10 = vpack.c.bf16 %v7570_v9, %v7570_v9  ;;  %v7574_v53 = vmax.f32 %v7573_v20, 0.0  ;;  %v7576_v39 = vmax.f32 %v7575_v56, 0.0  ;;  %2769 = vst.msk [vmem:[%s6825_s5 + $0x140] sm:$0xf] %vm2688_vm3, %v3137_v34  ;;  %2770 = vst.msk [vmem:[%s6825_s5 + $0x144] sm:$0xf] %vm2688_vm3, %v3138_v2 }
 0x399   :  { %v3145_v1 = vpack.c.bf16 %v7572_v22, %v7572_v22  ;;  %v7578_v58 = vmax.f32 %v7577_v51, 0.0  ;;  %2771 = vst.msk [vmem:[%s6825_s5 + $0x148] sm:$0xf] %vm2688_vm3, %v3139_v13  ;;  %2772 = vst.msk [vmem:[%s6825_s5 + $0x14c] sm:$0xf] %vm2688_vm3, %v3140_v32  ;;  %v7579_v16 = vld [vmem:[#allocation43_spill] sm:$0xff] }
 0x39a   :  { %v3146_v54 = vpack.c.bf16 %v7574_v53, %v7574_v53  ;;  %v3147_v6 = vpack.c.bf16 %v7576_v39, %v7576_v39  ;;  %v7580_v29 = vmax.f32 %v7579_v16, 0.0  ;;  %v7581_v38 = vld [vmem:[#allocation44_spill] sm:$0xff]  ;;  %v7583_v24 = vld [vmem:[#allocation65_spill] sm:$0xff]  ;;  %v7585_v44 = vld [vmem:[#allocation66_spill] sm:$0xff]  ;;  %2773 = vst.msk [vmem:[%s6825_s5 + $0x150] sm:$0xf] %vm2688_vm3, %v3141_v27 }
 0x39b   :  { %v3148_v12 = vpack.c.bf16 %v7578_v58, %v7578_v58  ;;  %v7582_v0 = vmax.f32 %v7581_v38, 0.0  ;;  %v7584_v14 = vmax.f32 %v7583_v24, 0.0  ;;  %v7586_v62 = vmax.f32 %v7585_v44, 0.0  ;;  %2774 = vst.msk [vmem:[%s6825_s5 + $0x154] sm:$0xf] %vm2688_vm3, %v3142_v7  ;;  %v7587_v18 = vld [vmem:[#allocation67_spill] sm:$0xff] }
 0x39c   :  { %v3149_v15 = vpack.c.bf16 %v7580_v29, %v7580_v29  ;;  %2775 = vst.msk [vmem:[%s6825_s5 + $0x158] sm:$0xf] %vm2688_vm3, %v3143_v30  ;;  %2776 = vst.msk [vmem:[%s6825_s5 + $0x15c] sm:$0xf] %vm2688_vm3, %v3144_v10  ;;  %v7588_v33 = vmax.f32 %v7587_v18, 0.0  ;;  %v7589_v46 = vld [vmem:[#allocation68_spill] sm:$0xff] }
 0x39d   :  { %v3150_v41 = vpack.c.bf16 %v7582_v0, %v7582_v0  ;;  %v3151_v43 = vpack.c.bf16 %v7584_v14, %v7584_v14  ;;  %v3152_v55 = vpack.c.bf16 %v7586_v62, %v7586_v62  ;;  %v7590_v26 = vmax.f32 %v7589_v46, 0.0  ;;  %v7591_v49 = vld [vmem:[#allocation69_spill] sm:$0xff]  ;;  %v7593_v57 = vld [vmem:[#allocation70_spill] sm:$0xff]  ;;  %2777 = vst.msk [vmem:[%s6825_s5 + $0x160] sm:$0xf] %vm2688_vm3, %v3145_v1 }
 0x39e   :  { %v3153_v60 = vpack.c.bf16 %v7588_v33, %v7588_v33  ;;  %v7592_v59 = vmax.f32 %v7591_v49, 0.0  ;;  %v7594_v35 = vmax.f32 %v7593_v57, 0.0  ;;  %2778 = vst.msk [vmem:[%s6825_s5 + $0x164] sm:$0xf] %vm2688_vm3, %v3146_v54  ;;  %2779 = vst.msk [vmem:[%s6825_s5 + $0x168] sm:$0xf] %vm2688_vm3, %v3147_v6 }
 0x39f   :  { %v3154_v3 = vpack.c.bf16 %v7590_v26, %v7590_v26  ;;  %2780 = vst.msk [vmem:[%s6825_s5 + $0x16c] sm:$0xf] %vm2688_vm3, %v3148_v12  ;;  %2781 = vst.msk [vmem:[%s6825_s5 + $0x170] sm:$0xf] %vm2688_vm3, %v3149_v15 }
 0x3a0   :  { %v3155_v47 = vpack.c.bf16 %v7592_v59, %v7592_v59  ;;  %v3156_v11 = vpack.c.bf16 %v7594_v35, %v7594_v35  ;;  %2782 = vst.msk [vmem:[%s6825_s5 + $0x174] sm:$0xf] %vm2688_vm3, %v3150_v41  ;;  %2783 = vst.msk [vmem:[%s6825_s5 + $0x178] sm:$0xf] %vm2688_vm3, %v3151_v43 }
 0x3a1   :  { %2784 = vst.msk [vmem:[%s6825_s5 + $0x17c] sm:$0xf] %vm2688_vm3, %v3152_v55  ;;  %2785 = vst.msk [vmem:[%s6825_s5 + $0x180] sm:$0xf] %vm2688_vm3, %v3153_v60 }
 0x3a2   :  { %2786 = vst.msk [vmem:[%s6825_s5 + $0x184] sm:$0xf] %vm2688_vm3, %v3154_v3  ;;  %2787 = vst.msk [vmem:[%s6825_s5 + $0x188] sm:$0xf] %vm2688_vm3, %v3155_v47 }
 0x3a3   :  { %2788 = vst.msk [vmem:[%s6825_s5 + $0x18c] sm:$0xf] %vm2688_vm3, %v3156_v11 }

// kernel: shrinkage_forward.7
= control target key start
LH: loop header
LB: loop body
LE: loop exit
PB: predicated region body
PF: predicated region fallthrough
CT: control target
= control target key end

     0   :  { %vm340_vm0 = vcmask 1046528   ;;  %vm315_vm1 = vcmask 113664   ;;  %vm538_vm2 = vcmask 326656   ;;  %vm776_vm3 = vcmask 322560   ;;  %s1458_s1 = inlined_call_operand.vmem [shape: bf16[270,40], index: 1, kind: input, shape index: {}]   ;;  %s1459_s0 = inlined_call_operand.vmem [shape: bf16[128,270], index: 0, kind: input, shape index: {}]   ;;  %s1460_s2 = inlined_call_operand.vmem [shape: f32[1,40], index: 2, kind: input, shape index: {}]   ;;  %s1461_s3 = inlined_call_operand.vmem [shape: f32[1,40], index: 3, kind: input, shape index: {}]   ;;  %s1462_s4 = inlined_call_operand.vmem [shape: f32[1,40], index: 4, kind: input, shape index: {}]   ;;  %s1463_s5 = inlined_call_operand.vmem [shape: bf16[128,40], index: 5, kind: output, shape index: {}]  }
   0x1   :  { %v988_v0 = vld [vmem:[%s1458_s1 + $0x78] sm:$0xff]   ;;  %v990_v2 = vld [vmem:[%s1458_s1 + $0x70] sm:$0xff]   ;;  %v992_v4 = vld [vmem:[%s1458_s1 + $0x68] sm:$0xff]  }
   0x2   :  { %v989_v1 = vld [vmem:[%s1458_s1 + $0x38] sm:$0xff]   ;;  %880 = vmatprep.subr.bf16.mxu0 %v988_v0  ;;  %971 = vmatprep.subr.bf16.mxu1 %v988_v0  ;;  %v991_v3 = vld [vmem:[%s1458_s1 + $0x30] sm:$0xff]   ;;  %v993_v5 = vld [vmem:[%s1458_s1 + $0x28] sm:$0xff]  }
   0x3   :  { %881 = vmatpush3.bf16.msra.mxu0 %v989_v1  ;;  %979 = vmatpush3.bf16.msra.mxu1 %v989_v1  ;;  %v994_v6 = vld [vmem:[%s1458_s1 + $0x60] sm:$0xff]   ;;  %v996_v8 = vld [vmem:[%s1458_s1 + $0x58] sm:$0xff]   ;;  %v998_v10 = vld [vmem:[%s1458_s1 + $0x50] sm:$0xff]  }
   0x4   :  { %882 = vmatprep.subr.bf16.mxu0 %v990_v2  ;;  %972 = vmatprep.subr.bf16.mxu1 %v990_v2  ;;  %v995_v7 = vld [vmem:[%s1458_s1 + $0x20] sm:$0xff]   ;;  %v997_v9 = vld [vmem:[%s1458_s1 + $0x18] sm:$0xff]   ;;  %v999_v13 = vld [vmem:[%s1458_s1 + $0x10] sm:$0xff]  }
   0x5   :  { %v1006_v11 = vld [vmem:[%s1459_s0 + $0x4] ss:$12 sps:$4 sm:$0xff]   ;;  %v1009_v12 = vld [vmem:[%s1459_s0 + $0x94] ss:$12 sps:$4 sm:$0xff]   ;;  %v1000_v14 = vld [vmem:[%s1458_s1 + $0x48] sm:$0xff]  }
   0x6   :  { %376 = vmatprep.mubr.bf16.mxu0 %v1006_v11  ;;  %424 = vmatprep.mubr.bf16.mxu1 %v1009_v12  ;;  %v1001_v15 = vld [vmem:[%s1458_s1 + $0x8] sm:$0xff]   ;;  %v1002_v16 = vld [vmem:[%s1458_s1 + $0x40] sm:$0xff]   ;;  %v1007_v20 = vld [vmem:[%s1459_s0 + $0x90] ss:$12 sps:$4 sm:$0xff]  }
   0x7   :  { %883 = vmatpush3.bf16.msra.mxu0 %v991_v3  ;;  %980 = vmatpush3.bf16.msra.mxu1 %v991_v3  ;;  %v1003_v17 = vld [vmem:[%s1458_s1] sm:$0xff]   ;;  %v1010_v21 = vld [vmem:[%s1459_s0 + $0x1c] ss:$12 sps:$4 sm:$0xff]   ;;  %v1012_v22 = vld [vmem:[%s1459_s0 + $0xac] ss:$12 sps:$4 sm:$0xff]  }
   0x8   :  { %884 = vmatprep.subr.bf16.mxu0 %v992_v4  ;;  %973 = vmatprep.subr.bf16.mxu1 %v992_v4  ;;  %v1004_v18 = vld [vmem:[%s1459_s0] ss:$12 sps:$4 sm:$0xff]   ;;  %v1015_v24 = vld [vmem:[%s1459_s0 + $0x18] ss:$12 sps:$4 sm:$0xff]   ;;  %v1016_v25 = vld [vmem:[%s1459_s0 + $0xa8] ss:$12 sps:$4 sm:$0xff]  }
   0x9   :  { %v1014_v19 = vld [vmem:[%s1458_s1 + $0x80] sm:$0x7f]   ;;  %v1019_v27 = vld [vmem:[%s1459_s0 + $0x8] ss:$12 sps:$4 sm:$0xff]   ;;  %v1020_v28 = vld [vmem:[%s1459_s0 + $0x30] ss:$12 sps:$4 sm:$0xff]  }
   0xa   :  { %v342_v23 = vsel %vm340_vm0, %v1014_v19, 0  ;;  %v1017_v26 = vld [vmem:[%s1459_s0 + $0x34] ss:$12 sps:$4 sm:$0xff]   ;;  %v1022_v30 = vld [vmem:[%s1459_s0 + $0x4c] ss:$12 sps:$4 sm:$0xff]  }
   0xb   :  { %885 = vmatpush3.bf16.msra.mxu0 %v993_v5  ;;  %981 = vmatpush3.bf16.msra.mxu1 %v993_v5  ;;  %v1021_v29 = vld [vmem:[%s1459_s0 + $0x20] ss:$12 sps:$4 sm:$0xff]   ;;  %v1024_v31 = vld [vmem:[%s1459_s0 + $0x38] ss:$12 sps:$4 sm:$0xff]   ;;  %v1025_v32 = vld [vmem:[%s1459_s0 + $0x48] ss:$12 sps:$4 sm:$0xff]  }
   0xc   :  { %886 = vmatprep.subr.bf16.mxu0 %v994_v6  ;;  %974 = vmatprep.subr.bf16.mxu1 %v994_v6  ;;  %v1026_v33 = vld [vmem:[%s1459_s0 + $0x50] ss:$12 sps:$4 sm:$0xff]   ;;  %v1029_v35 = vld [vmem:[%s1459_s0 + $0x68] ss:$12 sps:$4 sm:$0xff]   ;;  %v1030_v36 = vld [vmem:[%s1459_s0 + $0x60] ss:$12 sps:$4 sm:$0xff]  }
   0xd   :  { %v1027_v34 = vld [vmem:[%s1459_s0 + $0x64] ss:$12 sps:$4 sm:$0xff]   ;;  %v1031_v37 = vld [vmem:[%s1459_s0 + $0x80] ss:$12 sps:$4 sm:$0xff]   ;;  %v1032_v38 = vld [vmem:[%s1459_s0 + $0x7c] ss:$12 sps:$4 sm:$0xff]  }
   0xe   :  { %v1034_v39 = vld [vmem:[%s1459_s0 + $0x98] ss:$12 sps:$4 sm:$0xff]   ;;  %v1036_v41 = vld [vmem:[%s1459_s0 + $0xb0] ss:$12 sps:$4 sm:$0xff]   ;;  %v1219_v60 = vld [vmem:[%s1460_s2] ss:$0 sm:$0xff] }
   0xf   :  { %887 = vmatpush3.bf16.msra.mxu0 %v995_v7  ;;  %982 = vmatpush3.bf16.msra.mxu1 %v995_v7  ;;  %v1035_v40 = vld [vmem:[%s1459_s0 + $0x78] ss:$12 sps:$4 sm:$0xff]  }
  0x10   :  { %888 = vmatprep.subr.bf16.mxu0 %v996_v8  ;;  %975 = vmatprep.subr.bf16.mxu1 %v996_v8 }
  0x13   :  { %889 = vmatpush3.bf16.msra.mxu0 %v997_v9  ;;  %983 = vmatpush3.bf16.msra.mxu1 %v997_v9 }
  0x14   :  { %890 = vmatprep.subr.bf16.mxu0 %v998_v10  ;;  %976 = vmatprep.subr.bf16.mxu1 %v998_v10 }
  0x17   :  { %891 = vmatpush3.bf16.msra.mxu0 %v999_v13  ;;  %984 = vmatpush3.bf16.msra.mxu1 %v999_v13 }
  0x18   :  { %892 = vmatprep.subr.bf16.mxu0 %v1000_v14  ;;  %977 = vmatprep.subr.bf16.mxu1 %v1000_v14 }
  0x1b   :  { %893 = vmatpush3.bf16.msra.mxu0 %v1001_v15  ;;  %985 = vmatpush3.bf16.msra.mxu1 %v1001_v15 }
  0x1c   :  { %894 = vmatprep.subr.bf16.mxu0 %v1002_v16  ;;  %978 = vmatprep.subr.bf16.mxu1 %v1002_v16 }
  0x1f   :  { %895 = vmatpush3.bf16.msra.mxu0 %v1003_v17  ;;  %986 = vmatpush3.bf16.msra.mxu1 %v1003_v17 }
  0x20   :  { %987 = vmatprep.subr.msk.bf16.mxu1 %vm340_vm0, %v1014_v19 }
  0x22   :  { %377 = vmatmul.mubr.bf16.vlgmr.msra.gmra.mxu0 %v1004_v18  ;;  %425 = vmatmul.mubr.bf16.vlgmr.msra.gmra.mxu1 %v1007_v20 }
  0x23   :  { %384 = vmatprep.mubr.bf16.mxu0 %v1010_v21  ;;  %432 = vmatprep.mubr.bf16.mxu1 %v1012_v22 }
  0x24   :  { %954 = vmatpush3.bf16.msra.mxu1 %v342_v23 }
  0x2a   :  { %385 = vmatmul.mubr.bf16.gmra.mxu0 %v1015_v24  ;;  %433 = vmatmul.mubr.bf16.gmra.mxu1 %v1016_v25 }
  0x2b   :  { %392 = vmatprep.mubr.bf16.mxu0 %v1017_v26  ;;  %955 = vmatprep.mubr.msk.bf16.mxu1 %vm315_vm1, %v1019_v27 }
  0x32   :  { %393 = vmatmul.mubr.bf16.gmra.mxu0 %v1020_v28  ;;  %956 = vmatmul.mubr.msk.bf16.vlgmr.msra.gmra.mxu1 %vm315_vm1, %v1021_v29 }
  0x33   :  { %400 = vmatprep.mubr.bf16.mxu0 %v1022_v30  ;;  %959 = vmatprep.mubr.msk.bf16.mxu1 %vm315_vm1, %v1024_v31 }
  0x3a   :  { %401 = vmatmul.mubr.bf16.gmra.mxu0 %v1025_v32  ;;  %960 = vmatmul.mubr.msk.bf16.gmra.mxu1 %vm315_vm1, %v1026_v33 }
  0x3b   :  { %408 = vmatprep.mubr.bf16.mxu0 %v1027_v34  ;;  %963 = vmatprep.mubr.msk.bf16.mxu1 %vm315_vm1, %v1029_v35 }
  0x42   :  { %409 = vmatmul.mubr.bf16.gmra.mxu0 %v1030_v36  ;;  %964 = vmatmul.mubr.msk.bf16.gmra.mxu1 %vm315_vm1, %v1031_v37 }
  0x43   :  { %416 = vmatprep.mubr.bf16.mxu0 %v1032_v38  ;;  %967 = vmatprep.mubr.msk.bf16.mxu1 %vm315_vm1, %v1034_v39 }
  0x4a   :  { %417 = vmatmul.mubr.bf16.gmra.mxu0 %v1035_v40  ;;  %968 = vmatmul.mubr.msk.bf16.gmra.mxu1 %vm315_vm1, %v1036_v41 }
  0xe2   :  { %v896_v42 = vpop.f32.mrf.mxu0  ;;  %v1200_v43 = vpop.f32.mrf.mxu1 }
  0xe4   :  { %v897_v44 = vpop.f32.mrf.mxu0  ;;  %v1202_v45 = vpop.f32.mrf.mxu1 }
  0xe5   :  { %v898_v58 = vadd.f32 %v897_v44, %v896_v42 }
  0xe6   :  { %v899_v46 = vpop.f32.mrf.mxu0  ;;  %v1204_v47 = vpop.f32.mrf.mxu1 }
  0xe7   :  { %v379_v3 = vadd.f32 %v898_v58, %v1219_v60 }
  0xe8   :  { %v900_v48 = vpop.f32.mrf.mxu0  ;;  %v1206_v49 = vpop.f32.mrf.mxu1 }
  0xe9   :  { %v901_v62 = vadd.f32 %v900_v48, %v899_v46 }
  0xea   :  { %v902_v50 = vpop.f32.mrf.mxu0  ;;  %v1208_v51 = vpop.f32.mrf.mxu1 }
  0xeb   :  { %v382_v8 = vadd.f32 %v901_v62, %v1219_v60 }
  0xec   :  { %v903_v52 = vpop.f32.mrf.mxu0  ;;  %v1210_v53 = vpop.f32.mrf.mxu1 }
  0xed   :  { %v904_v63 = vadd.f32 %v903_v52, %v902_v50 }
  0xee   :  { %v905_v54 = vpop.f32.mrf.mxu0  ;;  %v1212_v55 = vpop.f32.mrf.mxu1 }
  0xef   :  { %v387_v6 = vadd.f32 %v904_v63, %v1219_v60 }
  0xf0   :  { %v906_v56 = vpop.f32.mrf.mxu0  ;;  %v1214_v57 = vpop.f32.mrf.mxu1 }
  0xf1   :  { %v907_v2 = vadd.f32 %v906_v56, %v905_v54 }
  0xf2   :  { %v908_v59 = vpop.f32.mrf.mxu0  ;;  %v957_v61 = vpop.f32.mrf.mxu1 }
  0xf3   :  { %v1226_v11 = vadd.f32 %v957_v61, %v387_v6  ;;  %v390_v13 = vadd.f32 %v907_v2, %v1219_v60 }
  0xf4   :  { %v909_v0 = vpop.f32.mrf.mxu0  ;;  %v475_v1 = vpop.f32.mrf.mxu1 }
  0xf5   :  { %v1223_v7 = vadd.f32 %v475_v1, %v379_v3  ;;  %v910_v12 = vadd.f32 %v909_v0, %v908_v59  ;;  %v542_v24 = vsel %vm538_vm2, %v1226_v11, 0.0 }
  0xf6   :  { %v911_v4 = vpop.f32.mrf.mxu0  ;;  %v958_v5 = vpop.f32.mrf.mxu1 }
  0xf7   :  { %v539_v17 = vsel %vm538_vm2, %v1223_v7, 0.0  ;;  %v1233_v18 = vadd.f32 %v958_v5, %v390_v13  ;;  %v395_v25 = vadd.f32 %v910_v12, %v1219_v60 }
  0xf8   :  { %v912_v9 = vpop.f32.mrf.mxu0  ;;  %v478_v10 = vpop.f32.mrf.mxu1 }
  0xf9   :  { %v1229_v14 = vadd.f32 %v478_v10, %v382_v8  ;;  %v913_v19 = vadd.f32 %v912_v9, %v911_v4  ;;  %v544_v29 = vsel %vm538_vm2, %v1233_v18, 0.0 }
  0xfa   :  { %v914_v15 = vpop.f32.mrf.mxu0  ;;  %v961_v16 = vpop.f32.mrf.mxu1 }
  0xfb   :  { %v540_v20 = vsel %vm538_vm2, %v1229_v14, 0.0  ;;  %v398_v32 = vadd.f32 %v913_v19, %v1219_v60 }
  0xfc   :  { %v541_v21 = vadd.f32 %v540_v20, %v539_v17  ;;  %v915_v22 = vpop.f32.mrf.mxu0  ;;  %v491_v23 = vpop.f32.mrf.mxu1  ;;  %v934_v17 = vadd.f32 %v1202_v45, %v1200_v43  ;;  %v940_v43 = vadd.f32 %v1210_v53, %v1208_v51 }
  0xfd   :  { %v916_v30 = vadd.f32 %v915_v22, %v914_v15  ;;  %v1242_v31 = vadd.f32 %v491_v23, %v395_v25 }
  0xfe   :  { %v543_v26 = vadd.f32 %v542_v24, %v541_v21  ;;  %v917_v27 = vpop.f32.mrf.mxu0  ;;  %v962_v28 = vpop.f32.mrf.mxu1  ;;  %v937_v24 = vadd.f32 %v1206_v49, %v1204_v47  ;;  %v943_v47 = vadd.f32 %v1214_v57, %v1212_v55  ;;  %v435_v51 = vadd.f32 %v940_v43, %v1219_v60 }
  0xff   :  { %v403_v40 = vadd.f32 %v916_v30, %v1219_v60  ;;  %v546_v41 = vsel %vm538_vm2, %v1242_v31, 0.0 }
 0x100   :  { %v545_v33 = vadd.f32 %v544_v29, %v543_v26  ;;  %v918_v34 = vpop.f32.mrf.mxu0  ;;  %v494_v35 = vpop.f32.mrf.mxu1  ;;  %v427_v29 = vadd.f32 %v934_v17, %v1219_v60 }
 0x101   :  { %v919_v36 = vadd.f32 %v918_v34, %v917_v27  ;;  %v1245_v37 = vadd.f32 %v494_v35, %v398_v32  ;;  %v1253_v58 = vadd.f32 %v961_v16, %v403_v40  ;;  %v430_v35 = vadd.f32 %v937_v24, %v1219_v60 }
 0x102   :  { %v920_v38 = vpop.f32.mrf.mxu0  ;;  %v965_v39 = vpop.f32.mrf.mxu1  ;;  %v547_v42 = vadd.f32 %v546_v41, %v545_v33 }
 0x103   :  { %v406_v48 = vadd.f32 %v919_v36, %v1219_v60  ;;  %v548_v50 = vsel %vm538_vm2, %v1245_v37, 0.0  ;;  %v550_v4 = vsel %vm538_vm2, %v1253_v58, 0.0 }
 0x104   :  { %v921_v44 = vpop.f32.mrf.mxu0  ;;  %v507_v46 = vpop.f32.mrf.mxu1  ;;  %v549_v61 = vadd.f32 %v548_v50, %v547_v42  ;;  %v438_v42 = vadd.f32 %v943_v47, %v1219_v60 }
 0x105   :  { %v922_v52 = vadd.f32 %v921_v44, %v920_v38  ;;  %v1256_v0 = vadd.f32 %v962_v28, %v406_v48 }
 0x106   :  { %v923_v54 = vpop.f32.mrf.mxu0  ;;  %v966_v56 = vpop.f32.mrf.mxu1  ;;  %v551_v8 = vadd.f32 %v550_v4, %v549_v61 }
 0x107   :  { %v411_v59 = vadd.f32 %v922_v52, %v1219_v60  ;;  %v552_v12 = vsel %vm538_vm2, %v1256_v0, 0.0 }
 0x108   :  { %v924_v62 = vpop.f32.mrf.mxu0  ;;  %v510_v63 = vpop.f32.mrf.mxu1  ;;  %v553_v21 = vadd.f32 %v552_v12, %v551_v8 }
 0x109   :  { %v925_v1 = vadd.f32 %v924_v62, %v923_v54  ;;  %v1260_v5 = vadd.f32 %v507_v46, %v411_v59 }
 0x10a   :  { %v926_v2 = vpop.f32.mrf.mxu0  ;;  %v969_v3 = vpop.f32.mrf.mxu1 }
 0x10b   :  { %v414_v6 = vadd.f32 %v925_v1, %v1219_v60  ;;  %v554_v19 = vsel %vm538_vm2, %v1260_v5, 0.0  ;;  %v1291_v40 = vadd.f32 %v969_v3, %v435_v51 }
 0x10c   :  { %v927_v9 = vpop.f32.mrf.mxu0  ;;  %v523_v10 = vpop.f32.mrf.mxu1  ;;  %v555_v28 = vadd.f32 %v554_v19, %v553_v21 }
 0x10d   :  { %v1265_v13 = vadd.f32 %v510_v63, %v414_v6  ;;  %v928_v15 = vadd.f32 %v927_v9, %v926_v2  ;;  %v1286_v49 = vadd.f32 %v523_v10, %v427_v29  ;;  %v566_v48 = vsel %vm538_vm2, %v1291_v40, 0.0 }
 0x10e   :  { %v929_v16 = vpop.f32.mrf.mxu0  ;;  %v970_v22 = vpop.f32.mrf.mxu1 }
 0x10f   :  { %v419_v20 = vadd.f32 %v928_v15, %v1219_v60  ;;  %v556_v25 = vsel %vm538_vm2, %v1265_v13, 0.0  ;;  %v562_v41 = vsel %vm538_vm2, %v1286_v49, 0.0  ;;  %v1296_v57 = vadd.f32 %v970_v22, %v438_v42 }
 0x110   :  { %v930_v23 = vpop.f32.mrf.mxu0  ;;  %v557_v32 = vadd.f32 %v556_v25, %v555_v28  ;;  %v526_v33 = vpop.f32.mrf.mxu1 }
 0x111   :  { %v1276_v26 = vadd.f32 %v965_v39, %v419_v20  ;;  %v931_v27 = vadd.f32 %v930_v23, %v929_v16  ;;  %v527_v38 = vadd.f32 %v526_v33, %v430_v35  ;;  %v568_v52 = vsel %vm538_vm2, %v1296_v57, 0.0 }
 0x113   :  { %v558_v45 = vsel %vm538_vm2, %v1276_v26, 0.0  ;;  %v422_v30 = vadd.f32 %v931_v27, %v1219_v60  ;;  %v564_v44 = vsel %vm538_vm2, %v527_v38, 0.0 }
 0x114   :  { %v559_v36 = vadd.f32 %v558_v45, %v557_v32 }
 0x115   :  { %v519_v34 = vadd.f32 %v966_v56, %v422_v30 }
 0x117   :  { %v560_v53 = vsel %vm538_vm2, %v519_v34, 0.0 }
 0x118   :  { %v561_v39 = vadd.f32 %v560_v53, %v559_v36 }
 0x11a   :  { %v563_v55 = vadd.f32 %v562_v41, %v561_v39 }
 0x11c   :  { %v565_v46 = vadd.f32 %v564_v44, %v563_v55 }
 0x11e   :  { %v567_v50 = vadd.f32 %v566_v48, %v565_v46 }
 0x120   :  { %v569_v54 = vadd.f32 %v568_v52, %v567_v50 }
 0x122   :  { %v570_v56 = vrot.slane %v569_v54, 4 }
 0x124   :  { %v571_v59 = vadd.f32 %v570_v56, %v569_v54 }
 0x126   :  { %v572_v61 = vrot.slane %v571_v59, 2 }
 0x128   :  { %v573_v62 = vadd.f32 %v572_v61, %v571_v59 }
 0x12a   :  { %v574_v63 = vrot.slane %v573_v62, 1 }
 0x12c   :  { %v575_v60 = vadd.f32 %v574_v63, %v573_v62 }
 0x12e   :  { %v576_v1 = vmul.f32 0.0078125, %v575_v60 }
 0x130   :  { %v1304_v2 = vsub.f32 %v1223_v7, %v576_v1  ;;  %v1307_v3 = vsub.f32 %v1229_v14, %v576_v1  ;;  %v1310_v4 = vsub.f32 %v1226_v11, %v576_v1  ;;  %v1313_v6 = vsub.f32 %v1233_v18, %v576_v1 }
 0x131   :  { %v1320_v10 = vsub.f32 %v1242_v31, %v576_v1  ;;  %v1325_v14 = vsub.f32 %v1245_v37, %v576_v1  ;;  %v1332_v16 = vsub.f32 %v1253_v58, %v576_v1  ;;  %v1338_v37 = vsub.f32 %v1256_v0, %v576_v1 }
 0x132   :  { %v593_v8 = vmul.f32 %v1304_v2, %v1304_v2  ;;  %v594_v9 = vmul.f32 %v1307_v3, %v1307_v3  ;;  %v595_v7 = vmul.f32 %v1310_v4, %v1310_v4  ;;  %v596_v11 = vmul.f32 %v1313_v6, %v1313_v6 }
 0x133   :  { %v597_v31 = vmul.f32 %v1320_v10, %v1320_v10  ;;  %v598_v20 = vmul.f32 %v1325_v14, %v1325_v14  ;;  %v1344_v23 = vsub.f32 %v1260_v5, %v576_v1  ;;  %v599_v58 = vmul.f32 %v1332_v16, %v1332_v16 }
 0x134   :  { %v609_v18 = vsel %vm538_vm2, %v593_v8, 0.0  ;;  %v610_v12 = vsel %vm538_vm2, %v594_v9, 0.0  ;;  %v612_v17 = vsel %vm538_vm2, %v595_v7, 0.0  ;;  %v614_v21 = vsel %vm538_vm2, %v596_v11, 0.0 }
 0x135   :  { %v611_v15 = vadd.f32 %v610_v12, %v609_v18  ;;  %v616_v24 = vsel %vm538_vm2, %v597_v31, 0.0  ;;  %v1350_v27 = vsub.f32 %v1265_v13, %v576_v1  ;;  %v600_v0 = vmul.f32 %v1338_v37, %v1338_v37 }
 0x136   :  { %v618_v28 = vsel %vm538_vm2, %v598_v20, 0.0  ;;  %v1356_v45 = vsub.f32 %v1276_v26, %v576_v1  ;;  %v601_v5 = vmul.f32 %v1344_v23, %v1344_v23  ;;  %v620_v29 = vsel %vm538_vm2, %v599_v58, 0.0 }
 0x137   :  { %v613_v19 = vadd.f32 %v612_v17, %v611_v15  ;;  %v588_v32 = vsub.f32 %v519_v34, %v576_v1  ;;  %v602_v13 = vmul.f32 %v1350_v27, %v1350_v27  ;;  %v622_v33 = vsel %vm538_vm2, %v600_v0, 0.0 }
 0x138   :  { %v589_v35 = vsub.f32 %v1286_v49, %v576_v1  ;;  %v603_v36 = vmul.f32 %v1356_v45, %v1356_v45  ;;  %v624_v26 = vsel %vm538_vm2, %v601_v5, 0.0  ;;  %v590_v53 = vsub.f32 %v527_v38, %v576_v1 }
 0x139   :  { %v615_v22 = vadd.f32 %v614_v21, %v613_v19  ;;  %v604_v39 = vmul.f32 %v588_v32, %v588_v32  ;;  %v626_v41 = vsel %vm538_vm2, %v602_v13, 0.0  ;;  %v591_v34 = vsub.f32 %v1291_v40, %v576_v1  ;;  %v647_v19 = vld [vmem:[%s1461_s3] sm:$0x1] }
 0x13a   :  { %v605_v55 = vmul.f32 %v589_v35, %v589_v35  ;;  %v628_v44 = vsel %vm538_vm2, %v603_v36, 0.0  ;;  %v592_v48 = vsub.f32 %v1296_v57, %v576_v1  ;;  %v606_v49 = vmul.f32 %v590_v53, %v590_v53  ;;  %v847_v13 = vld [vmem:[%s1462_s4] ss:$0 sm:$0xff] }
 0x13b   :  { %v617_v25 = vadd.f32 %v616_v24, %v615_v22  ;;  %v630_v50 = vsel %vm538_vm2, %v604_v39, 0.0  ;;  %v607_v54 = vmul.f32 %v591_v34, %v591_v34  ;;  %v652_v31 = vlaneseq }
 0x13c   :  { %v632_v56 = vsel %vm538_vm2, %v605_v55, 0.0  ;;  %v608_v59 = vmul.f32 %v592_v48, %v592_v48  ;;  %v634_v61 = vsel %vm538_vm2, %v606_v49, 0.0 }
 0x13d   :  { %v619_v43 = vadd.f32 %v618_v28, %v617_v25  ;;  %v636_v40 = vsel %vm538_vm2, %v607_v54, 0.0  ;;  %v653_v17 = vshrl.u32 %v652_v31, 7 }
 0x13e   :  { %v638_v60 = vsel %vm538_vm2, %v608_v59, 0.0 }
 0x13f   :  { %v621_v30 = vadd.f32 %v620_v29, %v619_v43  ;;  %v654_v20 = vsub.s32 0, %v653_v17 }
 0x141   :  { %v623_v47 = vadd.f32 %v622_v33, %v621_v30 }
 0x143   :  { %v625_v51 = vadd.f32 %v624_v26, %v623_v47 }
 0x145   :  { %v627_v42 = vadd.f32 %v626_v41, %v625_v51 }
 0x147   :  { %v629_v46 = vadd.f32 %v628_v44, %v627_v42 }
 0x149   :  { %v631_v52 = vadd.f32 %v630_v50, %v629_v46 }
 0x14b   :  { %v633_v38 = vadd.f32 %v632_v56, %v631_v52 }
 0x14d   :  { %v635_v62 = vadd.f32 %v634_v61, %v633_v38 }
 0x14f   :  { %v637_v63 = vadd.f32 %v636_v40, %v635_v62 }
 0x151   :  { %v639_v8 = vadd.f32 %v638_v60, %v637_v63 }
 0x153   :  { %v640_v9 = vrot.slane %v639_v8, 4 }
 0x155   :  { %v641_v57 = vadd.f32 %v640_v9, %v639_v8 }
 0x157   :  { %v642_v1 = vrot.slane %v641_v57, 2 }
 0x159   :  { %v643_v7 = vadd.f32 %v642_v1, %v641_v57 }
 0x15b   :  { %v644_v11 = vrot.slane %v643_v7, 1 }
 0x15d   :  { %v645_v18 = vadd.f32 %v644_v11, %v643_v7 }
 0x15f   :  { %v646_v12 = vmul.f32 0.0078125, %v645_v18 }
 0x161   :  { %v648_v15 = vadd.f32 1e-05, %v646_v12 }
 0x163   :  { %1037 = vrsqrt.f32 %v648_v15 }
 0x170   :  { %v1038_v21 = vpop.eup %1037 }
 0x171   :  { %v650_v22 = vmul.f32 %v1038_v21, %v647_v19 }
 0x173   :  { %v655_v58 = vrot.slane %v650_v22, %v654_v20 }
 0x175   :  { %v657_v24 = vmul.f32 %v655_v58, %v1304_v2  ;;  %v658_v25 = vmul.f32 %v655_v58, %v1307_v3  ;;  %v659_v0 = vmul.f32 %v655_v58, %v1310_v4  ;;  %v660_v28 = vmul.f32 %v655_v58, %v1313_v6 }
 0x176   :  { %v661_v43 = vmul.f32 %v655_v58, %v1320_v10  ;;  %v662_v5 = vmul.f32 %v655_v58, %v1325_v14  ;;  %v663_v29 = vmul.f32 %v655_v58, %v1332_v16  ;;  %v664_v30 = vmul.f32 %v655_v58, %v1338_v37 }
 0x177   :  { %v665_v2 = vmul.f32 %v655_v58, %v1344_v23  ;;  %v666_v3 = vmul.f32 %v655_v58, %v1350_v27  ;;  %v667_v4 = vmul.f32 %v655_v58, %v1356_v45  ;;  %v668_v33 = vmul.f32 %v655_v58, %v588_v32 }
 0x178   :  { %v669_v6 = vmul.f32 %v655_v58, %v589_v35  ;;  %v670_v47 = vmul.f32 %v655_v58, %v590_v53  ;;  %v671_v10 = vmul.f32 %v655_v58, %v591_v34  ;;  %v672_v36 = vmul.f32 %v655_v58, %v592_v48 }
 0x179   :  { %v680_v14 = vadd.f32 %v847_v13, %v657_v24  ;;  %v681_v16 = vadd.f32 %v847_v13, %v658_v25  ;;  %v682_v26 = vadd.f32 %v847_v13, %v659_v0  ;;  %v683_v37 = vadd.f32 %v847_v13, %v660_v28 }
 0x17a   :  { %v684_v51 = vadd.f32 %v847_v13, %v661_v43  ;;  %v685_v39 = vadd.f32 %v847_v13, %v662_v5  ;;  %v686_v41 = vadd.f32 %v847_v13, %v663_v29  ;;  %v687_v42 = vadd.f32 %v847_v13, %v664_v30 }
 0x17b   :  { %v688_v55 = vadd.f32 %v847_v13, %v665_v2  ;;  %v689_v23 = vadd.f32 %v847_v13, %v666_v3  ;;  %v690_v44 = vadd.f32 %v847_v13, %v667_v4  ;;  %v691_v27 = vadd.f32 %v847_v13, %v668_v33 }
 0x17c   :  { %v692_v46 = vadd.f32 %v847_v13, %v669_v6  ;;  %v693_v45 = vadd.f32 %v847_v13, %v670_v47  ;;  %v694_v32 = vadd.f32 %v847_v13, %v671_v10  ;;  %v695_v35 = vadd.f32 %v847_v13, %v672_v36 }
 0x17d   :  { %v696_v53 = vmax.f32 %v680_v14, 0.0  ;;  %v697_v34 = vmax.f32 %v681_v16, 0.0  ;;  %v698_v48 = vmax.f32 %v682_v26, 0.0  ;;  %v699_v49 = vmax.f32 %v683_v37, 0.0 }
 0x17e   :  { %v700_v50 = vmax.f32 %v684_v51, 0.0  ;;  %v701_v52 = vmax.f32 %v685_v39, 0.0  ;;  %v702_v54 = vmax.f32 %v686_v41, 0.0  ;;  %v703_v56 = vmax.f32 %v687_v42, 0.0 }
 0x17f   :  { %v704_v38 = vmax.f32 %v688_v55, 0.0  ;;  %v705_v59 = vmax.f32 %v689_v23, 0.0  ;;  %v706_v61 = vmax.f32 %v690_v44, 0.0  ;;  %v707_v62 = vmax.f32 %v691_v27, 0.0 }
 0x180   :  { %v708_v40 = vmax.f32 %v692_v46, 0.0  ;;  %v709_v63 = vmax.f32 %v693_v45, 0.0  ;;  %v710_v60 = vmax.f32 %v694_v32, 0.0  ;;  %v711_v8 = vmax.f32 %v695_v35, 0.0 }
 0x181   :  { %v864_v9 = vpack.c.bf16 %v696_v53, %v696_v53  ;;  %v865_v57 = vpack.c.bf16 %v697_v34, %v697_v34  ;;  %v866_v1 = vpack.c.bf16 %v698_v48, %v698_v48  ;;  %v867_v7 = vpack.c.bf16 %v699_v49, %v699_v49 }
 0x182   :  { %v868_v11 = vpack.c.bf16 %v700_v50, %v700_v50  ;;  %v869_v18 = vpack.c.bf16 %v701_v52, %v701_v52  ;;  %v870_v12 = vpack.c.bf16 %v702_v54, %v702_v54  ;;  %v871_v15 = vpack.c.bf16 %v703_v56, %v703_v56 }
 0x183   :  { %v872_v31 = vpack.c.bf16 %v704_v38, %v704_v38  ;;  %v873_v17 = vpack.c.bf16 %v705_v59, %v705_v59  ;;  %v874_v19 = vpack.c.bf16 %v706_v61, %v706_v61  ;;  %v875_v20 = vpack.c.bf16 %v707_v62, %v707_v62  ;;  %777 = vst.msk [vmem:[%s1463_s5] sm:$0xf] %vm776_vm3, %v864_v9 }
 0x184   :  { %778 = vst.msk [vmem:[%s1463_s5 + $0x4] sm:$0xf] %vm776_vm3, %v865_v57  ;;  %779 = vst.msk [vmem:[%s1463_s5 + $0x8] sm:$0xf] %vm776_vm3, %v866_v1  ;;  %v876_v21 = vpack.c.bf16 %v708_v40, %v708_v40  ;;  %v877_v22 = vpack.c.bf16 %v709_v63, %v709_v63  ;;  %v878_v58 = vpack.c.bf16 %v710_v60, %v710_v60 }
 0x185   :  { %780 = vst.msk [vmem:[%s1463_s5 + $0xc] sm:$0xf] %vm776_vm3, %v867_v7  ;;  %v879_v24 = vpack.c.bf16 %v711_v8, %v711_v8  ;;  %781 = vst.msk [vmem:[%s1463_s5 + $0x10] sm:$0xf] %vm776_vm3, %v868_v11 }
 0x186   :  { %782 = vst.msk [vmem:[%s1463_s5 + $0x14] sm:$0xf] %vm776_vm3, %v869_v18  ;;  %783 = vst.msk [vmem:[%s1463_s5 + $0x18] sm:$0xf] %vm776_vm3, %v870_v12 }
 0x187   :  { %784 = vst.msk [vmem:[%s1463_s5 + $0x1c] sm:$0xf] %vm776_vm3, %v871_v15  ;;  %785 = vst.msk [vmem:[%s1463_s5 + $0x20] sm:$0xf] %vm776_vm3, %v872_v31 }
 0x188   :  { %786 = vst.msk [vmem:[%s1463_s5 + $0x24] sm:$0xf] %vm776_vm3, %v873_v17  ;;  %787 = vst.msk [vmem:[%s1463_s5 + $0x28] sm:$0xf] %vm776_vm3, %v874_v19 }
 0x189   :  { %788 = vst.msk [vmem:[%s1463_s5 + $0x2c] sm:$0xf] %vm776_vm3, %v875_v20  ;;  %789 = vst.msk [vmem:[%s1463_s5 + $0x30] sm:$0xf] %vm776_vm3, %v876_v21 }
 0x18a   :  { %790 = vst.msk [vmem:[%s1463_s5 + $0x34] sm:$0xf] %vm776_vm3, %v877_v22  ;;  %791 = vst.msk [vmem:[%s1463_s5 + $0x38] sm:$0xf] %vm776_vm3, %v878_v58 }
 0x18b   :  { %792 = vst.msk [vmem:[%s1463_s5 + $0x3c] sm:$0xf] %vm776_vm3, %v879_v24 }

// kernel: shrinkage_forward.8
= control target key start
LH: loop header
LB: loop body
LE: loop exit
PB: predicated region body
PF: predicated region fallthrough
CT: control target
= control target key end

     0   :  { %vm33_vm0 = vcmask 322560   ;;  %s87_s0 = inlined_call_operand.vmem [shape: bf16[9,8,40], index: 0, kind: input, shape index: {}]   ;;  %s88_s1 = inlined_call_operand.vmem [shape: bf16[8,40], index: 1, kind: output, shape index: {}]  }
   0x1   :  { %v8_v0 = vld [vmem:[%s87_s0] sm:$0xf]  ;;  %v39_v1 = vld [vmem:[%s87_s0 + $0x4] sm:$0xf]  ;;  %v40_v2 = vld [vmem:[%s87_s0 + $0x8] sm:$0xf] }
   0x2   :  { %v11_v3 = vmax.bf16 %v39_v1, %v8_v0  ;;  %v41_v4 = vld [vmem:[%s87_s0 + $0xc] sm:$0xf]  ;;  %v42_v6 = vld [vmem:[%s87_s0 + $0x10] sm:$0xf]  ;;  %v43_v8 = vld [vmem:[%s87_s0 + $0x14] sm:$0xf] }
   0x3   :  { %v44_v10 = vld [vmem:[%s87_s0 + $0x18] sm:$0xf]  ;;  %v45_v12 = vld [vmem:[%s87_s0 + $0x1c] sm:$0xf]  ;;  %v46_v14 = vld [vmem:[%s87_s0 + $0x20] sm:$0xf] }
   0x4   :  { %v14_v5 = vmax.bf16 %v40_v2, %v11_v3 }
   0x6   :  { %v17_v7 = vmax.bf16 %v41_v4, %v14_v5 }
   0x8   :  { %v20_v9 = vmax.bf16 %v42_v6, %v17_v7 }
   0xa   :  { %v23_v11 = vmax.bf16 %v43_v8, %v20_v9 }
   0xc   :  { %v26_v13 = vmax.bf16 %v44_v10, %v23_v11 }
   0xe   :  { %v29_v15 = vmax.bf16 %v45_v12, %v26_v13 }
  0x10   :  { %v32_v16 = vmax.bf16 %v46_v14, %v29_v15 }
  0x12   :  { %34 = vst.msk [vmem:[%s88_s1] sm:$0xf] %vm33_vm0, %v32_v16 }

// kernel: shrinkage_forward.9
= control target key start
LH: loop header
LB: loop body
LE: loop exit
PB: predicated region body
PF: predicated region fallthrough
CT: control target
= control target key end

     0   :  { %v458_v0 = vmov 0   ;;  %vm127_vm0 = vcmask 261120   ;;  %v459_v14 = vmov 0.0   ;;  %vm259_vm1 = vcmask 1045504   ;;  %s594_s1 = inlined_call_operand.vmem [shape: bf16[160,60], index: 1, kind: input, shape index: {}]   ;;  %s595_s0 = inlined_call_operand.vmem [shape: bf16[8,160], index: 0, kind: input, shape index: {}]   ;;  %s596_s5 = inlined_call_operand.vmem [shape: bf16[60,30], index: 5, kind: input, shape index: {}]   ;;  %s597_s7 = inlined_call_operand.vmem [shape: bf16[30,11], index: 7, kind: input, shape index: {}]   ;;  %s598_s2 = inlined_call_operand.vmem [shape: f32[1,60], index: 2, kind: input, shape index: {}]   ;;  %s599_s3 = inlined_call_operand.vmem [shape: f32[1,60], index: 3, kind: input, shape index: {}]   ;;  %s600_s4 = inlined_call_operand.vmem [shape: f32[1,60], index: 4, kind: input, shape index: {}]   ;;  %s601_s6 = inlined_call_operand.vmem [shape: f32[1,30], index: 6, kind: input, shape index: {}]   ;;  %s602_s8 = inlined_call_operand.vmem [shape: f32[1,11], index: 8, kind: input, shape index: {}]   ;;  %s603_s9 = inlined_call_operand.vmem [shape: f32[8,11], index: 9, kind: output, shape index: {}]  }
   0x1   :  { %131 = vmatprep.subr.bf16.mxu0 %v458_v0  ;;  %v438_v1 = vld [vmem:[%s594_s1 + $0x38] sm:$0xff]   ;;  %v439_v2 = vld [vmem:[%s594_s1 + $0x30] sm:$0xff]   ;;  %v440_v3 = vld [vmem:[%s594_s1 + $0x28] sm:$0xff]   ;;  %415 = vmatprep.subr.bf16.mxu1 %v459_v14  ;;  %vm460_vm2 = vmmov 0   ;;  %v171_v20 = vlaneseq  ;;  %vm177_vm4 = vcmask 490496   ;;  %vm331_vm5 = vcmask 1046528  }
   0x2   :  { %132 = vmatpush1.bf16.msra.mxu0 %v438_v1  ;;  %v441_v4 = vld [vmem:[%s594_s1 + $0x20] sm:$0xff]   ;;  %v442_v7 = vld [vmem:[%s594_s1 + $0x18] sm:$0xff]   ;;  %v443_v8 = vld [vmem:[%s594_s1 + $0x10] sm:$0xff]   ;;  %423 = vmatprep.mubr.msk.bf16.mxu1 %vm460_vm2, %v459_v14  ;;  %vm327_vm6 = vcmask 244736   ;;  %vm375_vm7 = vcmask 89088  }
   0x3   :  { %133 = vmatprep.subr.bf16.mxu0 %v458_v0  ;;  %v33_v5 = vld [vmem:[%s595_s0] sm:$0xff]  ;;  %v444_v9 = vld [vmem:[%s594_s1 + $0x8] sm:$0xff]   ;;  %v450_v15 = vld [vmem:[%s596_s5 + $0x18] sm:$0x3f]   ;;  %v172_v21 = vshrl.u32 %v171_v20, 7 }
   0x4   :  { %v383_v6 = vcombine.high %v33_v5, %v33_v5  ;;  %v445_v10 = vld [vmem:[%s594_s1] sm:$0xff]   ;;  %v446_v11 = vld [vmem:[%s594_s1 + $0x48] sm:$0xff]   ;;  %v382_v13 = vcombine.low %v33_v5, %v33_v5  ;;  %v261_v16 = vsel %vm259_vm1, %v450_v15, 0  ;;  %v451_v17 = vld [vmem:[%s596_s5 + $0x10] sm:$0xff]  }
   0x5   :  { %v447_v12 = vld [vmem:[%s594_s1 + $0x40] sm:$0xff]   ;;  %416 = vmatpush3.bf16.msra.mxu1 %v261_v16  ;;  %v452_v18 = vld [vmem:[%s596_s5 + $0x8] sm:$0xff]   ;;  %vm173_vm3 = vcmp.lt.s32.totalorder %v172_v21, 2  ;;  %v204_v51 = vsub.s32 0, %v172_v21 }
   0x6   :  { %134 = vmatpush1.bf16.msra.mxu0 %v439_v2  ;;  %394 = vmatprep.mubr.msk.bf16.mxu0 %vm127_vm0, %v383_v6  ;;  %v453_v19 = vld [vmem:[%s596_s5] sm:$0xff]   ;;  %v395_v24 = vsel %vm173_vm3, 1.0, %v459_v14  ;;  %v454_v58 = vld [vmem:[%s597_s7 + $0x8] sm:$0x7f]  }
   0x7   :  { %135 = vmatprep.subr.bf16.mxu0 %v458_v0  ;;  %417 = vmatprep.subr.bf16.mxu1 %v459_v14  ;;  %v381_v22 = vld [vmem:[%s598_s2] ss:$0 sm:$0xff]  ;;  %v333_v61 = vsel %vm331_vm5, %v454_v58, 0 }
   0x8   :  { %v197_v50 = vld [vmem:[%s599_s3] sm:$0x1] }
   0x9   :  { %418 = vmatpush3.bf16.msra.mxu1 %v451_v17  ;;  %v396_v55 = vld [vmem:[%s600_s4] ss:$0 sm:$0xff] }
   0xa   :  { %136 = vmatpush1.bf16.msra.mxu0 %v440_v3  ;;  %419 = vmatprep.subr.bf16.mxu1 %v459_v14  ;;  %v455_v62 = vld [vmem:[%s597_s7] sm:$0xff]  }
   0xb   :  { %137 = vmatprep.subr.bf16.mxu0 %v458_v0  ;;  %v397_v63 = vld [vmem:[%s601_s6] ss:$0 sm:$0xff] }
   0xd   :  { %420 = vmatpush3.bf16.msra.mxu1 %v452_v18 }
   0xe   :  { %138 = vmatpush1.bf16.msra.mxu0 %v441_v4  ;;  %421 = vmatprep.subr.bf16.mxu1 %v459_v14 }
   0xf   :  { %139 = vmatprep.subr.bf16.mxu0 %v458_v0 }
  0x11   :  { %422 = vmatpush3.bf16.msra.mxu1 %v453_v19 }
  0x12   :  { %140 = vmatpush1.bf16.msra.mxu0 %v442_v7  ;;  %427 = vmatprep.subr.bf16.mxu1 %v459_v14  ;;  %v403_v7 = vld [vmem:[%s602_s8] ss:$0 sm:$0xff] }
  0x13   :  { %141 = vmatprep.subr.bf16.mxu0 %v458_v0 }
  0x16   :  { %142 = vmatpush1.bf16.msra.mxu0 %v443_v8 }
  0x17   :  { %143 = vmatprep.subr.bf16.mxu0 %v458_v0 }
  0x1a   :  { %144 = vmatpush1.bf16.msra.mxu0 %v444_v9 }
  0x1b   :  { %145 = vmatprep.subr.bf16.mxu0 %v458_v0 }
  0x1e   :  { %146 = vmatpush1.bf16.msra.mxu0 %v445_v10 }
  0x1f   :  { %159 = vmatprep.subr.bf16.mxu0 %v458_v0 }
  0x22   :  { %160 = vmatpush2.bf16.msra.mxu0 %v446_v11 }
  0x23   :  { %161 = vmatprep.subr.bf16.mxu0 %v458_v0 }
  0x26   :  { %162 = vmatpush2.bf16.msra.mxu0 %v447_v12 }
  0x29   :  { %164 = vmatmul.mubr.bf16.vlgmr.msra.gmra.mxu0 %v382_v13 }
  0xe9   :  { %v165_v23 = vpop.f32.mrf.mxu0 }
  0xea   :  { %v166_v25 = vadd.f32 %v381_v22, %v165_v23 }
  0xeb   :  { %v167_v26 = vpop.f32.mrf.mxu0 }
  0xec   :  { %v176_v27 = vmul.f32 %v395_v24, %v166_v25 }
  0xed   :  { %v168_v28 = vpop.f32.mrf.mxu0 }
  0xee   :  { %v178_v29 = vsel %vm177_vm4, %v176_v27, 0.0 }
  0xef   :  { %v179_v30 = vrot.slane %v178_v29, 4  ;;  %v169_v31 = vpop.f32.mrf.mxu0 }
  0xf1   :  { %v180_v32 = vadd.f32 %v179_v30, %v178_v29 }
  0xf3   :  { %v181_v33 = vrot.slane %v180_v32, 2 }
  0xf5   :  { %v182_v34 = vadd.f32 %v181_v33, %v180_v32 }
  0xf7   :  { %v183_v35 = vrot.slane %v182_v34, 1 }
  0xf9   :  { %v184_v36 = vadd.f32 %v183_v35, %v182_v34 }
  0xfb   :  { %v185_v37 = vmul.f32 0.5, %v184_v36 }
  0xfd   :  { %v186_v38 = vsub.f32 %v166_v25, %v185_v37 }
  0xff   :  { %v187_v39 = vmul.f32 %v186_v38, %v186_v38 }
 0x101   :  { %v188_v40 = vmul.f32 %v395_v24, %v187_v39 }
 0x103   :  { %v189_v41 = vsel %vm177_vm4, %v188_v40, 0.0 }
 0x104   :  { %v190_v42 = vrot.slane %v189_v41, 4 }
 0x106   :  { %v191_v43 = vadd.f32 %v190_v42, %v189_v41 }
 0x108   :  { %v192_v44 = vrot.slane %v191_v43, 2 }
 0x10a   :  { %v193_v45 = vadd.f32 %v192_v44, %v191_v43 }
 0x10c   :  { %v194_v46 = vrot.slane %v193_v45, 1 }
 0x10e   :  { %v195_v47 = vadd.f32 %v194_v46, %v193_v45 }
 0x110   :  { %v196_v48 = vmul.f32 0.5, %v195_v47 }
 0x112   :  { %v198_v49 = vadd.f32 1e-05, %v196_v48 }
 0x114   :  { %456 = vrsqrt.f32 %v198_v49 }
 0x121   :  { %v457_v52 = vpop.eup %456 }
 0x122   :  { %v200_v53 = vmul.f32 %v457_v52, %v197_v50 }
 0x124   :  { %v205_v54 = vrot.slane %v200_v53, %v204_v51 }
 0x126   :  { %v207_v56 = vmul.f32 %v205_v54, %v186_v38 }
 0x128   :  { %v215_v57 = vadd.f32 %v396_v55, %v207_v56 }
 0x12a   :  { %v216_v59 = vmax.f32 %v215_v57, 0.0 }
 0x12c   :  { %v217_v60 = vpack.c.bf16 %v216_v59, %v216_v59 }
 0x12e   :  { %424 = vmatmul.mubr.msk.bf16.vlgmr.msra.gmra.mxu1 %vm177_vm4, %v217_v60 }
 0x12f   :  { %428 = vmatpush3.bf16.msra.mxu1 %v333_v61  ;;  %431 = vmatprep.mubr.msk.bf16.mxu1 %vm460_vm2, %v459_v14 }
 0x130   :  { %429 = vmatprep.subr.bf16.mxu1 %v459_v14 }
 0x133   :  { %430 = vmatpush3.bf16.msra.mxu1 %v455_v62 }
 0x1ee   :  { %v297_v0 = vpop.f32.mrf.mxu1 }
 0x1ef   :  { %v298_v1 = vadd.f32 %v397_v63, %v297_v0 }
 0x1f0   :  { %v425_v2 = vpop.f32.mrf.mxu1 }
 0x1f1   :  { %v303_v3 = vmax.f32 %v298_v1, 0.0 }
 0x1f2   :  { %v300_v4 = vpop.f32.mrf.mxu1 }
 0x1f3   :  { %v304_v5 = vpack.c.bf16 %v303_v3, %v303_v3 }
 0x1f4   :  { %v426_v6 = vpop.f32.mrf.mxu1 }
 0x1f5   :  { %432 = vmatmul.mubr.msk.bf16.vlgmr.msra.gmra.mxu1 %vm327_vm6, %v304_v5 }
 0x2b5   :  { %v369_v8 = vpop.f32.mrf.mxu1 }
 0x2b6   :  { %v370_v9 = vadd.f32 %v403_v7, %v369_v8 }
 0x2b7   :  { %v433_v10 = vpop.f32.mrf.mxu1 }
 0x2b8   :  { %376 = vst.msk [vmem:[%s603_s9] sm:$0xff] %vm375_vm7, %v370_v9 }
 0x2b9   :  { %v372_v11 = vpop.f32.mrf.mxu1 }
 0x2bb   :  { %v434_v12 = vpop.f32.mrf.mxu1 }

</bundles_post_ra>
